<compile_context>
chip_gen: v7x
topology: tpu7x:2x2x1
jax: 0.10.0
libtpu: 0.0.40
codegen_flags: <defaults>
</compile_context>

<pallas_src>
import numpy as np
import jax
import jax.numpy as jnp
from jax.experimental import pallas as pl
from jax.experimental.pallas import tpu as pltpu


# --------------------- host-side weight preparation (done once) ---------------------

def _conv_transpose1d_as_dense(w, l_in, stride=2, padding=1):
    """w: (Cin, Cout, K) PyTorch ConvTranspose1d weight -> dense (Cin*Lin, Cout*Lout)."""
    c_in, c_out, k = w.shape
    l_out = (l_in - 1) * stride - 2 * padding + k
    m = np.zeros((c_in * l_in, c_out * l_out), dtype=np.float32)
    cols = np.arange(c_out) * l_out
    for ci in range(c_in):
        for j in range(l_in):
            for kk in range(k):
                t = j * stride + kk - padding
                if 0 <= t < l_out:
                    m[ci * l_in + j, cols + t] += w[ci, :, kk]
    return m, l_out


def init_params(key, data_size, input_channel, latent_size, hidden_size, pred_steps):
    layer_num = int(np.log2(data_size)) - 3
    max_channel = data_size * 2
    final_size = 4
    keys = iter(jax.random.split(key, 64))

    def rnd(shape, scale=0.1):
        return scale * jax.random.normal(next(keys), shape, dtype=jnp.float32)

    params = {
        'lin1_w': rnd((latent_size, final_size * max_channel)),
        'lin1_b': rnd((final_size * max_channel,)),
    }

    convs = []
    prev_c = max_channel
    for i in range(layer_num):
        out_c = max_channel // 2 ** (i + 1)
        convs.append(dict(
            w=rnd((prev_c, out_c, 4)),
            b=rnd((out_c,)),
            gamma=jnp.ones((out_c,), jnp.float32),     # BatchNorm1d eval-mode defaults
            beta=jnp.zeros((out_c,), jnp.float32),
            mean=jnp.zeros((out_c,), jnp.float32),
            var=jnp.ones((out_c,), jnp.float32),
        ))
        prev_c = out_c
    params['convs'] = convs
    params['conv_last_w'] = rnd((prev_c, input_channel, 4))
    params['conv_last_b'] = rnd((input_channel,))

    lstm = []
    in_dim = input_channel
    for _ in range(2):   # num_layers = 2
        lstm.append(dict(
            w_ih=rnd((in_dim, 4 * hidden_size)),
            w_hh=rnd((hidden_size, 4 * hidden_size)),
            b=rnd((4 * hidden_size,)),                 # b_ih + b_hh folded together
        ))
        in_dim = hidden_size
    params['lstm'] = lstm

    params['pred_w'] = rnd((data_size * hidden_size, pred_steps * input_channel))
    params['pred_b'] = rnd((pred_steps * input_channel,))
    return params


def prepare_params(params, *, data_size, input_channel, hidden_size, pred_steps,
                   matmul_dtype=jnp.bfloat16):
    """Fold ConvT->dense, BatchNorm(eval), biases, and the permute into static matrices."""
    eps = 1e-5
    final_size = 4
    S, C, H, P = data_size, input_channel, hidden_size, pred_steps
    G = 4 * H

    def f32(a):
        return np.asarray(a, np.float32)

    lin_w = f32(params['lin1_w'])
    lin_b = f32(params['lin1_b']).reshape(1, -1)

    conv_ws, conv_bs = [], []
    l_in = final_size
    for layer in params['convs']:
        dense, l_out = _conv_transpose1d_as_dense(f32(layer['w']), l_in)
        bn_scale = f32(layer['gamma']) / np.sqrt(f32(layer['var']) + eps)
        bn_shift = f32(layer['beta']) - f32(layer['mean']) * bn_scale
        col_scale = np.repeat(bn_scale, l_out)
        col_shift = np.repeat(f32(layer['b']) * bn_scale + bn_shift, l_out)
        conv_ws.append(dense * col_scale[None, :])      # fold BN scale into the weights
        conv_bs.append(col_shift.reshape(1, -1))
        l_in = l_out

    last_dense, l_out = _conv_transpose1d_as_dense(f32(params['conv_last_w']), l_in)
    last_b = np.repeat(f32(params['conv_last_b']), l_out).reshape(1, -1)
    assert l_out == S, (l_out, S)

    # LSTM layer-1 input projection folded with the (B,C,L) -> (L,B,C) permute:
    #   proj1[b, s*G + j] = sum_c conv_out[b, c*S + s] * w_ih1[c, j] + b1[j]
    w_ih1 = f32(params['lstm'][0]['w_ih'])              # (C, 4H)
    b1 = f32(params['lstm'][0]['b'])                    # (4H,)
    seq_w = np.zeros((C * S, S * G), np.float32)
    rows_c = np.arange(C) * S
    for s in range(S):
        seq_w[rows_c + s, s * G:(s + 1) * G] = w_ih1
    seq_b = np.tile(b1, S).reshape(1, S * G)

    whh1 = f32(params['lstm'][0]['w_hh'])               # (H, 4H)
    wih2 = f32(params['lstm'][1]['w_ih'])               # (H, 4H)
    b2 = f32(params['lstm'][1]['b']).reshape(1, G)
    whh2 = f32(params['lstm'][1]['w_hh'])               # (H, 4H)

    pred_w = f32(params['pred_w'])                      # (S*H, P*C)
    pred_b = f32(params['pred_b']).reshape(1, -1)

    mm = lambda a: jnp.asarray(a, matmul_dtype)         # bf16 MXU operands (f32 accumulate)
    fp = lambda a: jnp.asarray(a, jnp.float32)

    inputs = (fp(lin_w), fp(lin_b),
              *[mm(w) for w in conv_ws], *[fp(b) for b in conv_bs],
              mm(last_dense), fp(last_b),
              mm(seq_w), fp(seq_b),
              fp(whh1), fp(wih2), fp(b2), fp(whh2),
              mm(pred_w), fp(pred_b))
    return dict(inputs=inputs, num_conv=len(conv_ws), S=S, C=C, H=H, P=P)


# --------------------------------- fused Pallas kernel ---------------------------------

def _make_fused_kernel(num_conv, S, B, H, G, PC):
    def kernel(*refs):
        z_ref, lin_w, lin_b = refs[0], refs[1], refs[2]
        conv_w = refs[3:3 + num_conv]
        conv_b = refs[3 + num_conv:3 + 2 * num_conv]
        (last_w, last_b, seq_w, seq_b,
         whh1_ref, wih2_ref, b2_ref, whh2_ref,
         pred_w, pred_b,
         o_ref,
         proj1, h1_hist, proj2, flat) = refs[3 + 2 * num_conv:]

        f32 = jnp.float32

        # Linear + ReLU (output is already the channel-major (C, L) flattening).
        x = jnp.dot(z_ref[...], lin_w[...], preferred_element_type=f32) + lin_b[...]
        x = jnp.maximum(x, 0.0)

        # ConvTranspose1d + BatchNorm(eval) + ReLU chain as dense MXU matmuls.
        for i in range(num_conv):
            w = conv_w[i][...]
            x = jnp.dot(x.astype(w.dtype), w, preferred_element_type=f32) + conv_b[i][...]
            x = jnp.maximum(x, 0.0)

        # Last ConvTranspose1d + Tanh -> (B, C*S).
        w = last_w[...]
        x = jnp.tanh(jnp.dot(x.astype(w.dtype), w, preferred_element_type=f32) + last_b[...])

        # LSTM layer-1 input projection for all S timesteps in ONE MXU matmul.
        w = seq_w[...]
        proj1[...] = jnp.dot(x.astype(w.dtype), w, preferred_element_type=f32) + seq_b[...]

        def cell(gates, c_prev):
            sg = jax.nn.sigmoid(gates)          # full 4H-wide EUP op
            th = jnp.tanh(gates)                # full 4H-wide EUP op
            i_g, f_g, o_g = sg[:, 0:H], sg[:, H:2 * H], sg[:, 3 * H:4 * H]
            g_g = th[:, 2 * H:3 * H]
            c_new = f_g * c_prev + i_g * g_g
            h_new = o_g * jnp.tanh(c_new)
            return h_new, c_new

        # Layer-1 recurrence, fully unrolled; only h @ W_hh is on the serial path.
        whh = whh1_ref[...]
        h = jnp.zeros((B, H), f32)
        c = jnp.zeros((B, H), f32)
        for s in range(S):
            gates = proj1[:, s * G:(s + 1) * G] + jnp.dot(h, whh, preferred_element_type=f32)
            h, c = cell(gates, c)
            h1_hist[s * B:(s + 1) * B, :] = h
        # TODO(synk): PyTorch dropout(0.4) between LSTM layers is training-only; skipped.

        # Layer-2 input projection over the whole layer-1 history in ONE MXU matmul.
        proj2[...] = jnp.dot(h1_hist[...], wih2_ref[...], preferred_element_type=f32) + b2_ref[...]

        # Layer-2 recurrence; scatter h directly into PyTorch's out.view(-1, S*H)
        # (time/batch interleaved) layout at static offsets.
        whh = whh2_ref[...]
        h = jnp.zeros((B, H), f32)
        c = jnp.zeros((B, H), f32)
        for s in range(S):
            gates = proj2[s * B:(s + 1) * B, :] + jnp.dot(h, whh, preferred_element_type=f32)
            h, c = cell(gates, c)
            for b in range(B):
                q = s * B + b
                row, col = q // S, (q % S) * H
                flat[row:row + 1, col:col + H] = h[b:b + 1, :]

        # Prediction head: lane-dense (B, S*H) @ (S*H, P*C).
        w = pred_w[...]
        pred = jnp.dot(flat[...].astype(w.dtype), w, preferred_element_type=f32) + pred_b[...]
        o_ref[...] = pred.astype(o_ref.dtype)

    return kernel


def bi_rnn_predictor2_forward(prepped, z):
    S, C, H, P = prepped['S'], prepped['C'], prepped['H'], prepped['P']
    num_conv = prepped['num_conv']
    B = z.shape[0]
    G = 4 * H
    PC = P * C
    vmem = pl.BlockSpec(memory_space=pltpu.MemorySpace.VMEM)
    n_in = 1 + len(prepped['inputs'])
    flat_out = pl.pallas_call(
        _make_fused_kernel(num_conv, S, B, H, G, PC),
        out_shape=jax.ShapeDtypeStruct((B, PC), jnp.float32),
        in_specs=[vmem] * n_in,
        out_specs=vmem,
        scratch_shapes=[
            pltpu.VMEM((B, S * G), jnp.float32),   # proj1: layer-1 input projections
            pltpu.VMEM((S * B, H), jnp.float32),   # layer-1 hidden-state history
            pltpu.VMEM((S * B, G), jnp.float32),   # proj2: layer-2 input projections
            pltpu.VMEM((B, S * H), jnp.float32),   # LSTM output in view(-1, S*H) layout
        ],
    )(z.astype(jnp.float32), *prepped['inputs'])
    return flat_out.reshape(B, P, C)


# ----------------------------- pure numpy reference (f32) -----------------------------

def _reference_forward(params, z, *, data_size, input_channel, hidden_size, pred_steps):
    eps = 1e-5
    final_size = 4
    zn = np.asarray(z, np.float32)
    B = zn.shape[0]
    x = np.maximum(zn @ np.asarray(params['lin1_w'], np.float32)
                   + np.asarray(params['lin1_b'], np.float32), 0.0)
    x = x.reshape(B, data_size * 2, final_size)

    def convT(x, w, b, stride=2, padding=1):
        Bn, Cin, Lin = x.shape
        _, Cout, K = w.shape
        Lout = (Lin - 1) * stride - 2 * padding + K
        y = np.zeros((Bn, Cout, Lout), np.float32)
        for j in range(Lin):
            for kk in range(K):
                t = j * stride + kk - padding
                if 0 <= t < Lout:
                    y[:, :, t] += np.einsum('bi,io->bo', x[:, :, j], w[:, :, kk])
        return y + b[None, :, None]

    for layer in params['convs']:
        x = convT(x, np.asarray(layer['w'], np.float32), np.asarray(layer['b'], np.float32))
        scale = np.asarray(layer['gamma'], np.float32) / np.sqrt(np.asarray(layer['var'], np.float32) + eps)
        x = (x - np.asarray(layer['mean'], np.float32)[None, :, None]) * scale[None, :, None] \
            + np.asarray(layer['beta'], np.float32)[None, :, None]
        x = np.maximum(x, 0.0)
    x = np.tanh(convT(x, np.asarray(params['conv_last_w'], np.float32),
                      np.asarray(params['conv_last_b'], np.float32)))

    out = np.transpose(x, (2, 0, 1))                       # (S, B, C)
    S, H = data_size, hidden_size
    for layer in params['lstm']:
        w_ih = np.asarray(layer['w_ih'], np.float32)
        w_hh = np.asarray(layer['w_hh'], np.float32)
        bias = np.asarray(layer['b'], np.float32)
        h = np.zeros((out.shape[1], H), np.float32)
        c = np.zeros((out.shape[1], H), np.float32)
        ys = []
        for s in range(S):
            g = out[s] @ w_ih + h @ w_hh + bias
            i_g = 1.0 / (1.0 + np.exp(-g[:, 0:H]))
            f_g = 1.0 / (1.0 + np.exp(-g[:, H:2 * H]))
            g_g = np.tanh(g[:, 2 * H:3 * H])
            o_g = 1.0 / (1.0 + np.exp(-g[:, 3 * H:4 * H]))
            c = f_g * c + i_g * g_g
            h = o_g * np.tanh(c)
            ys.append(h)
        out = np.stack(ys, axis=0)                         # (S, B, H)
    flat = out.reshape(-1, S * H)                          # PyTorch .view(-1, S*H)
    pred = flat @ np.asarray(params['pred_w'], np.float32) + np.asarray(params['pred_b'], np.float32)
    return pred.reshape(-1, pred_steps, input_channel)


# --------------------------------------- main ---------------------------------------

if __name__ == "__main__":
    data_size = 16        # window_size; layer_num = log2(16) - 3 = 1
    input_channel = 4
    latent_size = 8
    hidden_size = 32
    pred_steps = 8
    batch = 2

    key = jax.random.PRNGKey(0)
    pkey, zkey = jax.random.split(key)
    params = init_params(pkey, data_size, input_channel, latent_size, hidden_size, pred_steps)
    prepped = prepare_params(params, data_size=data_size, input_channel=input_channel,
                             hidden_size=hidden_size, pred_steps=pred_steps)
    z = jax.random.normal(zkey, (batch, latent_size), dtype=jnp.float32)

    pred_seq = bi_rnn_predictor2_forward(prepped, z)
    pred_seq = jax.block_until_ready(pred_seq)

    assert pred_seq.shape == (batch, pred_steps, input_channel), pred_seq.shape
    assert bool(jnp.all(jnp.isfinite(pred_seq)))

    ref = _reference_forward(params, z, data_size=data_size, input_channel=input_channel,
                             hidden_size=hidden_size, pred_steps=pred_steps)
    np.testing.assert_allclose(np.asarray(pred_seq), ref, rtol=5e-2, atol=5e-2)

    print("KERNEL_OK")
</pallas_src>

<mosaic_0001>
module attributes {stable_mosaic.version = 11 : i64} {
  func.func @kernel(%arg0: memref<2x8xf32, #tpu.memory_space<vmem>>, %arg1: memref<8x128xf32, #tpu.memory_space<vmem>>, %arg2: memref<1x128xf32, #tpu.memory_space<vmem>>, %arg3: memref<128x128xbf16, #tpu.memory_space<vmem>>, %arg4: memref<1x128xf32, #tpu.memory_space<vmem>>, %arg5: memref<128x64xbf16, #tpu.memory_space<vmem>>, %arg6: memref<1x64xf32, #tpu.memory_space<vmem>>, %arg7: memref<64x2048xbf16, #tpu.memory_space<vmem>>, %arg8: memref<1x2048xf32, #tpu.memory_space<vmem>>, %arg9: memref<32x128xf32, #tpu.memory_space<vmem>>, %arg10: memref<32x128xf32, #tpu.memory_space<vmem>>, %arg11: memref<1x128xf32, #tpu.memory_space<vmem>>, %arg12: memref<32x128xf32, #tpu.memory_space<vmem>>, %arg13: memref<512x32xbf16, #tpu.memory_space<vmem>>, %arg14: memref<1x32xf32, #tpu.memory_space<vmem>>, %arg15: memref<2x32xf32, #tpu.memory_space<vmem>>, %arg16: memref<2x2048xf32, #tpu.memory_space<vmem>>, %arg17: memref<32x32xf32, #tpu.memory_space<vmem>>, %arg18: memref<32x128xf32, #tpu.memory_space<vmem>>, %arg19: memref<2x512xf32, #tpu.memory_space<vmem>>) attributes {dimension_semantics = [], scalar_prefetch = 0 : i64, scratch_operands = 4 : i64, tpu.core_type = #tpu.core_type<tc>} {
    %c0 = arith.constant 0 : index
    %c0_0 = arith.constant 0 : index
    %0 = vector.load %arg0[%c0, %c0_0] : memref<2x8xf32, #tpu.memory_space<vmem>>, vector<2x8xf32>
    %c0_1 = arith.constant 0 : index
    %c0_2 = arith.constant 0 : index
    %1 = vector.load %arg1[%c0_1, %c0_2] : memref<8x128xf32, #tpu.memory_space<vmem>>, vector<8x128xf32>
    %cst = arith.constant dense<0.000000e+00> : vector<2x128xf32>
    %2 = tpu.matmul %0, %1, %cst {dimension_numbers = #tpu.dot_dimension_numbers<[1], [0], [0], [1], [0, 0, 1, 1], [], []>} : vector<2x8xf32>, vector<8x128xf32>, vector<2x128xf32> -> vector<2x128xf32>
    %c0_3 = arith.constant 0 : index
    %c0_4 = arith.constant 0 : index
    %3 = vector.load %arg2[%c0_3, %c0_4] : memref<1x128xf32, #tpu.memory_space<vmem>>, vector<1x128xf32>
    %4 = vector.broadcast %3 : vector<1x128xf32> to vector<2x128xf32>
    %5 = arith.addf %2, %4 : vector<2x128xf32>
    %cst_5 = arith.constant 0.000000e+00 : f32
    %6 = vector.broadcast %cst_5 : f32 to vector<2x128xf32>
    %7 = arith.maximumf %5, %6 : vector<2x128xf32>
    %c0_6 = arith.constant 0 : index
    %c0_7 = arith.constant 0 : index
    %8 = vector.load %arg3[%c0_6, %c0_7] : memref<128x128xbf16, #tpu.memory_space<vmem>>, vector<128x128xbf16>
    %9 = arith.truncf %7 : vector<2x128xf32> to vector<2x128xbf16>
    %cst_8 = arith.constant dense<0.000000e+00> : vector<2x128xf32>
    %10 = tpu.matmul %9, %8, %cst_8 {dimension_numbers = #tpu.dot_dimension_numbers<[1], [0], [0], [1], [0, 0, 1, 1], [], []>} : vector<2x128xbf16>, vector<128x128xbf16>, vector<2x128xf32> -> vector<2x128xf32>
    %c0_9 = arith.constant 0 : index
    %c0_10 = arith.constant 0 : index
    %11 = vector.load %arg4[%c0_9, %c0_10] : memref<1x128xf32, #tpu.memory_space<vmem>>, vector<1x128xf32>
    %12 = vector.broadcast %11 : vector<1x128xf32> to vector<2x128xf32>
    %13 = arith.addf %10, %12 : vector<2x128xf32>
    %cst_11 = arith.constant 0.000000e+00 : f32
    %14 = vector.broadcast %cst_11 : f32 to vector<2x128xf32>
    %15 = arith.maximumf %13, %14 : vector<2x128xf32>
    %c0_12 = arith.constant 0 : index
    %c0_13 = arith.constant 0 : index
    %16 = vector.load %arg5[%c0_12, %c0_13] : memref<128x64xbf16, #tpu.memory_space<vmem>>, vector<128x64xbf16>
    %17 = arith.truncf %15 : vector<2x128xf32> to vector<2x128xbf16>
    %cst_14 = arith.constant dense<0.000000e+00> : vector<2x64xf32>
    %18 = tpu.matmul %17, %16, %cst_14 {dimension_numbers = #tpu.dot_dimension_numbers<[1], [0], [0], [1], [0, 0, 1, 1], [], []>} : vector<2x128xbf16>, vector<128x64xbf16>, vector<2x64xf32> -> vector<2x64xf32>
    %c0_15 = arith.constant 0 : index
    %c0_16 = arith.constant 0 : index
    %19 = vector.load %arg6[%c0_15, %c0_16] : memref<1x64xf32, #tpu.memory_space<vmem>>, vector<1x64xf32>
    %20 = vector.broadcast %19 : vector<1x64xf32> to vector<2x64xf32>
    %21 = arith.addf %18, %20 : vector<2x64xf32>
    %22 = math.tanh %21 : vector<2x64xf32>
    %c0_17 = arith.constant 0 : index
    %c0_18 = arith.constant 0 : index
    %23 = vector.load %arg7[%c0_17, %c0_18] : memref<64x2048xbf16, #tpu.memory_space<vmem>>, vector<64x2048xbf16>
    %24 = arith.truncf %22 : vector<2x64xf32> to vector<2x64xbf16>
    %cst_19 = arith.constant dense<0.000000e+00> : vector<2x2048xf32>
    %25 = tpu.matmul %24, %23, %cst_19 {dimension_numbers = #tpu.dot_dimension_numbers<[1], [0], [0], [1], [0, 0, 1, 1], [], []>} : vector<2x64xbf16>, vector<64x2048xbf16>, vector<2x2048xf32> -> vector<2x2048xf32>
    %c0_20 = arith.constant 0 : index
    %c0_21 = arith.constant 0 : index
    %26 = vector.load %arg8[%c0_20, %c0_21] : memref<1x2048xf32, #tpu.memory_space<vmem>>, vector<1x2048xf32>
    %27 = vector.broadcast %26 : vector<1x2048xf32> to vector<2x2048xf32>
    %28 = arith.addf %25, %27 : vector<2x2048xf32>
    %c0_22 = arith.constant 0 : index
    %c0_23 = arith.constant 0 : index
    %29 = vector.load %arg16[%c0_22, %c0_23] : memref<2x2048xf32, #tpu.memory_space<vmem>>, vector<2x2048xf32>
    tpu.vector_store %arg16[%c0_22, %c0_23], %28 {strides = array<i32>} : memref<2x2048xf32, #tpu.memory_space<vmem>>, vector<2x2048xf32>,
    %c0_24 = arith.constant 0 : index
    %c0_25 = arith.constant 0 : index
    %30 = vector.load %arg9[%c0_24, %c0_25] : memref<32x128xf32, #tpu.memory_space<vmem>>, vector<32x128xf32>
    %cst_26 = arith.constant 0.000000e+00 : f32
    %31 = vector.broadcast %cst_26 : f32 to vector<2x32xf32>
    %cst_27 = arith.constant 0.000000e+00 : f32
    %32 = vector.broadcast %cst_27 : f32 to vector<2x32xf32>
    %c0_28 = arith.constant 0 : index
    %c0_29 = arith.constant 0 : index
    %33 = vector.load %arg16[%c0_28, %c0_29] : memref<2x2048xf32, #tpu.memory_space<vmem>>, vector<2x128xf32>
    %cst_30 = arith.constant dense<0.000000e+00> : vector<2x128xf32>
    %34 = tpu.matmul %31, %30, %cst_30 {dimension_numbers = #tpu.dot_dimension_numbers<[1], [0], [0], [1], [0, 0, 1, 1], [], []>} : vector<2x32xf32>, vector<32x128xf32>, vector<2x128xf32> -> vector<2x128xf32>
    %35 = arith.addf %33, %34 : vector<2x128xf32>
    %36 = arith.negf %35 : vector<2x128xf32>
    %37 = math.exp %36 : vector<2x128xf32>
    %cst_31 = arith.constant 1.000000e+00 : f32
    %38 = vector.broadcast %cst_31 : f32 to vector<2x128xf32>
    %39 = arith.addf %38, %37 : vector<2x128xf32>
    %40 = arith.divf %38, %39 : vector<2x128xf32>
    %41 = math.tanh %35 : vector<2x128xf32>
    %42 = vector.extract_strided_slice %40 {offsets = [0, 0], sizes = [2, 32], strides = [1, 1]} : vector<2x128xf32> to vector<2x32xf32>
    %43 = vector.extract_strided_slice %40 {offsets = [0, 32], sizes = [2, 32], strides = [1, 1]} : vector<2x128xf32> to vector<2x32xf32>
    %44 = vector.extract_strided_slice %40 {offsets = [0, 96], sizes = [2, 32], strides = [1, 1]} : vector<2x128xf32> to vector<2x32xf32>
    %45 = vector.extract_strided_slice %41 {offsets = [0, 64], sizes = [2, 32], strides = [1, 1]} : vector<2x128xf32> to vector<2x32xf32>
    %46 = arith.mulf %43, %32 : vector<2x32xf32>
    %47 = arith.mulf %42, %45 : vector<2x32xf32>
    %48 = arith.addf %46, %47 : vector<2x32xf32>
    %49 = math.tanh %48 : vector<2x32xf32>
    %50 = arith.mulf %44, %49 : vector<2x32xf32>
    %c0_32 = arith.constant 0 : index
    %c0_33 = arith.constant 0 : index
    %51 = vector.load %arg17[%c0_32, %c0_33] : memref<32x32xf32, #tpu.memory_space<vmem>>, vector<2x32xf32>
    tpu.vector_store %arg17[%c0_32, %c0_33], %50 {strides = array<i32>} : memref<32x32xf32, #tpu.memory_space<vmem>>, vector<2x32xf32>,
    %c0_34 = arith.constant 0 : index
    %c128 = arith.constant 128 : index
    %52 = vector.load %arg16[%c0_34, %c128] : memref<2x2048xf32, #tpu.memory_space<vmem>>, vector<2x128xf32>
    %cst_35 = arith.constant dense<0.000000e+00> : vector<2x128xf32>
    %53 = tpu.matmul %50, %30, %cst_35 {dimension_numbers = #tpu.dot_dimension_numbers<[1], [0], [0], [1], [0, 0, 1, 1], [], []>} : vector<2x32xf32>, vector<32x128xf32>, vector<2x128xf32> -> vector<2x128xf32>
    %54 = arith.addf %52, %53 : vector<2x128xf32>
    %55 = arith.negf %54 : vector<2x128xf32>
    %56 = math.exp %55 : vector<2x128xf32>
    %cst_36 = arith.constant 1.000000e+00 : f32
    %57 = vector.broadcast %cst_36 : f32 to vector<2x128xf32>
    %58 = arith.addf %57, %56 : vector<2x128xf32>
    %59 = arith.divf %57, %58 : vector<2x128xf32>
    %60 = math.tanh %54 : vector<2x128xf32>
    %61 = vector.extract_strided_slice %59 {offsets = [0, 0], sizes = [2, 32], strides = [1, 1]} : vector<2x128xf32> to vector<2x32xf32>
    %62 = vector.extract_strided_slice %59 {offsets = [0, 32], sizes = [2, 32], strides = [1, 1]} : vector<2x128xf32> to vector<2x32xf32>
    %63 = vector.extract_strided_slice %59 {offsets = [0, 96], sizes = [2, 32], strides = [1, 1]} : vector<2x128xf32> to vector<2x32xf32>
    %64 = vector.extract_strided_slice %60 {offsets = [0, 64], sizes = [2, 32], strides = [1, 1]} : vector<2x128xf32> to vector<2x32xf32>
    %65 = arith.mulf %62, %48 : vector<2x32xf32>
    %66 = arith.mulf %61, %64 : vector<2x32xf32>
    %67 = arith.addf %65, %66 : vector<2x32xf32>
    %68 = math.tanh %67 : vector<2x32xf32>
    %69 = arith.mulf %63, %68 : vector<2x32xf32>
    %c2 = arith.constant 2 : index
    %c0_37 = arith.constant 0 : index
    %70 = vector.load %arg17[%c2, %c0_37] : memref<32x32xf32, #tpu.memory_space<vmem>>, vector<2x32xf32>
    tpu.vector_store %arg17[%c2, %c0_37], %69 {strides = array<i32>} : memref<32x32xf32, #tpu.memory_space<vmem>>, vector<2x32xf32>,
    %c0_38 = arith.constant 0 : index
    %c256 = arith.constant 256 : index
    %71 = vector.load %arg16[%c0_38, %c256] : memref<2x2048xf32, #tpu.memory_space<vmem>>, vector<2x128xf32>
    %cst_39 = arith.constant dense<0.000000e+00> : vector<2x128xf32>
    %72 = tpu.matmul %69, %30, %cst_39 {dimension_numbers = #tpu.dot_dimension_numbers<[1], [0], [0], [1], [0, 0, 1, 1], [], []>} : vector<2x32xf32>, vector<32x128xf32>, vector<2x128xf32> -> vector<2x128xf32>
    %73 = arith.addf %71, %72 : vector<2x128xf32>
    %74 = arith.negf %73 : vector<2x128xf32>
    %75 = math.exp %74 : vector<2x128xf32>
    %cst_40 = arith.constant 1.000000e+00 : f32
    %76 = vector.broadcast %cst_40 : f32 to vector<2x128xf32>
    %77 = arith.addf %76, %75 : vector<2x128xf32>
    %78 = arith.divf %76, %77 : vector<2x128xf32>
    %79 = math.tanh %73 : vector<2x128xf32>
    %80 = vector.extract_strided_slice %78 {offsets = [0, 0], sizes = [2, 32], strides = [1, 1]} : vector<2x128xf32> to vector<2x32xf32>
    %81 = vector.extract_strided_slice %78 {offsets = [0, 32], sizes = [2, 32], strides = [1, 1]} : vector<2x128xf32> to vector<2x32xf32>
    %82 = vector.extract_strided_slice %78 {offsets = [0, 96], sizes = [2, 32], strides = [1, 1]} : vector<2x128xf32> to vector<2x32xf32>
    %83 = vector.extract_strided_slice %79 {offsets = [0, 64], sizes = [2, 32], strides = [1, 1]} : vector<2x128xf32> to vector<2x32xf32>
    %84 = arith.mulf %81, %67 : vector<2x32xf32>
    %85 = arith.mulf %80, %83 : vector<2x32xf32>
    %86 = arith.addf %84, %85 : vector<2x32xf32>
    %87 = math.tanh %86 : vector<2x32xf32>
    %88 = arith.mulf %82, %87 : vector<2x32xf32>
    %c4 = arith.constant 4 : index
    %c0_41 = arith.constant 0 : index
    %89 = vector.load %arg17[%c4, %c0_41] : memref<32x32xf32, #tpu.memory_space<vmem>>, vector<2x32xf32>
    tpu.vector_store %arg17[%c4, %c0_41], %88 {strides = array<i32>} : memref<32x32xf32, #tpu.memory_space<vmem>>, vector<2x32xf32>,
    %c0_42 = arith.constant 0 : index
    %c384 = arith.constant 384 : index
    %90 = vector.load %arg16[%c0_42, %c384] : memref<2x2048xf32, #tpu.memory_space<vmem>>, vector<2x128xf32>
    %cst_43 = arith.constant dense<0.000000e+00> : vector<2x128xf32>
    %91 = tpu.matmul %88, %30, %cst_43 {dimension_numbers = #tpu.dot_dimension_numbers<[1], [0], [0], [1], [0, 0, 1, 1], [], []>} : vector<2x32xf32>, vector<32x128xf32>, vector<2x128xf32> -> vector<2x128xf32>
    %92 = arith.addf %90, %91 : vector<2x128xf32>
    %93 = arith.negf %92 : vector<2x128xf32>
    %94 = math.exp %93 : vector<2x128xf32>
    %cst_44 = arith.constant 1.000000e+00 : f32
    %95 = vector.broadcast %cst_44 : f32 to vector<2x128xf32>
    %96 = arith.addf %95, %94 : vector<2x128xf32>
    %97 = arith.divf %95, %96 : vector<2x128xf32>
    %98 = math.tanh %92 : vector<2x128xf32>
    %99 = vector.extract_strided_slice %97 {offsets = [0, 0], sizes = [2, 32], strides = [1, 1]} : vector<2x128xf32> to vector<2x32xf32>
    %100 = vector.extract_strided_slice %97 {offsets = [0, 32], sizes = [2, 32], strides = [1, 1]} : vector<2x128xf32> to vector<2x32xf32>
    %101 = vector.extract_strided_slice %97 {offsets = [0, 96], sizes = [2, 32], strides = [1, 1]} : vector<2x128xf32> to vector<2x32xf32>
    %102 = vector.extract_strided_slice %98 {offsets = [0, 64], sizes = [2, 32], strides = [1, 1]} : vector<2x128xf32> to vector<2x32xf32>
    %103 = arith.mulf %100, %86 : vector<2x32xf32>
    %104 = arith.mulf %99, %102 : vector<2x32xf32>
    %105 = arith.addf %103, %104 : vector<2x32xf32>
    %106 = math.tanh %105 : vector<2x32xf32>
    %107 = arith.mulf %101, %106 : vector<2x32xf32>
    %c6 = arith.constant 6 : index
    %c0_45 = arith.constant 0 : index
    %108 = vector.load %arg17[%c6, %c0_45] : memref<32x32xf32, #tpu.memory_space<vmem>>, vector<2x32xf32>
    tpu.vector_store %arg17[%c6, %c0_45], %107 {strides = array<i32>} : memref<32x32xf32, #tpu.memory_space<vmem>>, vector<2x32xf32>,
    %c0_46 = arith.constant 0 : index
    %c512 = arith.constant 512 : index
    %109 = vector.load %arg16[%c0_46, %c512] : memref<2x2048xf32, #tpu.memory_space<vmem>>, vector<2x128xf32>
    %cst_47 = arith.constant dense<0.000000e+00> : vector<2x128xf32>
    %110 = tpu.matmul %107, %30, %cst_47 {dimension_numbers = #tpu.dot_dimension_numbers<[1], [0], [0], [1], [0, 0, 1, 1], [], []>} : vector<2x32xf32>, vector<32x128xf32>, vector<2x128xf32> -> vector<2x128xf32>
    %111 = arith.addf %109, %110 : vector<2x128xf32>
    %112 = arith.negf %111 : vector<2x128xf32>
    %113 = math.exp %112 : vector<2x128xf32>
    %cst_48 = arith.constant 1.000000e+00 : f32
    %114 = vector.broadcast %cst_48 : f32 to vector<2x128xf32>
    %115 = arith.addf %114, %113 : vector<2x128xf32>
    %116 = arith.divf %114, %115 : vector<2x128xf32>
    %117 = math.tanh %111 : vector<2x128xf32>
    %118 = vector.extract_strided_slice %116 {offsets = [0, 0], sizes = [2, 32], strides = [1, 1]} : vector<2x128xf32> to vector<2x32xf32>
    %119 = vector.extract_strided_slice %116 {offsets = [0, 32], sizes = [2, 32], strides = [1, 1]} : vector<2x128xf32> to vector<2x32xf32>
    %120 = vector.extract_strided_slice %116 {offsets = [0, 96], sizes = [2, 32], strides = [1, 1]} : vector<2x128xf32> to vector<2x32xf32>
    %121 = vector.extract_strided_slice %117 {offsets = [0, 64], sizes = [2, 32], strides = [1, 1]} : vector<2x128xf32> to vector<2x32xf32>
    %122 = arith.mulf %119, %105 : vector<2x32xf32>
    %123 = arith.mulf %118, %121 : vector<2x32xf32>
    %124 = arith.addf %122, %123 : vector<2x32xf32>
    %125 = math.tanh %124 : vector<2x32xf32>
    %126 = arith.mulf %120, %125 : vector<2x32xf32>
    %c8 = arith.constant 8 : index
    %c0_49 = arith.constant 0 : index
    %127 = vector.load %arg17[%c8, %c0_49] : memref<32x32xf32, #tpu.memory_space<vmem>>, vector<2x32xf32>
    tpu.vector_store %arg17[%c8, %c0_49], %126 {strides = array<i32>} : memref<32x32xf32, #tpu.memory_space<vmem>>, vector<2x32xf32>,
    %c0_50 = arith.constant 0 : index
    %c640 = arith.constant 640 : index
    %128 = vector.load %arg16[%c0_50, %c640] : memref<2x2048xf32, #tpu.memory_space<vmem>>, vector<2x128xf32>
    %cst_51 = arith.constant dense<0.000000e+00> : vector<2x128xf32>
    %129 = tpu.matmul %126, %30, %cst_51 {dimension_numbers = #tpu.dot_dimension_numbers<[1], [0], [0], [1], [0, 0, 1, 1], [], []>} : vector<2x32xf32>, vector<32x128xf32>, vector<2x128xf32> -> vector<2x128xf32>
    %130 = arith.addf %128, %129 : vector<2x128xf32>
    %131 = arith.negf %130 : vector<2x128xf32>
    %132 = math.exp %131 : vector<2x128xf32>
    %cst_52 = arith.constant 1.000000e+00 : f32
    %133 = vector.broadcast %cst_52 : f32 to vector<2x128xf32>
    %134 = arith.addf %133, %132 : vector<2x128xf32>
    %135 = arith.divf %133, %134 : vector<2x128xf32>
    %136 = math.tanh %130 : vector<2x128xf32>
    %137 = vector.extract_strided_slice %135 {offsets = [0, 0], sizes = [2, 32], strides = [1, 1]} : vector<2x128xf32> to vector<2x32xf32>
    %138 = vector.extract_strided_slice %135 {offsets = [0, 32], sizes = [2, 32], strides = [1, 1]} : vector<2x128xf32> to vector<2x32xf32>
    %139 = vector.extract_strided_slice %135 {offsets = [0, 96], sizes = [2, 32], strides = [1, 1]} : vector<2x128xf32> to vector<2x32xf32>
    %140 = vector.extract_strided_slice %136 {offsets = [0, 64], sizes = [2, 32], strides = [1, 1]} : vector<2x128xf32> to vector<2x32xf32>
    %141 = arith.mulf %138, %124 : vector<2x32xf32>
    %142 = arith.mulf %137, %140 : vector<2x32xf32>
    %143 = arith.addf %141, %142 : vector<2x32xf32>
    %144 = math.tanh %143 : vector<2x32xf32>
    %145 = arith.mulf %139, %144 : vector<2x32xf32>
    %c10 = arith.constant 10 : index
    %c0_53 = arith.constant 0 : index
    %146 = vector.load %arg17[%c10, %c0_53] : memref<32x32xf32, #tpu.memory_space<vmem>>, vector<2x32xf32>
    tpu.vector_store %arg17[%c10, %c0_53], %145 {strides = array<i32>} : memref<32x32xf32, #tpu.memory_space<vmem>>, vector<2x32xf32>,
    %c0_54 = arith.constant 0 : index
    %c768 = arith.constant 768 : index
    %147 = vector.load %arg16[%c0_54, %c768] : memref<2x2048xf32, #tpu.memory_space<vmem>>, vector<2x128xf32>
    %cst_55 = arith.constant dense<0.000000e+00> : vector<2x128xf32>
    %148 = tpu.matmul %145, %30, %cst_55 {dimension_numbers = #tpu.dot_dimension_numbers<[1], [0], [0], [1], [0, 0, 1, 1], [], []>} : vector<2x32xf32>, vector<32x128xf32>, vector<2x128xf32> -> vector<2x128xf32>
    %149 = arith.addf %147, %148 : vector<2x128xf32>
    %150 = arith.negf %149 : vector<2x128xf32>
    %151 = math.exp %150 : vector<2x128xf32>
    %cst_56 = arith.constant 1.000000e+00 : f32
    %152 = vector.broadcast %cst_56 : f32 to vector<2x128xf32>
    %153 = arith.addf %152, %151 : vector<2x128xf32>
    %154 = arith.divf %152, %153 : vector<2x128xf32>
    %155 = math.tanh %149 : vector<2x128xf32>
    %156 = vector.extract_strided_slice %154 {offsets = [0, 0], sizes = [2, 32], strides = [1, 1]} : vector<2x128xf32> to vector<2x32xf32>
    %157 = vector.extract_strided_slice %154 {offsets = [0, 32], sizes = [2, 32], strides = [1, 1]} : vector<2x128xf32> to vector<2x32xf32>
    %158 = vector.extract_strided_slice %154 {offsets = [0, 96], sizes = [2, 32], strides = [1, 1]} : vector<2x128xf32> to vector<2x32xf32>
    %159 = vector.extract_strided_slice %155 {offsets = [0, 64], sizes = [2, 32], strides = [1, 1]} : vector<2x128xf32> to vector<2x32xf32>
    %160 = arith.mulf %157, %143 : vector<2x32xf32>
    %161 = arith.mulf %156, %159 : vector<2x32xf32>
    %162 = arith.addf %160, %161 : vector<2x32xf32>
    %163 = math.tanh %162 : vector<2x32xf32>
    %164 = arith.mulf %158, %163 : vector<2x32xf32>
    %c12 = arith.constant 12 : index
    %c0_57 = arith.constant 0 : index
    %165 = vector.load %arg17[%c12, %c0_57] : memref<32x32xf32, #tpu.memory_space<vmem>>, vector<2x32xf32>
    tpu.vector_store %arg17[%c12, %c0_57], %164 {strides = array<i32>} : memref<32x32xf32, #tpu.memory_space<vmem>>, vector<2x32xf32>,
    %c0_58 = arith.constant 0 : index
    %c896 = arith.constant 896 : index
    %166 = vector.load %arg16[%c0_58, %c896] : memref<2x2048xf32, #tpu.memory_space<vmem>>, vector<2x128xf32>
    %cst_59 = arith.constant dense<0.000000e+00> : vector<2x128xf32>
    %167 = tpu.matmul %164, %30, %cst_59 {dimension_numbers = #tpu.dot_dimension_numbers<[1], [0], [0], [1], [0, 0, 1, 1], [], []>} : vector<2x32xf32>, vector<32x128xf32>, vector<2x128xf32> -> vector<2x128xf32>
    %168 = arith.addf %166, %167 : vector<2x128xf32>
    %169 = arith.negf %168 : vector<2x128xf32>
    %170 = math.exp %169 : vector<2x128xf32>
    %cst_60 = arith.constant 1.000000e+00 : f32
    %171 = vector.broadcast %cst_60 : f32 to vector<2x128xf32>
    %172 = arith.addf %171, %170 : vector<2x128xf32>
    %173 = arith.divf %171, %172 : vector<2x128xf32>
    %174 = math.tanh %168 : vector<2x128xf32>
    %175 = vector.extract_strided_slice %173 {offsets = [0, 0], sizes = [2, 32], strides = [1, 1]} : vector<2x128xf32> to vector<2x32xf32>
    %176 = vector.extract_strided_slice %173 {offsets = [0, 32], sizes = [2, 32], strides = [1, 1]} : vector<2x128xf32> to vector<2x32xf32>
    %177 = vector.extract_strided_slice %173 {offsets = [0, 96], sizes = [2, 32], strides = [1, 1]} : vector<2x128xf32> to vector<2x32xf32>
    %178 = vector.extract_strided_slice %174 {offsets = [0, 64], sizes = [2, 32], strides = [1, 1]} : vector<2x128xf32> to vector<2x32xf32>
    %179 = arith.mulf %176, %162 : vector<2x32xf32>
    %180 = arith.mulf %175, %178 : vector<2x32xf32>
    %181 = arith.addf %179, %180 : vector<2x32xf32>
    %182 = math.tanh %181 : vector<2x32xf32>
    %183 = arith.mulf %177, %182 : vector<2x32xf32>
    %c14 = arith.constant 14 : index
    %c0_61 = arith.constant 0 : index
    %184 = vector.load %arg17[%c14, %c0_61] : memref<32x32xf32, #tpu.memory_space<vmem>>, vector<2x32xf32>
    tpu.vector_store %arg17[%c14, %c0_61], %183 {strides = array<i32>} : memref<32x32xf32, #tpu.memory_space<vmem>>, vector<2x32xf32>,
    %c0_62 = arith.constant 0 : index
    %c1024 = arith.constant 1024 : index
    %185 = vector.load %arg16[%c0_62, %c1024] : memref<2x2048xf32, #tpu.memory_space<vmem>>, vector<2x128xf32>
    %cst_63 = arith.constant dense<0.000000e+00> : vector<2x128xf32>
    %186 = tpu.matmul %183, %30, %cst_63 {dimension_numbers = #tpu.dot_dimension_numbers<[1], [0], [0], [1], [0, 0, 1, 1], [], []>} : vector<2x32xf32>, vector<32x128xf32>, vector<2x128xf32> -> vector<2x128xf32>
    %187 = arith.addf %185, %186 : vector<2x128xf32>
    %188 = arith.negf %187 : vector<2x128xf32>
    %189 = math.exp %188 : vector<2x128xf32>
    %cst_64 = arith.constant 1.000000e+00 : f32
    %190 = vector.broadcast %cst_64 : f32 to vector<2x128xf32>
    %191 = arith.addf %190, %189 : vector<2x128xf32>
    %192 = arith.divf %190, %191 : vector<2x128xf32>
    %193 = math.tanh %187 : vector<2x128xf32>
    %194 = vector.extract_strided_slice %192 {offsets = [0, 0], sizes = [2, 32], strides = [1, 1]} : vector<2x128xf32> to vector<2x32xf32>
    %195 = vector.extract_strided_slice %192 {offsets = [0, 32], sizes = [2, 32], strides = [1, 1]} : vector<2x128xf32> to vector<2x32xf32>
    %196 = vector.extract_strided_slice %192 {offsets = [0, 96], sizes = [2, 32], strides = [1, 1]} : vector<2x128xf32> to vector<2x32xf32>
    %197 = vector.extract_strided_slice %193 {offsets = [0, 64], sizes = [2, 32], strides = [1, 1]} : vector<2x128xf32> to vector<2x32xf32>
    %198 = arith.mulf %195, %181 : vector<2x32xf32>
    %199 = arith.mulf %194, %197 : vector<2x32xf32>
    %200 = arith.addf %198, %199 : vector<2x32xf32>
    %201 = math.tanh %200 : vector<2x32xf32>
    %202 = arith.mulf %196, %201 : vector<2x32xf32>
    %c16 = arith.constant 16 : index
    %c0_65 = arith.constant 0 : index
    %203 = vector.load %arg17[%c16, %c0_65] : memref<32x32xf32, #tpu.memory_space<vmem>>, vector<2x32xf32>
    tpu.vector_store %arg17[%c16, %c0_65], %202 {strides = array<i32>} : memref<32x32xf32, #tpu.memory_space<vmem>>, vector<2x32xf32>,
    %c0_66 = arith.constant 0 : index
    %c1152 = arith.constant 1152 : index
    %204 = vector.load %arg16[%c0_66, %c1152] : memref<2x2048xf32, #tpu.memory_space<vmem>>, vector<2x128xf32>
    %cst_67 = arith.constant dense<0.000000e+00> : vector<2x128xf32>
    %205 = tpu.matmul %202, %30, %cst_67 {dimension_numbers = #tpu.dot_dimension_numbers<[1], [0], [0], [1], [0, 0, 1, 1], [], []>} : vector<2x32xf32>, vector<32x128xf32>, vector<2x128xf32> -> vector<2x128xf32>
    %206 = arith.addf %204, %205 : vector<2x128xf32>
    %207 = arith.negf %206 : vector<2x128xf32>
    %208 = math.exp %207 : vector<2x128xf32>
    %cst_68 = arith.constant 1.000000e+00 : f32
    %209 = vector.broadcast %cst_68 : f32 to vector<2x128xf32>
    %210 = arith.addf %209, %208 : vector<2x128xf32>
    %211 = arith.divf %209, %210 : vector<2x128xf32>
    %212 = math.tanh %206 : vector<2x128xf32>
    %213 = vector.extract_strided_slice %211 {offsets = [0, 0], sizes = [2, 32], strides = [1, 1]} : vector<2x128xf32> to vector<2x32xf32>
    %214 = vector.extract_strided_slice %211 {offsets = [0, 32], sizes = [2, 32], strides = [1, 1]} : vector<2x128xf32> to vector<2x32xf32>
    %215 = vector.extract_strided_slice %211 {offsets = [0, 96], sizes = [2, 32], strides = [1, 1]} : vector<2x128xf32> to vector<2x32xf32>
    %216 = vector.extract_strided_slice %212 {offsets = [0, 64], sizes = [2, 32], strides = [1, 1]} : vector<2x128xf32> to vector<2x32xf32>
    %217 = arith.mulf %214, %200 : vector<2x32xf32>
    %218 = arith.mulf %213, %216 : vector<2x32xf32>
    %219 = arith.addf %217, %218 : vector<2x32xf32>
    %220 = math.tanh %219 : vector<2x32xf32>
    %221 = arith.mulf %215, %220 : vector<2x32xf32>
    %c18 = arith.constant 18 : index
    %c0_69 = arith.constant 0 : index
    %222 = vector.load %arg17[%c18, %c0_69] : memref<32x32xf32, #tpu.memory_space<vmem>>, vector<2x32xf32>
    tpu.vector_store %arg17[%c18, %c0_69], %221 {strides = array<i32>} : memref<32x32xf32, #tpu.memory_space<vmem>>, vector<2x32xf32>,
    %c0_70 = arith.constant 0 : index
    %c1280 = arith.constant 1280 : index
    %223 = vector.load %arg16[%c0_70, %c1280] : memref<2x2048xf32, #tpu.memory_space<vmem>>, vector<2x128xf32>
    %cst_71 = arith.constant dense<0.000000e+00> : vector<2x128xf32>
    %224 = tpu.matmul %221, %30, %cst_71 {dimension_numbers = #tpu.dot_dimension_numbers<[1], [0], [0], [1], [0, 0, 1, 1], [], []>} : vector<2x32xf32>, vector<32x128xf32>, vector<2x128xf32> -> vector<2x128xf32>
    %225 = arith.addf %223, %224 : vector<2x128xf32>
    %226 = arith.negf %225 : vector<2x128xf32>
    %227 = math.exp %226 : vector<2x128xf32>
    %cst_72 = arith.constant 1.000000e+00 : f32
    %228 = vector.broadcast %cst_72 : f32 to vector<2x128xf32>
    %229 = arith.addf %228, %227 : vector<2x128xf32>
    %230 = arith.divf %228, %229 : vector<2x128xf32>
    %231 = math.tanh %225 : vector<2x128xf32>
    %232 = vector.extract_strided_slice %230 {offsets = [0, 0], sizes = [2, 32], strides = [1, 1]} : vector<2x128xf32> to vector<2x32xf32>
    %233 = vector.extract_strided_slice %230 {offsets = [0, 32], sizes = [2, 32], strides = [1, 1]} : vector<2x128xf32> to vector<2x32xf32>
    %234 = vector.extract_strided_slice %230 {offsets = [0, 96], sizes = [2, 32], strides = [1, 1]} : vector<2x128xf32> to vector<2x32xf32>
    %235 = vector.extract_strided_slice %231 {offsets = [0, 64], sizes = [2, 32], strides = [1, 1]} : vector<2x128xf32> to vector<2x32xf32>
    %236 = arith.mulf %233, %219 : vector<2x32xf32>
    %237 = arith.mulf %232, %235 : vector<2x32xf32>
    %238 = arith.addf %236, %237 : vector<2x32xf32>
    %239 = math.tanh %238 : vector<2x32xf32>
    %240 = arith.mulf %234, %239 : vector<2x32xf32>
    %c20 = arith.constant 20 : index
    %c0_73 = arith.constant 0 : index
    %241 = vector.load %arg17[%c20, %c0_73] : memref<32x32xf32, #tpu.memory_space<vmem>>, vector<2x32xf32>
    tpu.vector_store %arg17[%c20, %c0_73], %240 {strides = array<i32>} : memref<32x32xf32, #tpu.memory_space<vmem>>, vector<2x32xf32>,
    %c0_74 = arith.constant 0 : index
    %c1408 = arith.constant 1408 : index
    %242 = vector.load %arg16[%c0_74, %c1408] : memref<2x2048xf32, #tpu.memory_space<vmem>>, vector<2x128xf32>
    %cst_75 = arith.constant dense<0.000000e+00> : vector<2x128xf32>
    %243 = tpu.matmul %240, %30, %cst_75 {dimension_numbers = #tpu.dot_dimension_numbers<[1], [0], [0], [1], [0, 0, 1, 1], [], []>} : vector<2x32xf32>, vector<32x128xf32>, vector<2x128xf32> -> vector<2x128xf32>
    %244 = arith.addf %242, %243 : vector<2x128xf32>
    %245 = arith.negf %244 : vector<2x128xf32>
    %246 = math.exp %245 : vector<2x128xf32>
    %cst_76 = arith.constant 1.000000e+00 : f32
    %247 = vector.broadcast %cst_76 : f32 to vector<2x128xf32>
    %248 = arith.addf %247, %246 : vector<2x128xf32>
    %249 = arith.divf %247, %248 : vector<2x128xf32>
    %250 = math.tanh %244 : vector<2x128xf32>
    %251 = vector.extract_strided_slice %249 {offsets = [0, 0], sizes = [2, 32], strides = [1, 1]} : vector<2x128xf32> to vector<2x32xf32>
    %252 = vector.extract_strided_slice %249 {offsets = [0, 32], sizes = [2, 32], strides = [1, 1]} : vector<2x128xf32> to vector<2x32xf32>
    %253 = vector.extract_strided_slice %249 {offsets = [0, 96], sizes = [2, 32], strides = [1, 1]} : vector<2x128xf32> to vector<2x32xf32>
    %254 = vector.extract_strided_slice %250 {offsets = [0, 64], sizes = [2, 32], strides = [1, 1]} : vector<2x128xf32> to vector<2x32xf32>
    %255 = arith.mulf %252, %238 : vector<2x32xf32>
    %256 = arith.mulf %251, %254 : vector<2x32xf32>
    %257 = arith.addf %255, %256 : vector<2x32xf32>
    %258 = math.tanh %257 : vector<2x32xf32>
    %259 = arith.mulf %253, %258 : vector<2x32xf32>
    %c22 = arith.constant 22 : index
    %c0_77 = arith.constant 0 : index
    %260 = vector.load %arg17[%c22, %c0_77] : memref<32x32xf32, #tpu.memory_space<vmem>>, vector<2x32xf32>
    tpu.vector_store %arg17[%c22, %c0_77], %259 {strides = array<i32>} : memref<32x32xf32, #tpu.memory_space<vmem>>, vector<2x32xf32>,
    %c0_78 = arith.constant 0 : index
    %c1536 = arith.constant 1536 : index
    %261 = vector.load %arg16[%c0_78, %c1536] : memref<2x2048xf32, #tpu.memory_space<vmem>>, vector<2x128xf32>
    %cst_79 = arith.constant dense<0.000000e+00> : vector<2x128xf32>
    %262 = tpu.matmul %259, %30, %cst_79 {dimension_numbers = #tpu.dot_dimension_numbers<[1], [0], [0], [1], [0, 0, 1, 1], [], []>} : vector<2x32xf32>, vector<32x128xf32>, vector<2x128xf32> -> vector<2x128xf32>
    %263 = arith.addf %261, %262 : vector<2x128xf32>
    %264 = arith.negf %263 : vector<2x128xf32>
    %265 = math.exp %264 : vector<2x128xf32>
    %cst_80 = arith.constant 1.000000e+00 : f32
    %266 = vector.broadcast %cst_80 : f32 to vector<2x128xf32>
    %267 = arith.addf %266, %265 : vector<2x128xf32>
    %268 = arith.divf %266, %267 : vector<2x128xf32>
    %269 = math.tanh %263 : vector<2x128xf32>
    %270 = vector.extract_strided_slice %268 {offsets = [0, 0], sizes = [2, 32], strides = [1, 1]} : vector<2x128xf32> to vector<2x32xf32>
    %271 = vector.extract_strided_slice %268 {offsets = [0, 32], sizes = [2, 32], strides = [1, 1]} : vector<2x128xf32> to vector<2x32xf32>
    %272 = vector.extract_strided_slice %268 {offsets = [0, 96], sizes = [2, 32], strides = [1, 1]} : vector<2x128xf32> to vector<2x32xf32>
    %273 = vector.extract_strided_slice %269 {offsets = [0, 64], sizes = [2, 32], strides = [1, 1]} : vector<2x128xf32> to vector<2x32xf32>
    %274 = arith.mulf %271, %257 : vector<2x32xf32>
    %275 = arith.mulf %270, %273 : vector<2x32xf32>
    %276 = arith.addf %274, %275 : vector<2x32xf32>
    %277 = math.tanh %276 : vector<2x32xf32>
    %278 = arith.mulf %272, %277 : vector<2x32xf32>
    %c24 = arith.constant 24 : index
    %c0_81 = arith.constant 0 : index
    %279 = vector.load %arg17[%c24, %c0_81] : memref<32x32xf32, #tpu.memory_space<vmem>>, vector<2x32xf32>
    tpu.vector_store %arg17[%c24, %c0_81], %278 {strides = array<i32>} : memref<32x32xf32, #tpu.memory_space<vmem>>, vector<2x32xf32>,
    %c0_82 = arith.constant 0 : index
    %c1664 = arith.constant 1664 : index
    %280 = vector.load %arg16[%c0_82, %c1664] : memref<2x2048xf32, #tpu.memory_space<vmem>>, vector<2x128xf32>
    %cst_83 = arith.constant dense<0.000000e+00> : vector<2x128xf32>
    %281 = tpu.matmul %278, %30, %cst_83 {dimension_numbers = #tpu.dot_dimension_numbers<[1], [0], [0], [1], [0, 0, 1, 1], [], []>} : vector<2x32xf32>, vector<32x128xf32>, vector<2x128xf32> -> vector<2x128xf32>
    %282 = arith.addf %280, %281 : vector<2x128xf32>
    %283 = arith.negf %282 : vector<2x128xf32>
    %284 = math.exp %283 : vector<2x128xf32>
    %cst_84 = arith.constant 1.000000e+00 : f32
    %285 = vector.broadcast %cst_84 : f32 to vector<2x128xf32>
    %286 = arith.addf %285, %284 : vector<2x128xf32>
    %287 = arith.divf %285, %286 : vector<2x128xf32>
    %288 = math.tanh %282 : vector<2x128xf32>
    %289 = vector.extract_strided_slice %287 {offsets = [0, 0], sizes = [2, 32], strides = [1, 1]} : vector<2x128xf32> to vector<2x32xf32>
    %290 = vector.extract_strided_slice %287 {offsets = [0, 32], sizes = [2, 32], strides = [1, 1]} : vector<2x128xf32> to vector<2x32xf32>
    %291 = vector.extract_strided_slice %287 {offsets = [0, 96], sizes = [2, 32], strides = [1, 1]} : vector<2x128xf32> to vector<2x32xf32>
    %292 = vector.extract_strided_slice %288 {offsets = [0, 64], sizes = [2, 32], strides = [1, 1]} : vector<2x128xf32> to vector<2x32xf32>
    %293 = arith.mulf %290, %276 : vector<2x32xf32>
    %294 = arith.mulf %289, %292 : vector<2x32xf32>
    %295 = arith.addf %293, %294 : vector<2x32xf32>
    %296 = math.tanh %295 : vector<2x32xf32>
    %297 = arith.mulf %291, %296 : vector<2x32xf32>
    %c26 = arith.constant 26 : index
    %c0_85 = arith.constant 0 : index
    %298 = vector.load %arg17[%c26, %c0_85] : memref<32x32xf32, #tpu.memory_space<vmem>>, vector<2x32xf32>
    tpu.vector_store %arg17[%c26, %c0_85], %297 {strides = array<i32>} : memref<32x32xf32, #tpu.memory_space<vmem>>, vector<2x32xf32>,
    %c0_86 = arith.constant 0 : index
    %c1792 = arith.constant 1792 : index
    %299 = vector.load %arg16[%c0_86, %c1792] : memref<2x2048xf32, #tpu.memory_space<vmem>>, vector<2x128xf32>
    %cst_87 = arith.constant dense<0.000000e+00> : vector<2x128xf32>
    %300 = tpu.matmul %297, %30, %cst_87 {dimension_numbers = #tpu.dot_dimension_numbers<[1], [0], [0], [1], [0, 0, 1, 1], [], []>} : vector<2x32xf32>, vector<32x128xf32>, vector<2x128xf32> -> vector<2x128xf32>
    %301 = arith.addf %299, %300 : vector<2x128xf32>
    %302 = arith.negf %301 : vector<2x128xf32>
    %303 = math.exp %302 : vector<2x128xf32>
    %cst_88 = arith.constant 1.000000e+00 : f32
    %304 = vector.broadcast %cst_88 : f32 to vector<2x128xf32>
    %305 = arith.addf %304, %303 : vector<2x128xf32>
    %306 = arith.divf %304, %305 : vector<2x128xf32>
    %307 = math.tanh %301 : vector<2x128xf32>
    %308 = vector.extract_strided_slice %306 {offsets = [0, 0], sizes = [2, 32], strides = [1, 1]} : vector<2x128xf32> to vector<2x32xf32>
    %309 = vector.extract_strided_slice %306 {offsets = [0, 32], sizes = [2, 32], strides = [1, 1]} : vector<2x128xf32> to vector<2x32xf32>
    %310 = vector.extract_strided_slice %306 {offsets = [0, 96], sizes = [2, 32], strides = [1, 1]} : vector<2x128xf32> to vector<2x32xf32>
    %311 = vector.extract_strided_slice %307 {offsets = [0, 64], sizes = [2, 32], strides = [1, 1]} : vector<2x128xf32> to vector<2x32xf32>
    %312 = arith.mulf %309, %295 : vector<2x32xf32>
    %313 = arith.mulf %308, %311 : vector<2x32xf32>
    %314 = arith.addf %312, %313 : vector<2x32xf32>
    %315 = math.tanh %314 : vector<2x32xf32>
    %316 = arith.mulf %310, %315 : vector<2x32xf32>
    %c28 = arith.constant 28 : index
    %c0_89 = arith.constant 0 : index
    %317 = vector.load %arg17[%c28, %c0_89] : memref<32x32xf32, #tpu.memory_space<vmem>>, vector<2x32xf32>
    tpu.vector_store %arg17[%c28, %c0_89], %316 {strides = array<i32>} : memref<32x32xf32, #tpu.memory_space<vmem>>, vector<2x32xf32>,
    %c0_90 = arith.constant 0 : index
    %c1920 = arith.constant 1920 : index
    %318 = vector.load %arg16[%c0_90, %c1920] : memref<2x2048xf32, #tpu.memory_space<vmem>>, vector<2x128xf32>
    %cst_91 = arith.constant dense<0.000000e+00> : vector<2x128xf32>
    %319 = tpu.matmul %316, %30, %cst_91 {dimension_numbers = #tpu.dot_dimension_numbers<[1], [0], [0], [1], [0, 0, 1, 1], [], []>} : vector<2x32xf32>, vector<32x128xf32>, vector<2x128xf32> -> vector<2x128xf32>
    %320 = arith.addf %318, %319 : vector<2x128xf32>
    %321 = arith.negf %320 : vector<2x128xf32>
    %322 = math.exp %321 : vector<2x128xf32>
    %cst_92 = arith.constant 1.000000e+00 : f32
    %323 = vector.broadcast %cst_92 : f32 to vector<2x128xf32>
    %324 = arith.addf %323, %322 : vector<2x128xf32>
    %325 = arith.divf %323, %324 : vector<2x128xf32>
    %326 = math.tanh %320 : vector<2x128xf32>
    %327 = vector.extract_strided_slice %325 {offsets = [0, 0], sizes = [2, 32], strides = [1, 1]} : vector<2x128xf32> to vector<2x32xf32>
    %328 = vector.extract_strided_slice %325 {offsets = [0, 32], sizes = [2, 32], strides = [1, 1]} : vector<2x128xf32> to vector<2x32xf32>
    %329 = vector.extract_strided_slice %325 {offsets = [0, 96], sizes = [2, 32], strides = [1, 1]} : vector<2x128xf32> to vector<2x32xf32>
    %330 = vector.extract_strided_slice %326 {offsets = [0, 64], sizes = [2, 32], strides = [1, 1]} : vector<2x128xf32> to vector<2x32xf32>
    %331 = arith.mulf %328, %314 : vector<2x32xf32>
    %332 = arith.mulf %327, %330 : vector<2x32xf32>
    %333 = arith.addf %331, %332 : vector<2x32xf32>
    %334 = math.tanh %333 : vector<2x32xf32>
    %335 = arith.mulf %329, %334 : vector<2x32xf32>
    %c30 = arith.constant 30 : index
    %c0_93 = arith.constant 0 : index
    %336 = vector.load %arg17[%c30, %c0_93] : memref<32x32xf32, #tpu.memory_space<vmem>>, vector<2x32xf32>
    tpu.vector_store %arg17[%c30, %c0_93], %335 {strides = array<i32>} : memref<32x32xf32, #tpu.memory_space<vmem>>, vector<2x32xf32>,
    %c0_94 = arith.constant 0 : index
    %c0_95 = arith.constant 0 : index
    %337 = vector.load %arg17[%c0_94, %c0_95] : memref<32x32xf32, #tpu.memory_space<vmem>>, vector<32x32xf32>
    %c0_96 = arith.constant 0 : index
    %c0_97 = arith.constant 0 : index
    %338 = vector.load %arg10[%c0_96, %c0_97] : memref<32x128xf32, #tpu.memory_space<vmem>>, vector<32x128xf32>
    %cst_98 = arith.constant dense<0.000000e+00> : vector<32x128xf32>
    %339 = tpu.matmul %337, %338, %cst_98 {dimension_numbers = #tpu.dot_dimension_numbers<[1], [0], [0], [1], [0, 0, 1, 1], [], []>} : vector<32x32xf32>, vector<32x128xf32>, vector<32x128xf32> -> vector<32x128xf32>
    %c0_99 = arith.constant 0 : index
    %c0_100 = arith.constant 0 : index
    %340 = vector.load %arg11[%c0_99, %c0_100] : memref<1x128xf32, #tpu.memory_space<vmem>>, vector<1x128xf32>
    %341 = vector.broadcast %340 : vector<1x128xf32> to vector<32x128xf32>
    %342 = arith.addf %339, %341 : vector<32x128xf32>
    %c0_101 = arith.constant 0 : index
    %c0_102 = arith.constant 0 : index
    %343 = vector.load %arg18[%c0_101, %c0_102] : memref<32x128xf32, #tpu.memory_space<vmem>>, vector<32x128xf32>
    tpu.vector_store %arg18[%c0_101, %c0_102], %342 {strides = array<i32>} : memref<32x128xf32, #tpu.memory_space<vmem>>, vector<32x128xf32>,
    %c0_103 = arith.constant 0 : index
    %c0_104 = arith.constant 0 : index
    %344 = vector.load %arg12[%c0_103, %c0_104] : memref<32x128xf32, #tpu.memory_space<vmem>>, vector<32x128xf32>
    %cst_105 = arith.constant 0.000000e+00 : f32
    %345 = vector.broadcast %cst_105 : f32 to vector<2x32xf32>
    %cst_106 = arith.constant 0.000000e+00 : f32
    %346 = vector.broadcast %cst_106 : f32 to vector<2x32xf32>
    %c0_107 = arith.constant 0 : index
    %c0_108 = arith.constant 0 : index
    %347 = vector.load %arg18[%c0_107, %c0_108] : memref<32x128xf32, #tpu.memory_space<vmem>>, vector<2x128xf32>
    %cst_109 = arith.constant dense<0.000000e+00> : vector<2x128xf32>
    %348 = tpu.matmul %345, %344, %cst_109 {dimension_numbers = #tpu.dot_dimension_numbers<[1], [0], [0], [1], [0, 0, 1, 1], [], []>} : vector<2x32xf32>, vector<32x128xf32>, vector<2x128xf32> -> vector<2x128xf32>
    %349 = arith.addf %347, %348 : vector<2x128xf32>
    %350 = arith.negf %349 : vector<2x128xf32>
    %351 = math.exp %350 : vector<2x128xf32>
    %cst_110 = arith.constant 1.000000e+00 : f32
    %352 = vector.broadcast %cst_110 : f32 to vector<2x128xf32>
    %353 = arith.addf %352, %351 : vector<2x128xf32>
    %354 = arith.divf %352, %353 : vector<2x128xf32>
    %355 = math.tanh %349 : vector<2x128xf32>
    %356 = vector.extract_strided_slice %354 {offsets = [0, 0], sizes = [2, 32], strides = [1, 1]} : vector<2x128xf32> to vector<2x32xf32>
    %357 = vector.extract_strided_slice %354 {offsets = [0, 32], sizes = [2, 32], strides = [1, 1]} : vector<2x128xf32> to vector<2x32xf32>
    %358 = vector.extract_strided_slice %354 {offsets = [0, 96], sizes = [2, 32], strides = [1, 1]} : vector<2x128xf32> to vector<2x32xf32>
    %359 = vector.extract_strided_slice %355 {offsets = [0, 64], sizes = [2, 32], strides = [1, 1]} : vector<2x128xf32> to vector<2x32xf32>
    %360 = arith.mulf %357, %346 : vector<2x32xf32>
    %361 = arith.mulf %356, %359 : vector<2x32xf32>
    %362 = arith.addf %360, %361 : vector<2x32xf32>
    %363 = math.tanh %362 : vector<2x32xf32>
    %364 = arith.mulf %358, %363 : vector<2x32xf32>
    %365 = vector.extract_strided_slice %364 {offsets = [0, 0], sizes = [1, 32], strides = [1, 1]} : vector<2x32xf32> to vector<1x32xf32>
    %c0_111 = arith.constant 0 : index
    %c0_112 = arith.constant 0 : index
    %366 = vector.load %arg19[%c0_111, %c0_112] : memref<2x512xf32, #tpu.memory_space<vmem>>, vector<1x32xf32>
    tpu.vector_store %arg19[%c0_111, %c0_112], %365 {strides = array<i32>} : memref<2x512xf32, #tpu.memory_space<vmem>>, vector<1x32xf32>,
    %367 = vector.extract_strided_slice %364 {offsets = [1, 0], sizes = [1, 32], strides = [1, 1]} : vector<2x32xf32> to vector<1x32xf32>
    %c0_113 = arith.constant 0 : index
    %c32 = arith.constant 32 : index
    %368 = vector.load %arg19[%c0_113, %c32] : memref<2x512xf32, #tpu.memory_space<vmem>>, vector<1x32xf32>
    tpu.vector_store %arg19[%c0_113, %c32], %367 {strides = array<i32>} : memref<2x512xf32, #tpu.memory_space<vmem>>, vector<1x32xf32>,
    %c2_114 = arith.constant 2 : index
    %c0_115 = arith.constant 0 : index
    %369 = vector.load %arg18[%c2_114, %c0_115] : memref<32x128xf32, #tpu.memory_space<vmem>>, vector<2x128xf32>
    %cst_116 = arith.constant dense<0.000000e+00> : vector<2x128xf32>
    %370 = tpu.matmul %364, %344, %cst_116 {dimension_numbers = #tpu.dot_dimension_numbers<[1], [0], [0], [1], [0, 0, 1, 1], [], []>} : vector<2x32xf32>, vector<32x128xf32>, vector<2x128xf32> -> vector<2x128xf32>
    %371 = arith.addf %369, %370 : vector<2x128xf32>
    %372 = arith.negf %371 : vector<2x128xf32>
    %373 = math.exp %372 : vector<2x128xf32>
    %cst_117 = arith.constant 1.000000e+00 : f32
    %374 = vector.broadcast %cst_117 : f32 to vector<2x128xf32>
    %375 = arith.addf %374, %373 : vector<2x128xf32>
    %376 = arith.divf %374, %375 : vector<2x128xf32>
    %377 = math.tanh %371 : vector<2x128xf32>
    %378 = vector.extract_strided_slice %376 {offsets = [0, 0], sizes = [2, 32], strides = [1, 1]} : vector<2x128xf32> to vector<2x32xf32>
    %379 = vector.extract_strided_slice %376 {offsets = [0, 32], sizes = [2, 32], strides = [1, 1]} : vector<2x128xf32> to vector<2x32xf32>
    %380 = vector.extract_strided_slice %376 {offsets = [0, 96], sizes = [2, 32], strides = [1, 1]} : vector<2x128xf32> to vector<2x32xf32>
    %381 = vector.extract_strided_slice %377 {offsets = [0, 64], sizes = [2, 32], strides = [1, 1]} : vector<2x128xf32> to vector<2x32xf32>
    %382 = arith.mulf %379, %362 : vector<2x32xf32>
    %383 = arith.mulf %378, %381 : vector<2x32xf32>
    %384 = arith.addf %382, %383 : vector<2x32xf32>
    %385 = math.tanh %384 : vector<2x32xf32>
    %386 = arith.mulf %380, %385 : vector<2x32xf32>
    %387 = vector.extract_strided_slice %386 {offsets = [0, 0], sizes = [1, 32], strides = [1, 1]} : vector<2x32xf32> to vector<1x32xf32>
    %c0_118 = arith.constant 0 : index
    %c64 = arith.constant 64 : index
    %388 = vector.load %arg19[%c0_118, %c64] : memref<2x512xf32, #tpu.memory_space<vmem>>, vector<1x32xf32>
    tpu.vector_store %arg19[%c0_118, %c64], %387 {strides = array<i32>} : memref<2x512xf32, #tpu.memory_space<vmem>>, vector<1x32xf32>,
    %389 = vector.extract_strided_slice %386 {offsets = [1, 0], sizes = [1, 32], strides = [1, 1]} : vector<2x32xf32> to vector<1x32xf32>
    %c0_119 = arith.constant 0 : index
    %c96 = arith.constant 96 : index
    %390 = vector.load %arg19[%c0_119, %c96] : memref<2x512xf32, #tpu.memory_space<vmem>>, vector<1x32xf32>
    tpu.vector_store %arg19[%c0_119, %c96], %389 {strides = array<i32>} : memref<2x512xf32, #tpu.memory_space<vmem>>, vector<1x32xf32>,
    %c4_120 = arith.constant 4 : index
    %c0_121 = arith.constant 0 : index
    %391 = vector.load %arg18[%c4_120, %c0_121] : memref<32x128xf32, #tpu.memory_space<vmem>>, vector<2x128xf32>
    %cst_122 = arith.constant dense<0.000000e+00> : vector<2x128xf32>
    %392 = tpu.matmul %386, %344, %cst_122 {dimension_numbers = #tpu.dot_dimension_numbers<[1], [0], [0], [1], [0, 0, 1, 1], [], []>} : vector<2x32xf32>, vector<32x128xf32>, vector<2x128xf32> -> vector<2x128xf32>
    %393 = arith.addf %391, %392 : vector<2x128xf32>
    %394 = arith.negf %393 : vector<2x128xf32>
    %395 = math.exp %394 : vector<2x128xf32>
    %cst_123 = arith.constant 1.000000e+00 : f32
    %396 = vector.broadcast %cst_123 : f32 to vector<2x128xf32>
    %397 = arith.addf %396, %395 : vector<2x128xf32>
    %398 = arith.divf %396, %397 : vector<2x128xf32>
    %399 = math.tanh %393 : vector<2x128xf32>
    %400 = vector.extract_strided_slice %398 {offsets = [0, 0], sizes = [2, 32], strides = [1, 1]} : vector<2x128xf32> to vector<2x32xf32>
    %401 = vector.extract_strided_slice %398 {offsets = [0, 32], sizes = [2, 32], strides = [1, 1]} : vector<2x128xf32> to vector<2x32xf32>
    %402 = vector.extract_strided_slice %398 {offsets = [0, 96], sizes = [2, 32], strides = [1, 1]} : vector<2x128xf32> to vector<2x32xf32>
    %403 = vector.extract_strided_slice %399 {offsets = [0, 64], sizes = [2, 32], strides = [1, 1]} : vector<2x128xf32> to vector<2x32xf32>
    %404 = arith.mulf %401, %384 : vector<2x32xf32>
    %405 = arith.mulf %400, %403 : vector<2x32xf32>
    %406 = arith.addf %404, %405 : vector<2x32xf32>
    %407 = math.tanh %406 : vector<2x32xf32>
    %408 = arith.mulf %402, %407 : vector<2x32xf32>
    %409 = vector.extract_strided_slice %408 {offsets = [0, 0], sizes = [1, 32], strides = [1, 1]} : vector<2x32xf32> to vector<1x32xf32>
    %c0_124 = arith.constant 0 : index
    %c128_125 = arith.constant 128 : index
    %410 = vector.load %arg19[%c0_124, %c128_125] : memref<2x512xf32, #tpu.memory_space<vmem>>, vector<1x32xf32>
    tpu.vector_store %arg19[%c0_124, %c128_125], %409 {strides = array<i32>} : memref<2x512xf32, #tpu.memory_space<vmem>>, vector<1x32xf32>,
    %411 = vector.extract_strided_slice %408 {offsets = [1, 0], sizes = [1, 32], strides = [1, 1]} : vector<2x32xf32> to vector<1x32xf32>
    %c0_126 = arith.constant 0 : index
    %c160 = arith.constant 160 : index
    %412 = vector.load %arg19[%c0_126, %c160] : memref<2x512xf32, #tpu.memory_space<vmem>>, vector<1x32xf32>
    tpu.vector_store %arg19[%c0_126, %c160], %411 {strides = array<i32>} : memref<2x512xf32, #tpu.memory_space<vmem>>, vector<1x32xf32>,
    %c6_127 = arith.constant 6 : index
    %c0_128 = arith.constant 0 : index
    %413 = vector.load %arg18[%c6_127, %c0_128] : memref<32x128xf32, #tpu.memory_space<vmem>>, vector<2x128xf32>
    %cst_129 = arith.constant dense<0.000000e+00> : vector<2x128xf32>
    %414 = tpu.matmul %408, %344, %cst_129 {dimension_numbers = #tpu.dot_dimension_numbers<[1], [0], [0], [1], [0, 0, 1, 1], [], []>} : vector<2x32xf32>, vector<32x128xf32>, vector<2x128xf32> -> vector<2x128xf32>
    %415 = arith.addf %413, %414 : vector<2x128xf32>
    %416 = arith.negf %415 : vector<2x128xf32>
    %417 = math.exp %416 : vector<2x128xf32>
    %cst_130 = arith.constant 1.000000e+00 : f32
    %418 = vector.broadcast %cst_130 : f32 to vector<2x128xf32>
    %419 = arith.addf %418, %417 : vector<2x128xf32>
    %420 = arith.divf %418, %419 : vector<2x128xf32>
    %421 = math.tanh %415 : vector<2x128xf32>
    %422 = vector.extract_strided_slice %420 {offsets = [0, 0], sizes = [2, 32], strides = [1, 1]} : vector<2x128xf32> to vector<2x32xf32>
    %423 = vector.extract_strided_slice %420 {offsets = [0, 32], sizes = [2, 32], strides = [1, 1]} : vector<2x128xf32> to vector<2x32xf32>
    %424 = vector.extract_strided_slice %420 {offsets = [0, 96], sizes = [2, 32], strides = [1, 1]} : vector<2x128xf32> to vector<2x32xf32>
    %425 = vector.extract_strided_slice %421 {offsets = [0, 64], sizes = [2, 32], strides = [1, 1]} : vector<2x128xf32> to vector<2x32xf32>
    %426 = arith.mulf %423, %406 : vector<2x32xf32>
    %427 = arith.mulf %422, %425 : vector<2x32xf32>
    %428 = arith.addf %426, %427 : vector<2x32xf32>
    %429 = math.tanh %428 : vector<2x32xf32>
    %430 = arith.mulf %424, %429 : vector<2x32xf32>
    %431 = vector.extract_strided_slice %430 {offsets = [0, 0], sizes = [1, 32], strides = [1, 1]} : vector<2x32xf32> to vector<1x32xf32>
    %c0_131 = arith.constant 0 : index
    %c192 = arith.constant 192 : index
    %432 = vector.load %arg19[%c0_131, %c192] : memref<2x512xf32, #tpu.memory_space<vmem>>, vector<1x32xf32>
    tpu.vector_store %arg19[%c0_131, %c192], %431 {strides = array<i32>} : memref<2x512xf32, #tpu.memory_space<vmem>>, vector<1x32xf32>,
    %433 = vector.extract_strided_slice %430 {offsets = [1, 0], sizes = [1, 32], strides = [1, 1]} : vector<2x32xf32> to vector<1x32xf32>
    %c0_132 = arith.constant 0 : index
    %c224 = arith.constant 224 : index
    %434 = vector.load %arg19[%c0_132, %c224] : memref<2x512xf32, #tpu.memory_space<vmem>>, vector<1x32xf32>
    tpu.vector_store %arg19[%c0_132, %c224], %433 {strides = array<i32>} : memref<2x512xf32, #tpu.memory_space<vmem>>, vector<1x32xf32>,
    %c8_133 = arith.constant 8 : index
    %c0_134 = arith.constant 0 : index
    %435 = vector.load %arg18[%c8_133, %c0_134] : memref<32x128xf32, #tpu.memory_space<vmem>>, vector<2x128xf32>
    %cst_135 = arith.constant dense<0.000000e+00> : vector<2x128xf32>
    %436 = tpu.matmul %430, %344, %cst_135 {dimension_numbers = #tpu.dot_dimension_numbers<[1], [0], [0], [1], [0, 0, 1, 1], [], []>} : vector<2x32xf32>, vector<32x128xf32>, vector<2x128xf32> -> vector<2x128xf32>
    %437 = arith.addf %435, %436 : vector<2x128xf32>
    %438 = arith.negf %437 : vector<2x128xf32>
    %439 = math.exp %438 : vector<2x128xf32>
    %cst_136 = arith.constant 1.000000e+00 : f32
    %440 = vector.broadcast %cst_136 : f32 to vector<2x128xf32>
    %441 = arith.addf %440, %439 : vector<2x128xf32>
    %442 = arith.divf %440, %441 : vector<2x128xf32>
    %443 = math.tanh %437 : vector<2x128xf32>
    %444 = vector.extract_strided_slice %442 {offsets = [0, 0], sizes = [2, 32], strides = [1, 1]} : vector<2x128xf32> to vector<2x32xf32>
    %445 = vector.extract_strided_slice %442 {offsets = [0, 32], sizes = [2, 32], strides = [1, 1]} : vector<2x128xf32> to vector<2x32xf32>
    %446 = vector.extract_strided_slice %442 {offsets = [0, 96], sizes = [2, 32], strides = [1, 1]} : vector<2x128xf32> to vector<2x32xf32>
    %447 = vector.extract_strided_slice %443 {offsets = [0, 64], sizes = [2, 32], strides = [1, 1]} : vector<2x128xf32> to vector<2x32xf32>
    %448 = arith.mulf %445, %428 : vector<2x32xf32>
    %449 = arith.mulf %444, %447 : vector<2x32xf32>
    %450 = arith.addf %448, %449 : vector<2x32xf32>
    %451 = math.tanh %450 : vector<2x32xf32>
    %452 = arith.mulf %446, %451 : vector<2x32xf32>
    %453 = vector.extract_strided_slice %452 {offsets = [0, 0], sizes = [1, 32], strides = [1, 1]} : vector<2x32xf32> to vector<1x32xf32>
    %c0_137 = arith.constant 0 : index
    %c256_138 = arith.constant 256 : index
    %454 = vector.load %arg19[%c0_137, %c256_138] : memref<2x512xf32, #tpu.memory_space<vmem>>, vector<1x32xf32>
    tpu.vector_store %arg19[%c0_137, %c256_138], %453 {strides = array<i32>} : memref<2x512xf32, #tpu.memory_space<vmem>>, vector<1x32xf32>,
    %455 = vector.extract_strided_slice %452 {offsets = [1, 0], sizes = [1, 32], strides = [1, 1]} : vector<2x32xf32> to vector<1x32xf32>
    %c0_139 = arith.constant 0 : index
    %c288 = arith.constant 288 : index
    %456 = vector.load %arg19[%c0_139, %c288] : memref<2x512xf32, #tpu.memory_space<vmem>>, vector<1x32xf32>
    tpu.vector_store %arg19[%c0_139, %c288], %455 {strides = array<i32>} : memref<2x512xf32, #tpu.memory_space<vmem>>, vector<1x32xf32>,
    %c10_140 = arith.constant 10 : index
    %c0_141 = arith.constant 0 : index
    %457 = vector.load %arg18[%c10_140, %c0_141] : memref<32x128xf32, #tpu.memory_space<vmem>>, vector<2x128xf32>
    %cst_142 = arith.constant dense<0.000000e+00> : vector<2x128xf32>
    %458 = tpu.matmul %452, %344, %cst_142 {dimension_numbers = #tpu.dot_dimension_numbers<[1], [0], [0], [1], [0, 0, 1, 1], [], []>} : vector<2x32xf32>, vector<32x128xf32>, vector<2x128xf32> -> vector<2x128xf32>
    %459 = arith.addf %457, %458 : vector<2x128xf32>
    %460 = arith.negf %459 : vector<2x128xf32>
    %461 = math.exp %460 : vector<2x128xf32>
    %cst_143 = arith.constant 1.000000e+00 : f32
    %462 = vector.broadcast %cst_143 : f32 to vector<2x128xf32>
    %463 = arith.addf %462, %461 : vector<2x128xf32>
    %464 = arith.divf %462, %463 : vector<2x128xf32>
    %465 = math.tanh %459 : vector<2x128xf32>
    %466 = vector.extract_strided_slice %464 {offsets = [0, 0], sizes = [2, 32], strides = [1, 1]} : vector<2x128xf32> to vector<2x32xf32>
    %467 = vector.extract_strided_slice %464 {offsets = [0, 32], sizes = [2, 32], strides = [1, 1]} : vector<2x128xf32> to vector<2x32xf32>
    %468 = vector.extract_strided_slice %464 {offsets = [0, 96], sizes = [2, 32], strides = [1, 1]} : vector<2x128xf32> to vector<2x32xf32>
    %469 = vector.extract_strided_slice %465 {offsets = [0, 64], sizes = [2, 32], strides = [1, 1]} : vector<2x128xf32> to vector<2x32xf32>
    %470 = arith.mulf %467, %450 : vector<2x32xf32>
    %471 = arith.mulf %466, %469 : vector<2x32xf32>
    %472 = arith.addf %470, %471 : vector<2x32xf32>
    %473 = math.tanh %472 : vector<2x32xf32>
    %474 = arith.mulf %468, %473 : vector<2x32xf32>
    %475 = vector.extract_strided_slice %474 {offsets = [0, 0], sizes = [1, 32], strides = [1, 1]} : vector<2x32xf32> to vector<1x32xf32>
    %c0_144 = arith.constant 0 : index
    %c320 = arith.constant 320 : index
    %476 = vector.load %arg19[%c0_144, %c320] : memref<2x512xf32, #tpu.memory_space<vmem>>, vector<1x32xf32>
    tpu.vector_store %arg19[%c0_144, %c320], %475 {strides = array<i32>} : memref<2x512xf32, #tpu.memory_space<vmem>>, vector<1x32xf32>,
    %477 = vector.extract_strided_slice %474 {offsets = [1, 0], sizes = [1, 32], strides = [1, 1]} : vector<2x32xf32> to vector<1x32xf32>
    %c0_145 = arith.constant 0 : index
    %c352 = arith.constant 352 : index
    %478 = vector.load %arg19[%c0_145, %c352] : memref<2x512xf32, #tpu.memory_space<vmem>>, vector<1x32xf32>
    tpu.vector_store %arg19[%c0_145, %c352], %477 {strides = array<i32>} : memref<2x512xf32, #tpu.memory_space<vmem>>, vector<1x32xf32>,
    %c12_146 = arith.constant 12 : index
    %c0_147 = arith.constant 0 : index
    %479 = vector.load %arg18[%c12_146, %c0_147] : memref<32x128xf32, #tpu.memory_space<vmem>>, vector<2x128xf32>
    %cst_148 = arith.constant dense<0.000000e+00> : vector<2x128xf32>
    %480 = tpu.matmul %474, %344, %cst_148 {dimension_numbers = #tpu.dot_dimension_numbers<[1], [0], [0], [1], [0, 0, 1, 1], [], []>} : vector<2x32xf32>, vector<32x128xf32>, vector<2x128xf32> -> vector<2x128xf32>
    %481 = arith.addf %479, %480 : vector<2x128xf32>
    %482 = arith.negf %481 : vector<2x128xf32>
    %483 = math.exp %482 : vector<2x128xf32>
    %cst_149 = arith.constant 1.000000e+00 : f32
    %484 = vector.broadcast %cst_149 : f32 to vector<2x128xf32>
    %485 = arith.addf %484, %483 : vector<2x128xf32>
    %486 = arith.divf %484, %485 : vector<2x128xf32>
    %487 = math.tanh %481 : vector<2x128xf32>
    %488 = vector.extract_strided_slice %486 {offsets = [0, 0], sizes = [2, 32], strides = [1, 1]} : vector<2x128xf32> to vector<2x32xf32>
    %489 = vector.extract_strided_slice %486 {offsets = [0, 32], sizes = [2, 32], strides = [1, 1]} : vector<2x128xf32> to vector<2x32xf32>
    %490 = vector.extract_strided_slice %486 {offsets = [0, 96], sizes = [2, 32], strides = [1, 1]} : vector<2x128xf32> to vector<2x32xf32>
    %491 = vector.extract_strided_slice %487 {offsets = [0, 64], sizes = [2, 32], strides = [1, 1]} : vector<2x128xf32> to vector<2x32xf32>
    %492 = arith.mulf %489, %472 : vector<2x32xf32>
    %493 = arith.mulf %488, %491 : vector<2x32xf32>
    %494 = arith.addf %492, %493 : vector<2x32xf32>
    %495 = math.tanh %494 : vector<2x32xf32>
    %496 = arith.mulf %490, %495 : vector<2x32xf32>
    %497 = vector.extract_strided_slice %496 {offsets = [0, 0], sizes = [1, 32], strides = [1, 1]} : vector<2x32xf32> to vector<1x32xf32>
    %c0_150 = arith.constant 0 : index
    %c384_151 = arith.constant 384 : index
    %498 = vector.load %arg19[%c0_150, %c384_151] : memref<2x512xf32, #tpu.memory_space<vmem>>, vector<1x32xf32>
    tpu.vector_store %arg19[%c0_150, %c384_151], %497 {strides = array<i32>} : memref<2x512xf32, #tpu.memory_space<vmem>>, vector<1x32xf32>,
    %499 = vector.extract_strided_slice %496 {offsets = [1, 0], sizes = [1, 32], strides = [1, 1]} : vector<2x32xf32> to vector<1x32xf32>
    %c0_152 = arith.constant 0 : index
    %c416 = arith.constant 416 : index
    %500 = vector.load %arg19[%c0_152, %c416] : memref<2x512xf32, #tpu.memory_space<vmem>>, vector<1x32xf32>
    tpu.vector_store %arg19[%c0_152, %c416], %499 {strides = array<i32>} : memref<2x512xf32, #tpu.memory_space<vmem>>, vector<1x32xf32>,
    %c14_153 = arith.constant 14 : index
    %c0_154 = arith.constant 0 : index
    %501 = vector.load %arg18[%c14_153, %c0_154] : memref<32x128xf32, #tpu.memory_space<vmem>>, vector<2x128xf32>
    %cst_155 = arith.constant dense<0.000000e+00> : vector<2x128xf32>
    %502 = tpu.matmul %496, %344, %cst_155 {dimension_numbers = #tpu.dot_dimension_numbers<[1], [0], [0], [1], [0, 0, 1, 1], [], []>} : vector<2x32xf32>, vector<32x128xf32>, vector<2x128xf32> -> vector<2x128xf32>
    %503 = arith.addf %501, %502 : vector<2x128xf32>
    %504 = arith.negf %503 : vector<2x128xf32>
    %505 = math.exp %504 : vector<2x128xf32>
    %cst_156 = arith.constant 1.000000e+00 : f32
    %506 = vector.broadcast %cst_156 : f32 to vector<2x128xf32>
    %507 = arith.addf %506, %505 : vector<2x128xf32>
    %508 = arith.divf %506, %507 : vector<2x128xf32>
    %509 = math.tanh %503 : vector<2x128xf32>
    %510 = vector.extract_strided_slice %508 {offsets = [0, 0], sizes = [2, 32], strides = [1, 1]} : vector<2x128xf32> to vector<2x32xf32>
    %511 = vector.extract_strided_slice %508 {offsets = [0, 32], sizes = [2, 32], strides = [1, 1]} : vector<2x128xf32> to vector<2x32xf32>
    %512 = vector.extract_strided_slice %508 {offsets = [0, 96], sizes = [2, 32], strides = [1, 1]} : vector<2x128xf32> to vector<2x32xf32>
    %513 = vector.extract_strided_slice %509 {offsets = [0, 64], sizes = [2, 32], strides = [1, 1]} : vector<2x128xf32> to vector<2x32xf32>
    %514 = arith.mulf %511, %494 : vector<2x32xf32>
    %515 = arith.mulf %510, %513 : vector<2x32xf32>
    %516 = arith.addf %514, %515 : vector<2x32xf32>
    %517 = math.tanh %516 : vector<2x32xf32>
    %518 = arith.mulf %512, %517 : vector<2x32xf32>
    %519 = vector.extract_strided_slice %518 {offsets = [0, 0], sizes = [1, 32], strides = [1, 1]} : vector<2x32xf32> to vector<1x32xf32>
    %c0_157 = arith.constant 0 : index
    %c448 = arith.constant 448 : index
    %520 = vector.load %arg19[%c0_157, %c448] : memref<2x512xf32, #tpu.memory_space<vmem>>, vector<1x32xf32>
    tpu.vector_store %arg19[%c0_157, %c448], %519 {strides = array<i32>} : memref<2x512xf32, #tpu.memory_space<vmem>>, vector<1x32xf32>,
    %521 = vector.extract_strided_slice %518 {offsets = [1, 0], sizes = [1, 32], strides = [1, 1]} : vector<2x32xf32> to vector<1x32xf32>
    %c0_158 = arith.constant 0 : index
    %c480 = arith.constant 480 : index
    %522 = vector.load %arg19[%c0_158, %c480] : memref<2x512xf32, #tpu.memory_space<vmem>>, vector<1x32xf32>
    tpu.vector_store %arg19[%c0_158, %c480], %521 {strides = array<i32>} : memref<2x512xf32, #tpu.memory_space<vmem>>, vector<1x32xf32>,
    %c16_159 = arith.constant 16 : index
    %c0_160 = arith.constant 0 : index
    %523 = vector.load %arg18[%c16_159, %c0_160] : memref<32x128xf32, #tpu.memory_space<vmem>>, vector<2x128xf32>
    %cst_161 = arith.constant dense<0.000000e+00> : vector<2x128xf32>
    %524 = tpu.matmul %518, %344, %cst_161 {dimension_numbers = #tpu.dot_dimension_numbers<[1], [0], [0], [1], [0, 0, 1, 1], [], []>} : vector<2x32xf32>, vector<32x128xf32>, vector<2x128xf32> -> vector<2x128xf32>
    %525 = arith.addf %523, %524 : vector<2x128xf32>
    %526 = arith.negf %525 : vector<2x128xf32>
    %527 = math.exp %526 : vector<2x128xf32>
    %cst_162 = arith.constant 1.000000e+00 : f32
    %528 = vector.broadcast %cst_162 : f32 to vector<2x128xf32>
    %529 = arith.addf %528, %527 : vector<2x128xf32>
    %530 = arith.divf %528, %529 : vector<2x128xf32>
    %531 = math.tanh %525 : vector<2x128xf32>
    %532 = vector.extract_strided_slice %530 {offsets = [0, 0], sizes = [2, 32], strides = [1, 1]} : vector<2x128xf32> to vector<2x32xf32>
    %533 = vector.extract_strided_slice %530 {offsets = [0, 32], sizes = [2, 32], strides = [1, 1]} : vector<2x128xf32> to vector<2x32xf32>
    %534 = vector.extract_strided_slice %530 {offsets = [0, 96], sizes = [2, 32], strides = [1, 1]} : vector<2x128xf32> to vector<2x32xf32>
    %535 = vector.extract_strided_slice %531 {offsets = [0, 64], sizes = [2, 32], strides = [1, 1]} : vector<2x128xf32> to vector<2x32xf32>
    %536 = arith.mulf %533, %516 : vector<2x32xf32>
    %537 = arith.mulf %532, %535 : vector<2x32xf32>
    %538 = arith.addf %536, %537 : vector<2x32xf32>
    %539 = math.tanh %538 : vector<2x32xf32>
    %540 = arith.mulf %534, %539 : vector<2x32xf32>
    %541 = vector.extract_strided_slice %540 {offsets = [0, 0], sizes = [1, 32], strides = [1, 1]} : vector<2x32xf32> to vector<1x32xf32>
    %c1 = arith.constant 1 : index
    %c0_163 = arith.constant 0 : index
    %542 = vector.load %arg19[%c1, %c0_163] : memref<2x512xf32, #tpu.memory_space<vmem>>, vector<1x32xf32>
    tpu.vector_store %arg19[%c1, %c0_163], %541 {strides = array<i32>} : memref<2x512xf32, #tpu.memory_space<vmem>>, vector<1x32xf32>,
    %543 = vector.extract_strided_slice %540 {offsets = [1, 0], sizes = [1, 32], strides = [1, 1]} : vector<2x32xf32> to vector<1x32xf32>
    %c1_164 = arith.constant 1 : index
    %c32_165 = arith.constant 32 : index
    %544 = vector.load %arg19[%c1_164, %c32_165] : memref<2x512xf32, #tpu.memory_space<vmem>>, vector<1x32xf32>
    tpu.vector_store %arg19[%c1_164, %c32_165], %543 {strides = array<i32>} : memref<2x512xf32, #tpu.memory_space<vmem>>, vector<1x32xf32>,
    %c18_166 = arith.constant 18 : index
    %c0_167 = arith.constant 0 : index
    %545 = vector.load %arg18[%c18_166, %c0_167] : memref<32x128xf32, #tpu.memory_space<vmem>>, vector<2x128xf32>
    %cst_168 = arith.constant dense<0.000000e+00> : vector<2x128xf32>
    %546 = tpu.matmul %540, %344, %cst_168 {dimension_numbers = #tpu.dot_dimension_numbers<[1], [0], [0], [1], [0, 0, 1, 1], [], []>} : vector<2x32xf32>, vector<32x128xf32>, vector<2x128xf32> -> vector<2x128xf32>
    %547 = arith.addf %545, %546 : vector<2x128xf32>
    %548 = arith.negf %547 : vector<2x128xf32>
    %549 = math.exp %548 : vector<2x128xf32>
    %cst_169 = arith.constant 1.000000e+00 : f32
    %550 = vector.broadcast %cst_169 : f32 to vector<2x128xf32>
    %551 = arith.addf %550, %549 : vector<2x128xf32>
    %552 = arith.divf %550, %551 : vector<2x128xf32>
    %553 = math.tanh %547 : vector<2x128xf32>
    %554 = vector.extract_strided_slice %552 {offsets = [0, 0], sizes = [2, 32], strides = [1, 1]} : vector<2x128xf32> to vector<2x32xf32>
    %555 = vector.extract_strided_slice %552 {offsets = [0, 32], sizes = [2, 32], strides = [1, 1]} : vector<2x128xf32> to vector<2x32xf32>
    %556 = vector.extract_strided_slice %552 {offsets = [0, 96], sizes = [2, 32], strides = [1, 1]} : vector<2x128xf32> to vector<2x32xf32>
    %557 = vector.extract_strided_slice %553 {offsets = [0, 64], sizes = [2, 32], strides = [1, 1]} : vector<2x128xf32> to vector<2x32xf32>
    %558 = arith.mulf %555, %538 : vector<2x32xf32>
    %559 = arith.mulf %554, %557 : vector<2x32xf32>
    %560 = arith.addf %558, %559 : vector<2x32xf32>
    %561 = math.tanh %560 : vector<2x32xf32>
    %562 = arith.mulf %556, %561 : vector<2x32xf32>
    %563 = vector.extract_strided_slice %562 {offsets = [0, 0], sizes = [1, 32], strides = [1, 1]} : vector<2x32xf32> to vector<1x32xf32>
    %c1_170 = arith.constant 1 : index
    %c64_171 = arith.constant 64 : index
    %564 = vector.load %arg19[%c1_170, %c64_171] : memref<2x512xf32, #tpu.memory_space<vmem>>, vector<1x32xf32>
    tpu.vector_store %arg19[%c1_170, %c64_171], %563 {strides = array<i32>} : memref<2x512xf32, #tpu.memory_space<vmem>>, vector<1x32xf32>,
    %565 = vector.extract_strided_slice %562 {offsets = [1, 0], sizes = [1, 32], strides = [1, 1]} : vector<2x32xf32> to vector<1x32xf32>
    %c1_172 = arith.constant 1 : index
    %c96_173 = arith.constant 96 : index
    %566 = vector.load %arg19[%c1_172, %c96_173] : memref<2x512xf32, #tpu.memory_space<vmem>>, vector<1x32xf32>
    tpu.vector_store %arg19[%c1_172, %c96_173], %565 {strides = array<i32>} : memref<2x512xf32, #tpu.memory_space<vmem>>, vector<1x32xf32>,
    %c20_174 = arith.constant 20 : index
    %c0_175 = arith.constant 0 : index
    %567 = vector.load %arg18[%c20_174, %c0_175] : memref<32x128xf32, #tpu.memory_space<vmem>>, vector<2x128xf32>
    %cst_176 = arith.constant dense<0.000000e+00> : vector<2x128xf32>
    %568 = tpu.matmul %562, %344, %cst_176 {dimension_numbers = #tpu.dot_dimension_numbers<[1], [0], [0], [1], [0, 0, 1, 1], [], []>} : vector<2x32xf32>, vector<32x128xf32>, vector<2x128xf32> -> vector<2x128xf32>
    %569 = arith.addf %567, %568 : vector<2x128xf32>
    %570 = arith.negf %569 : vector<2x128xf32>
    %571 = math.exp %570 : vector<2x128xf32>
    %cst_177 = arith.constant 1.000000e+00 : f32
    %572 = vector.broadcast %cst_177 : f32 to vector<2x128xf32>
    %573 = arith.addf %572, %571 : vector<2x128xf32>
    %574 = arith.divf %572, %573 : vector<2x128xf32>
    %575 = math.tanh %569 : vector<2x128xf32>
    %576 = vector.extract_strided_slice %574 {offsets = [0, 0], sizes = [2, 32], strides = [1, 1]} : vector<2x128xf32> to vector<2x32xf32>
    %577 = vector.extract_strided_slice %574 {offsets = [0, 32], sizes = [2, 32], strides = [1, 1]} : vector<2x128xf32> to vector<2x32xf32>
    %578 = vector.extract_strided_slice %574 {offsets = [0, 96], sizes = [2, 32], strides = [1, 1]} : vector<2x128xf32> to vector<2x32xf32>
    %579 = vector.extract_strided_slice %575 {offsets = [0, 64], sizes = [2, 32], strides = [1, 1]} : vector<2x128xf32> to vector<2x32xf32>
    %580 = arith.mulf %577, %560 : vector<2x32xf32>
    %581 = arith.mulf %576, %579 : vector<2x32xf32>
    %582 = arith.addf %580, %581 : vector<2x32xf32>
    %583 = math.tanh %582 : vector<2x32xf32>
    %584 = arith.mulf %578, %583 : vector<2x32xf32>
    %585 = vector.extract_strided_slice %584 {offsets = [0, 0], sizes = [1, 32], strides = [1, 1]} : vector<2x32xf32> to vector<1x32xf32>
    %c1_178 = arith.constant 1 : index
    %c128_179 = arith.constant 128 : index
    %586 = vector.load %arg19[%c1_178, %c128_179] : memref<2x512xf32, #tpu.memory_space<vmem>>, vector<1x32xf32>
    tpu.vector_store %arg19[%c1_178, %c128_179], %585 {strides = array<i32>} : memref<2x512xf32, #tpu.memory_space<vmem>>, vector<1x32xf32>,
    %587 = vector.extract_strided_slice %584 {offsets = [1, 0], sizes = [1, 32], strides = [1, 1]} : vector<2x32xf32> to vector<1x32xf32>
    %c1_180 = arith.constant 1 : index
    %c160_181 = arith.constant 160 : index
    %588 = vector.load %arg19[%c1_180, %c160_181] : memref<2x512xf32, #tpu.memory_space<vmem>>, vector<1x32xf32>
    tpu.vector_store %arg19[%c1_180, %c160_181], %587 {strides = array<i32>} : memref<2x512xf32, #tpu.memory_space<vmem>>, vector<1x32xf32>,
    %c22_182 = arith.constant 22 : index
    %c0_183 = arith.constant 0 : index
    %589 = vector.load %arg18[%c22_182, %c0_183] : memref<32x128xf32, #tpu.memory_space<vmem>>, vector<2x128xf32>
    %cst_184 = arith.constant dense<0.000000e+00> : vector<2x128xf32>
    %590 = tpu.matmul %584, %344, %cst_184 {dimension_numbers = #tpu.dot_dimension_numbers<[1], [0], [0], [1], [0, 0, 1, 1], [], []>} : vector<2x32xf32>, vector<32x128xf32>, vector<2x128xf32> -> vector<2x128xf32>
    %591 = arith.addf %589, %590 : vector<2x128xf32>
    %592 = arith.negf %591 : vector<2x128xf32>
    %593 = math.exp %592 : vector<2x128xf32>
    %cst_185 = arith.constant 1.000000e+00 : f32
    %594 = vector.broadcast %cst_185 : f32 to vector<2x128xf32>
    %595 = arith.addf %594, %593 : vector<2x128xf32>
    %596 = arith.divf %594, %595 : vector<2x128xf32>
    %597 = math.tanh %591 : vector<2x128xf32>
    %598 = vector.extract_strided_slice %596 {offsets = [0, 0], sizes = [2, 32], strides = [1, 1]} : vector<2x128xf32> to vector<2x32xf32>
    %599 = vector.extract_strided_slice %596 {offsets = [0, 32], sizes = [2, 32], strides = [1, 1]} : vector<2x128xf32> to vector<2x32xf32>
    %600 = vector.extract_strided_slice %596 {offsets = [0, 96], sizes = [2, 32], strides = [1, 1]} : vector<2x128xf32> to vector<2x32xf32>
    %601 = vector.extract_strided_slice %597 {offsets = [0, 64], sizes = [2, 32], strides = [1, 1]} : vector<2x128xf32> to vector<2x32xf32>
    %602 = arith.mulf %599, %582 : vector<2x32xf32>
    %603 = arith.mulf %598, %601 : vector<2x32xf32>
    %604 = arith.addf %602, %603 : vector<2x32xf32>
    %605 = math.tanh %604 : vector<2x32xf32>
    %606 = arith.mulf %600, %605 : vector<2x32xf32>
    %607 = vector.extract_strided_slice %606 {offsets = [0, 0], sizes = [1, 32], strides = [1, 1]} : vector<2x32xf32> to vector<1x32xf32>
    %c1_186 = arith.constant 1 : index
    %c192_187 = arith.constant 192 : index
    %608 = vector.load %arg19[%c1_186, %c192_187] : memref<2x512xf32, #tpu.memory_space<vmem>>, vector<1x32xf32>
    tpu.vector_store %arg19[%c1_186, %c192_187], %607 {strides = array<i32>} : memref<2x512xf32, #tpu.memory_space<vmem>>, vector<1x32xf32>,
    %609 = vector.extract_strided_slice %606 {offsets = [1, 0], sizes = [1, 32], strides = [1, 1]} : vector<2x32xf32> to vector<1x32xf32>
    %c1_188 = arith.constant 1 : index
    %c224_189 = arith.constant 224 : index
    %610 = vector.load %arg19[%c1_188, %c224_189] : memref<2x512xf32, #tpu.memory_space<vmem>>, vector<1x32xf32>
    tpu.vector_store %arg19[%c1_188, %c224_189], %609 {strides = array<i32>} : memref<2x512xf32, #tpu.memory_space<vmem>>, vector<1x32xf32>,
    %c24_190 = arith.constant 24 : index
    %c0_191 = arith.constant 0 : index
    %611 = vector.load %arg18[%c24_190, %c0_191] : memref<32x128xf32, #tpu.memory_space<vmem>>, vector<2x128xf32>
    %cst_192 = arith.constant dense<0.000000e+00> : vector<2x128xf32>
    %612 = tpu.matmul %606, %344, %cst_192 {dimension_numbers = #tpu.dot_dimension_numbers<[1], [0], [0], [1], [0, 0, 1, 1], [], []>} : vector<2x32xf32>, vector<32x128xf32>, vector<2x128xf32> -> vector<2x128xf32>
    %613 = arith.addf %611, %612 : vector<2x128xf32>
    %614 = arith.negf %613 : vector<2x128xf32>
    %615 = math.exp %614 : vector<2x128xf32>
    %cst_193 = arith.constant 1.000000e+00 : f32
    %616 = vector.broadcast %cst_193 : f32 to vector<2x128xf32>
    %617 = arith.addf %616, %615 : vector<2x128xf32>
    %618 = arith.divf %616, %617 : vector<2x128xf32>
    %619 = math.tanh %613 : vector<2x128xf32>
    %620 = vector.extract_strided_slice %618 {offsets = [0, 0], sizes = [2, 32], strides = [1, 1]} : vector<2x128xf32> to vector<2x32xf32>
    %621 = vector.extract_strided_slice %618 {offsets = [0, 32], sizes = [2, 32], strides = [1, 1]} : vector<2x128xf32> to vector<2x32xf32>
    %622 = vector.extract_strided_slice %618 {offsets = [0, 96], sizes = [2, 32], strides = [1, 1]} : vector<2x128xf32> to vector<2x32xf32>
    %623 = vector.extract_strided_slice %619 {offsets = [0, 64], sizes = [2, 32], strides = [1, 1]} : vector<2x128xf32> to vector<2x32xf32>
    %624 = arith.mulf %621, %604 : vector<2x32xf32>
    %625 = arith.mulf %620, %623 : vector<2x32xf32>
    %626 = arith.addf %624, %625 : vector<2x32xf32>
    %627 = math.tanh %626 : vector<2x32xf32>
    %628 = arith.mulf %622, %627 : vector<2x32xf32>
    %629 = vector.extract_strided_slice %628 {offsets = [0, 0], sizes = [1, 32], strides = [1, 1]} : vector<2x32xf32> to vector<1x32xf32>
    %c1_194 = arith.constant 1 : index
    %c256_195 = arith.constant 256 : index
    %630 = vector.load %arg19[%c1_194, %c256_195] : memref<2x512xf32, #tpu.memory_space<vmem>>, vector<1x32xf32>
    tpu.vector_store %arg19[%c1_194, %c256_195], %629 {strides = array<i32>} : memref<2x512xf32, #tpu.memory_space<vmem>>, vector<1x32xf32>,
    %631 = vector.extract_strided_slice %628 {offsets = [1, 0], sizes = [1, 32], strides = [1, 1]} : vector<2x32xf32> to vector<1x32xf32>
    %c1_196 = arith.constant 1 : index
    %c288_197 = arith.constant 288 : index
    %632 = vector.load %arg19[%c1_196, %c288_197] : memref<2x512xf32, #tpu.memory_space<vmem>>, vector<1x32xf32>
    tpu.vector_store %arg19[%c1_196, %c288_197], %631 {strides = array<i32>} : memref<2x512xf32, #tpu.memory_space<vmem>>, vector<1x32xf32>,
    %c26_198 = arith.constant 26 : index
    %c0_199 = arith.constant 0 : index
    %633 = vector.load %arg18[%c26_198, %c0_199] : memref<32x128xf32, #tpu.memory_space<vmem>>, vector<2x128xf32>
    %cst_200 = arith.constant dense<0.000000e+00> : vector<2x128xf32>
    %634 = tpu.matmul %628, %344, %cst_200 {dimension_numbers = #tpu.dot_dimension_numbers<[1], [0], [0], [1], [0, 0, 1, 1], [], []>} : vector<2x32xf32>, vector<32x128xf32>, vector<2x128xf32> -> vector<2x128xf32>
    %635 = arith.addf %633, %634 : vector<2x128xf32>
    %636 = arith.negf %635 : vector<2x128xf32>
    %637 = math.exp %636 : vector<2x128xf32>
    %cst_201 = arith.constant 1.000000e+00 : f32
    %638 = vector.broadcast %cst_201 : f32 to vector<2x128xf32>
    %639 = arith.addf %638, %637 : vector<2x128xf32>
    %640 = arith.divf %638, %639 : vector<2x128xf32>
    %641 = math.tanh %635 : vector<2x128xf32>
    %642 = vector.extract_strided_slice %640 {offsets = [0, 0], sizes = [2, 32], strides = [1, 1]} : vector<2x128xf32> to vector<2x32xf32>
    %643 = vector.extract_strided_slice %640 {offsets = [0, 32], sizes = [2, 32], strides = [1, 1]} : vector<2x128xf32> to vector<2x32xf32>
    %644 = vector.extract_strided_slice %640 {offsets = [0, 96], sizes = [2, 32], strides = [1, 1]} : vector<2x128xf32> to vector<2x32xf32>
    %645 = vector.extract_strided_slice %641 {offsets = [0, 64], sizes = [2, 32], strides = [1, 1]} : vector<2x128xf32> to vector<2x32xf32>
    %646 = arith.mulf %643, %626 : vector<2x32xf32>
    %647 = arith.mulf %642, %645 : vector<2x32xf32>
    %648 = arith.addf %646, %647 : vector<2x32xf32>
    %649 = math.tanh %648 : vector<2x32xf32>
    %650 = arith.mulf %644, %649 : vector<2x32xf32>
    %651 = vector.extract_strided_slice %650 {offsets = [0, 0], sizes = [1, 32], strides = [1, 1]} : vector<2x32xf32> to vector<1x32xf32>
    %c1_202 = arith.constant 1 : index
    %c320_203 = arith.constant 320 : index
    %652 = vector.load %arg19[%c1_202, %c320_203] : memref<2x512xf32, #tpu.memory_space<vmem>>, vector<1x32xf32>
    tpu.vector_store %arg19[%c1_202, %c320_203], %651 {strides = array<i32>} : memref<2x512xf32, #tpu.memory_space<vmem>>, vector<1x32xf32>,
    %653 = vector.extract_strided_slice %650 {offsets = [1, 0], sizes = [1, 32], strides = [1, 1]} : vector<2x32xf32> to vector<1x32xf32>
    %c1_204 = arith.constant 1 : index
    %c352_205 = arith.constant 352 : index
    %654 = vector.load %arg19[%c1_204, %c352_205] : memref<2x512xf32, #tpu.memory_space<vmem>>, vector<1x32xf32>
    tpu.vector_store %arg19[%c1_204, %c352_205], %653 {strides = array<i32>} : memref<2x512xf32, #tpu.memory_space<vmem>>, vector<1x32xf32>,
    %c28_206 = arith.constant 28 : index
    %c0_207 = arith.constant 0 : index
    %655 = vector.load %arg18[%c28_206, %c0_207] : memref<32x128xf32, #tpu.memory_space<vmem>>, vector<2x128xf32>
    %cst_208 = arith.constant dense<0.000000e+00> : vector<2x128xf32>
    %656 = tpu.matmul %650, %344, %cst_208 {dimension_numbers = #tpu.dot_dimension_numbers<[1], [0], [0], [1], [0, 0, 1, 1], [], []>} : vector<2x32xf32>, vector<32x128xf32>, vector<2x128xf32> -> vector<2x128xf32>
    %657 = arith.addf %655, %656 : vector<2x128xf32>
    %658 = arith.negf %657 : vector<2x128xf32>
    %659 = math.exp %658 : vector<2x128xf32>
    %cst_209 = arith.constant 1.000000e+00 : f32
    %660 = vector.broadcast %cst_209 : f32 to vector<2x128xf32>
    %661 = arith.addf %660, %659 : vector<2x128xf32>
    %662 = arith.divf %660, %661 : vector<2x128xf32>
    %663 = math.tanh %657 : vector<2x128xf32>
    %664 = vector.extract_strided_slice %662 {offsets = [0, 0], sizes = [2, 32], strides = [1, 1]} : vector<2x128xf32> to vector<2x32xf32>
    %665 = vector.extract_strided_slice %662 {offsets = [0, 32], sizes = [2, 32], strides = [1, 1]} : vector<2x128xf32> to vector<2x32xf32>
    %666 = vector.extract_strided_slice %662 {offsets = [0, 96], sizes = [2, 32], strides = [1, 1]} : vector<2x128xf32> to vector<2x32xf32>
    %667 = vector.extract_strided_slice %663 {offsets = [0, 64], sizes = [2, 32], strides = [1, 1]} : vector<2x128xf32> to vector<2x32xf32>
    %668 = arith.mulf %665, %648 : vector<2x32xf32>
    %669 = arith.mulf %664, %667 : vector<2x32xf32>
    %670 = arith.addf %668, %669 : vector<2x32xf32>
    %671 = math.tanh %670 : vector<2x32xf32>
    %672 = arith.mulf %666, %671 : vector<2x32xf32>
    %673 = vector.extract_strided_slice %672 {offsets = [0, 0], sizes = [1, 32], strides = [1, 1]} : vector<2x32xf32> to vector<1x32xf32>
    %c1_210 = arith.constant 1 : index
    %c384_211 = arith.constant 384 : index
    %674 = vector.load %arg19[%c1_210, %c384_211] : memref<2x512xf32, #tpu.memory_space<vmem>>, vector<1x32xf32>
    tpu.vector_store %arg19[%c1_210, %c384_211], %673 {strides = array<i32>} : memref<2x512xf32, #tpu.memory_space<vmem>>, vector<1x32xf32>,
    %675 = vector.extract_strided_slice %672 {offsets = [1, 0], sizes = [1, 32], strides = [1, 1]} : vector<2x32xf32> to vector<1x32xf32>
    %c1_212 = arith.constant 1 : index
    %c416_213 = arith.constant 416 : index
    %676 = vector.load %arg19[%c1_212, %c416_213] : memref<2x512xf32, #tpu.memory_space<vmem>>, vector<1x32xf32>
    tpu.vector_store %arg19[%c1_212, %c416_213], %675 {strides = array<i32>} : memref<2x512xf32, #tpu.memory_space<vmem>>, vector<1x32xf32>,
    %c30_214 = arith.constant 30 : index
    %c0_215 = arith.constant 0 : index
    %677 = vector.load %arg18[%c30_214, %c0_215] : memref<32x128xf32, #tpu.memory_space<vmem>>, vector<2x128xf32>
    %cst_216 = arith.constant dense<0.000000e+00> : vector<2x128xf32>
    %678 = tpu.matmul %672, %344, %cst_216 {dimension_numbers = #tpu.dot_dimension_numbers<[1], [0], [0], [1], [0, 0, 1, 1], [], []>} : vector<2x32xf32>, vector<32x128xf32>, vector<2x128xf32> -> vector<2x128xf32>
    %679 = arith.addf %677, %678 : vector<2x128xf32>
    %680 = arith.negf %679 : vector<2x128xf32>
    %681 = math.exp %680 : vector<2x128xf32>
    %cst_217 = arith.constant 1.000000e+00 : f32
    %682 = vector.broadcast %cst_217 : f32 to vector<2x128xf32>
    %683 = arith.addf %682, %681 : vector<2x128xf32>
    %684 = arith.divf %682, %683 : vector<2x128xf32>
    %685 = math.tanh %679 : vector<2x128xf32>
    %686 = vector.extract_strided_slice %684 {offsets = [0, 0], sizes = [2, 32], strides = [1, 1]} : vector<2x128xf32> to vector<2x32xf32>
    %687 = vector.extract_strided_slice %684 {offsets = [0, 32], sizes = [2, 32], strides = [1, 1]} : vector<2x128xf32> to vector<2x32xf32>
    %688 = vector.extract_strided_slice %684 {offsets = [0, 96], sizes = [2, 32], strides = [1, 1]} : vector<2x128xf32> to vector<2x32xf32>
    %689 = vector.extract_strided_slice %685 {offsets = [0, 64], sizes = [2, 32], strides = [1, 1]} : vector<2x128xf32> to vector<2x32xf32>
    %690 = arith.mulf %687, %670 : vector<2x32xf32>
    %691 = arith.mulf %686, %689 : vector<2x32xf32>
    %692 = arith.addf %690, %691 : vector<2x32xf32>
    %693 = math.tanh %692 : vector<2x32xf32>
    %694 = arith.mulf %688, %693 : vector<2x32xf32>
    %695 = vector.extract_strided_slice %694 {offsets = [0, 0], sizes = [1, 32], strides = [1, 1]} : vector<2x32xf32> to vector<1x32xf32>
    %c1_218 = arith.constant 1 : index
    %c448_219 = arith.constant 448 : index
    %696 = vector.load %arg19[%c1_218, %c448_219] : memref<2x512xf32, #tpu.memory_space<vmem>>, vector<1x32xf32>
    tpu.vector_store %arg19[%c1_218, %c448_219], %695 {strides = array<i32>} : memref<2x512xf32, #tpu.memory_space<vmem>>, vector<1x32xf32>,
    %697 = vector.extract_strided_slice %694 {offsets = [1, 0], sizes = [1, 32], strides = [1, 1]} : vector<2x32xf32> to vector<1x32xf32>
    %c1_220 = arith.constant 1 : index
    %c480_221 = arith.constant 480 : index
    %698 = vector.load %arg19[%c1_220, %c480_221] : memref<2x512xf32, #tpu.memory_space<vmem>>, vector<1x32xf32>
    tpu.vector_store %arg19[%c1_220, %c480_221], %697 {strides = array<i32>} : memref<2x512xf32, #tpu.memory_space<vmem>>, vector<1x32xf32>,
    %c0_222 = arith.constant 0 : index
    %c0_223 = arith.constant 0 : index
    %699 = vector.load %arg13[%c0_222, %c0_223] : memref<512x32xbf16, #tpu.memory_space<vmem>>, vector<512x32xbf16>
    %c0_224 = arith.constant 0 : index
    %c0_225 = arith.constant 0 : index
    %700 = vector.load %arg19[%c0_224, %c0_225] : memref<2x512xf32, #tpu.memory_space<vmem>>, vector<2x512xf32>
    %701 = arith.truncf %700 : vector<2x512xf32> to vector<2x512xbf16>
    %cst_226 = arith.constant dense<0.000000e+00> : vector<2x32xf32>
    %702 = tpu.matmul %701, %699, %cst_226 {dimension_numbers = #tpu.dot_dimension_numbers<[1], [0], [0], [1], [0, 0, 1, 1], [], []>} : vector<2x512xbf16>, vector<512x32xbf16>, vector<2x32xf32> -> vector<2x32xf32>
    %c0_227 = arith.constant 0 : index
    %c0_228 = arith.constant 0 : index
    %703 = vector.load %arg14[%c0_227, %c0_228] : memref<1x32xf32, #tpu.memory_space<vmem>>, vector<1x32xf32>
    %704 = vector.broadcast %703 : vector<1x32xf32> to vector<2x32xf32>
    %705 = arith.addf %702, %704 : vector<2x32xf32>
    %c0_229 = arith.constant 0 : index
    %c0_230 = arith.constant 0 : index
    %706 = vector.load %arg15[%c0_229, %c0_230] : memref<2x32xf32, #tpu.memory_space<vmem>>, vector<2x32xf32>
    tpu.vector_store %arg15[%c0_229, %c0_230], %705 {strides = array<i32>} : memref<2x32xf32, #tpu.memory_space<vmem>>, vector<2x32xf32>,
    return
  }
}

</mosaic_0001>

<bundles_post_ra>
// kernel: tpu_custom_call.1
= control target key start
LH: loop header
LB: loop body
LE: loop exit
PB: predicated region body
PF: predicated region fallthrough
CT: control target
= control target key end

     0   :  { %20 = vsyncpa [#allocation7], 0  ;;  %s7785_s0 = inlined_call_operand.vmem [shape: f32[2,8], index: 0, kind: input, shape index: {}]   ;;  %s7786_s1 = inlined_call_operand.vmem [shape: f32[8,128], index: 1, kind: input, shape index: {}]   ;;  %s7787_s2 = inlined_call_operand.vmem [shape: f32[1,128], index: 2, kind: input, shape index: {}]   ;;  %s7788_s3 = inlined_call_operand.vmem [shape: bf16[128,128], index: 3, kind: input, shape index: {}]   ;;  %s7789_s4 = inlined_call_operand.vmem [shape: f32[1,128], index: 4, kind: input, shape index: {}]   ;;  %s7790_s5 = inlined_call_operand.vmem [shape: bf16[128,64], index: 5, kind: input, shape index: {}]   ;;  %s7791_s6 = inlined_call_operand.vmem [shape: f32[1,64], index: 6, kind: input, shape index: {}]   ;;  %s7792_s7 = inlined_call_operand.hbm [shape: bf16[64,2048], index: 7, kind: input, shape index: {}]   ;;  %s7793_s8 = inlined_call_operand.vmem [shape: f32[1,2048], index: 8, kind: input, shape index: {}]   ;;  %s7794_s9 = inlined_call_operand.vmem [shape: f32[32,128], index: 9, kind: input, shape index: {}]   ;;  %s7795_s10 = inlined_call_operand.vmem [shape: f32[32,128], index: 10, kind: input, shape index: {}]   ;;  %s7796_s11 = inlined_call_operand.vmem [shape: f32[1,128], index: 11, kind: input, shape index: {}]   ;;  %s7797_s12 = inlined_call_operand.vmem [shape: f32[32,128], index: 12, kind: input, shape index: {}]   ;;  %s7798_s13 = inlined_call_operand.vmem [shape: bf16[512,32], index: 13, kind: input, shape index: {}]   ;;  %s7799_s14 = inlined_call_operand.vmem [shape: f32[1,32], index: 14, kind: input, shape index: {}]   ;;  %s7800_s15 = inlined_call_operand.hbm [shape: f32[2,32], index: 15, kind: output, shape index: {}]  }
   0x1   :  { %21 = vsyncpa [#allocation8], 0  ;;  %s6831_s18 = smov [#allocation6]   ;;  %s6783_s22 = scalar_lea.hbm %s7792_s7, 8192 }
   0x2   :  { %s41_s19 = sshll.u32 %s6831_s18, 4  ;;  %p6784_p0 = scmp.ne.s32.totalorder %s7792_s7, %s6783_s22  ;;  %s42_s19 = int_to_ptr.vmem [resolvable:$true] %s41_s19 }
   0x3   :  { %p6787_p1 = scmp.lt.u32.totalorder %s6783_s22, %s7792_s7 }
   0x5   :  { %p6789_p2 = pnand %p6787_p1, %p6784_p0 }
   0x7   :  { %6792 = shalt.err (!%p6789_p2)
}
   0x8   :  { %s6793_s27 = scalar_lea.vmem %s42_s19, 8192  ;;  %p6798_p4 = scmp.lt.s32.totalorder %s42_s19, %s42_s19 }
   0x9   :  { %p6794_p3 = scmp.ne.s32.totalorder %s42_s19, %s6793_s27  ;;  %p6799_p5 = scmp.lt.s32.totalorder %s6793_s27, %s6793_s27 }
   0xb   :  { %p6800_p6 = por %p6799_p5, %p6798_p4 }
   0xd   :  { %p6801_p7 = pnand %p6800_p6, %p6794_p3 }
   0xf   :  { %6804 = shalt.err (!%p6801_p7)
}
  0x10   :  { %s6832_s28 = smov 1024   ;;  %s6833_s29 = smov 64  }
  0x11   :  { %47 = dma.hbm_to_vmem [thread:$0]  %s7792_s7, 8192, %s42_s19, [#allocation7], %s6832_s28, %s6832_s28, %s6833_s29  }
  0x12   :  { %6827 = dma.done.wait [#allocation7], 8192  }
  0x13   :  { %6828 = vsyncadd [#allocation7], 4294959104  ;;  %v6834_v0 = vmov 0.0   ;;  %vm6835_vm0 = vmmov 0   ;;  %vm75_vm1 = vcmask 64512   ;;  %v67_v1 = vld [vmem:[%s7786_s1] sm:$0xff] }
  0x14   :  { %5854 = vmatprep.subr.mxu0 %v6834_v0  ;;  %5856 = vmatprep.mubr.msk.f32.mxu0 %vm6835_vm0, %v6834_v0  ;;  %v66_v2 = vld [vmem:[%s7785_s0] sm:$0x3]  ;;  %v6477_v4 = vld [vmem:[%s7788_s3 + $0x8] sm:$0xff]   ;;  %v6478_v5 = vld [vmem:[%s7788_s3 + $0x10] sm:$0xff]   ;;  %vm845_vm2 = vcmask 523264   ;;  %vm1384_vm3 = vcmask 254976  }
  0x15   :  { %5859 = vmatprep.subr.bf16.mxu1 %v6834_v0  ;;  %5875 = vmatprep.mubr.msk.bf16.mxu1 %vm6835_vm0, %v6834_v0  ;;  %v6476_v3 = vld [vmem:[%s7788_s3] sm:$0xff]   ;;  %v6479_v6 = vld [vmem:[%s7788_s3 + $0x18] sm:$0xff]   ;;  %v6481_v8 = vld [vmem:[%s7788_s3 + $0x28] sm:$0xff]   ;;  %vm1274_vm4 = vcmask 261120   ;;  %vm3263_vm5 = vcmask 253952   ;;  %vm3270_vm6 = vcmask 516352  }
  0x16   :  { %5855 = vmatpush3.msra.mxu0 %v67_v1  ;;  %5860 = vmatpush3.bf16.msra.mxu1 %v6476_v3  ;;  %v6480_v7 = vld [vmem:[%s7788_s3 + $0x20] sm:$0xff]   ;;  %v6482_v9 = vld [vmem:[%s7788_s3 + $0x30] sm:$0xff]   ;;  %v6483_v10 = vld [vmem:[%s7788_s3 + $0x38] sm:$0xff]   ;;  %vm3383_vm7 = vcmask 778752   ;;  %vm3388_vm8 = vcmask 1041152  }
  0x17   :  { %5857 = vmatmul.mubr.msk.f32.vlgmr.msra.gmra.mrb[0].mxu0 %vm75_vm1, %v66_v2  ;;  %5879 = vmatprep.subr.bf16.mxu0 %v6834_v0  ;;  %v6484_v11 = vld [vmem:[%s7790_s5] sm:$0xff]   ;;  %v6485_v12 = vld [vmem:[%s7790_s5 + $0x8] sm:$0xff]   ;;  %v6486_v13 = vld [vmem:[%s7790_s5 + $0x10] sm:$0xff]  }
  0x18   :  { %5895 = vmatprep.mubr.msk.bf16.mxu0 %vm6835_vm0, %v6834_v0  ;;  %5861 = vmatprep.subr.bf16.mxu1 %v6834_v0  ;;  %v6487_v14 = vld [vmem:[%s7790_s5 + $0x18] sm:$0xff]   ;;  %v6488_v15 = vld [vmem:[%s7790_s5 + $0x20] sm:$0xff]   ;;  %v6489_v16 = vld [vmem:[%s7790_s5 + $0x28] sm:$0xff]  }
  0x19   :  { %5880 = vmatpush3.bf16.msra.mxu0 %v6484_v11  ;;  %v5414_v17 = vld [vmem:[%s7787_s2] ss:$0 sm:$0xff]  ;;  %v6490_v23 = vld [vmem:[%s7790_s5 + $0x30] sm:$0xff]   ;;  %v6491_v24 = vld [vmem:[%s7790_s5 + $0x38] sm:$0xff]  }
  0x1a   :  { %5862 = vmatpush3.bf16.msra.mxu1 %v6477_v4  ;;  %5881 = vmatprep.subr.bf16.mxu0 %v6834_v0  ;;  %v376_v25 = vld [vmem:[#allocation6] sm:$0xff]  ;;  %v377_v27 = vld [vmem:[#allocation6 + $0x8] sm:$0xff]  ;;  %v5416_v33 = vld [vmem:[%s7789_s4] ss:$0 sm:$0xff] }
  0x1b   :  { %5863 = vmatprep.subr.bf16.mxu1 %v6834_v0  ;;  %v384_v26 = vld [vmem:[#allocation6 + $0x40] sm:$0xff]  ;;  %v385_v30 = vld [vmem:[#allocation6 + $0x48] sm:$0xff]  ;;  %v378_v2 = vld [vmem:[#allocation6 + $0x10] sm:$0xff] }
  0x1c   :  { %v5434_v28 = vcombine.low %v376_v25, %v384_v26  ;;  %v5435_v29 = vcombine.high %v376_v25, %v384_v26  ;;  %v5436_v31 = vcombine.low %v377_v27, %v385_v30  ;;  %v5437_v32 = vcombine.high %v377_v27, %v385_v30  ;;  %v392_v41 = vld [vmem:[#allocation6 + $0x80] sm:$0xff]  ;;  %v393_v43 = vld [vmem:[#allocation6 + $0x88] sm:$0xff]  ;;  %v386_v3 = vld [vmem:[#allocation6 + $0x50] sm:$0xff] }
  0x1d   :  { %5882 = vmatpush3.bf16.msra.mxu0 %v6485_v12  ;;  %v400_v42 = vld [vmem:[#allocation6 + $0xc0] sm:$0xff]  ;;  %v401_v45 = vld [vmem:[#allocation6 + $0xc8] sm:$0xff]  ;;  %v379_v4 = vld [vmem:[#allocation6 + $0x18] sm:$0xff] }
  0x1e   :  { %5864 = vmatpush3.bf16.msra.mxu1 %v6478_v5  ;;  %5883 = vmatprep.subr.bf16.mxu0 %v6834_v0  ;;  %v5451_v44 = vcombine.high %v392_v41, %v400_v42  ;;  %v5450_v46 = vcombine.low %v392_v41, %v400_v42  ;;  %v5452_v47 = vcombine.low %v393_v43, %v401_v45  ;;  %v408_v49 = vld [vmem:[#allocation6 + $0x100] sm:$0xff]  ;;  %v409_v51 = vld [vmem:[#allocation6 + $0x108] sm:$0xff]  ;;  %v5425_v11 = vld [vmem:[%s7791_s6] ss:$0 sm:$0xff] }
  0x1f   :  { %5865 = vmatprep.subr.bf16.mxu1 %v6834_v0  ;;  %v5453_v48 = vcombine.high %v393_v43, %v401_v45  ;;  %v416_v50 = vld [vmem:[#allocation6 + $0x140] sm:$0xff]  ;;  %v417_v53 = vld [vmem:[#allocation6 + $0x148] sm:$0xff]  ;;  %v5439_v5 = vcombine.high %v378_v2, %v386_v3  ;;  %v410_v25 = vld [vmem:[#allocation6 + $0x110] sm:$0xff] }
  0x20   :  { %v5467_v52 = vcombine.high %v408_v49, %v416_v50  ;;  %v5466_v54 = vcombine.low %v408_v49, %v416_v50  ;;  %v5468_v55 = vcombine.low %v409_v51, %v417_v53  ;;  %v5469_v56 = vcombine.high %v409_v51, %v417_v53  ;;  %v424_v57 = vld [vmem:[#allocation6 + $0x180] sm:$0xff]  ;;  %v425_v59 = vld [vmem:[#allocation6 + $0x188] sm:$0xff]  ;;  %v418_v26 = vld [vmem:[#allocation6 + $0x150] sm:$0xff] }
  0x21   :  { %5884 = vmatpush3.bf16.msra.mxu0 %v6486_v13  ;;  %v432_v58 = vld [vmem:[#allocation6 + $0x1c0] sm:$0xff]  ;;  %v433_v61 = vld [vmem:[#allocation6 + $0x1c8] sm:$0xff]  ;;  %v411_v27 = vld [vmem:[#allocation6 + $0x118] sm:$0xff] }
  0x22   :  { %5866 = vmatpush3.bf16.msra.mxu1 %v6479_v6  ;;  %5885 = vmatprep.subr.bf16.mxu0 %v6834_v0  ;;  %v5483_v60 = vcombine.high %v424_v57, %v432_v58  ;;  %v5482_v62 = vcombine.low %v424_v57, %v432_v58  ;;  %v5484_v63 = vcombine.low %v425_v59, %v433_v61  ;;  %v387_v6 = vld [vmem:[#allocation6 + $0x58] sm:$0xff]  ;;  %v380_v41 = vld [vmem:[#allocation6 + $0x20] sm:$0xff]  ;;  %v381_v43 = vld [vmem:[#allocation6 + $0x28] sm:$0xff] }
  0x23   :  { %5867 = vmatprep.subr.bf16.mxu1 %v6834_v0  ;;  %v5485_v1 = vcombine.high %v425_v59, %v433_v61  ;;  %v388_v42 = vld [vmem:[#allocation6 + $0x60] sm:$0xff]  ;;  %v397_v51 = vld [vmem:[#allocation6 + $0xa8] sm:$0xff] }
  0x24   :  { %v396_v49 = vld [vmem:[#allocation6 + $0xa0] sm:$0xff]  ;;  %v5442_v53 = vcombine.low %v380_v41, %v388_v42  ;;  %v413_v59 = vld [vmem:[#allocation6 + $0x128] sm:$0xff] }
  0x25   :  { %5886 = vmatpush3.bf16.msra.mxu0 %v6487_v14  ;;  %v404_v50 = vld [vmem:[#allocation6 + $0xe0] sm:$0xff] }
  0x26   :  { %5868 = vmatpush3.bf16.msra.mxu1 %v6480_v7  ;;  %5887 = vmatprep.subr.bf16.mxu0 %v6834_v0  ;;  %v5438_v7 = vcombine.low %v378_v2, %v386_v3  ;;  %v412_v57 = vld [vmem:[#allocation6 + $0x120] sm:$0xff]  ;;  %v5458_v61 = vcombine.low %v396_v49, %v404_v50 }
  0x27   :  { %5869 = vmatprep.subr.bf16.mxu1 %v6834_v0  ;;  %v420_v58 = vld [vmem:[#allocation6 + $0x160] sm:$0xff] }
  0x28   :  { %v428_v2 = vld [vmem:[#allocation6 + $0x1a0] sm:$0xff] }
  0x29   :  { %5888 = vmatpush3.bf16.msra.mxu0 %v6488_v15  ;;  %v436_v3 = vld [vmem:[#allocation6 + $0x1e0] sm:$0xff] }
  0x2a   :  { %5870 = vmatpush3.bf16.msra.mxu1 %v6481_v8  ;;  %5889 = vmatprep.subr.bf16.mxu0 %v6834_v0  ;;  %v5440_v8 = vcombine.low %v379_v4, %v387_v6 }
  0x2b   :  { %5871 = vmatprep.subr.bf16.mxu1 %v6834_v0 }
  0x2d   :  { %5890 = vmatpush3.bf16.msra.mxu0 %v6489_v16 }
  0x2e   :  { %5872 = vmatpush3.bf16.msra.mxu1 %v6482_v9  ;;  %5891 = vmatprep.subr.bf16.mxu0 %v6834_v0  ;;  %v5441_v9 = vcombine.high %v379_v4, %v387_v6  ;;  %v429_v4 = vld [vmem:[#allocation6 + $0x1a8] sm:$0xff]  ;;  %v5474_v6 = vcombine.low %v412_v57, %v420_v58 }
  0x2f   :  { %5873 = vmatprep.subr.bf16.mxu1 %v6834_v0 }
  0x31   :  { %5892 = vmatpush3.bf16.msra.mxu0 %v6490_v23 }
  0x32   :  { %5874 = vmatpush3.bf16.msra.mxu1 %v6483_v10  ;;  %5893 = vmatprep.subr.bf16.mxu0 %v6834_v0  ;;  %v6836_v10 = vmov 0  }
  0x33   :  { %849 = vmatprep.subr.bf16.mxu1 %v5435_v29 }
  0x35   :  { %5894 = vmatpush3.bf16.msra.mxu0 %v6491_v24 }
  0x36   :  { %890 = vmatprep.subr.bf16.mxu0 %v5437_v32 }
  0xea   :  { %v145_v18 = vpop.f32.mrb[0].mxu0 }
  0xeb   :  { %v146_v19 = vadd.f32 %v5414_v17, %v145_v18  ;;  %v5858_v20 = vpop.f32.mrb[1].mxu0  ;;  %v394_v17 = vld [vmem:[#allocation6 + $0x90] sm:$0xff] }
  0xec   :  { %v402_v18 = vld [vmem:[#allocation6 + $0xd0] sm:$0xff]  ;;  %v403_v20 = vld [vmem:[#allocation6 + $0xd8] sm:$0xff] }
  0xed   :  { %v149_v21 = vmax.f32 %v146_v19, 0.0  ;;  %v395_v19 = vld [vmem:[#allocation6 + $0x98] sm:$0xff]  ;;  %v5455_v23 = vcombine.high %v394_v17, %v402_v18  ;;  %v5454_v29 = vcombine.low %v394_v17, %v402_v18 }
  0xee   :  { %v5457_v24 = vcombine.high %v395_v19, %v403_v20  ;;  %v5456_v30 = vcombine.low %v395_v19, %v403_v20  ;;  %v398_v19 = vld [vmem:[#allocation6 + $0xb0] sm:$0xff] }
  0xef   :  { %v166_v22 = vpack.c.bf16 %v149_v21, %v149_v21  ;;  %v406_v20 = vld [vmem:[#allocation6 + $0xf0] sm:$0xff] }
  0xf1   :  { %5876 = vmatmul.mubr.bf16.vlgmr.msra.gmra.mrb[0].mxu1 %v166_v22 }
  0xf2   :  { %850 = vmatpush1.bf16.msra.mxu1 %v5434_v28  ;;  %881 = vmatprep.mubr.bf16.mxu1 %v6836_v10  ;;  %v419_v28 = vld [vmem:[#allocation6 + $0x158] sm:$0xff] }
  0xf3   :  { %851 = vmatprep.subr.bf16.mxu1 %v5451_v44  ;;  %v5473_v32 = vcombine.high %v411_v27, %v419_v28  ;;  %v389_v44 = vld [vmem:[#allocation6 + $0x68] sm:$0xff] }
  0xf6   :  { %852 = vmatpush1.bf16.msra.mxu1 %v5450_v46 }
  0xf7   :  { %853 = vmatprep.subr.bf16.mxu1 %v5467_v52  ;;  %v405_v52 = vld [vmem:[#allocation6 + $0xe8] sm:$0xff] }
  0xfa   :  { %854 = vmatpush1.bf16.msra.mxu1 %v5466_v54  ;;  %v5444_v54 = vcombine.low %v381_v43, %v389_v44 }
  0xfb   :  { %855 = vmatprep.subr.bf16.mxu1 %v5483_v60  ;;  %v421_v60 = vld [vmem:[#allocation6 + $0x168] sm:$0xff] }
  0xfe   :  { %856 = vmatpush1.bf16.msra.mxu1 %v5482_v62  ;;  %v5460_v62 = vcombine.low %v397_v51, %v405_v52 }
  0xff   :  { %931 = vmatprep.subr.bf16.mxu1 %v5439_v5  ;;  %v437_v5 = vld [vmem:[#allocation6 + $0x1e8] sm:$0xff] }
 0x1c4   :  { %v256_v34 = vpop.f32.mrb[0].mxu1 }
 0x1c5   :  { %v257_v35 = vadd.f32 %v5416_v33, %v256_v34  ;;  %v5877_v36 = vpop.f32.mrb[1].mxu1  ;;  %v426_v33 = vld [vmem:[#allocation6 + $0x190] sm:$0xff] }
 0x1c6   :  { %v259_v37 = vpop.f32.mrb[2].mxu1  ;;  %v434_v34 = vld [vmem:[#allocation6 + $0x1d0] sm:$0xff]  ;;  %v435_v36 = vld [vmem:[#allocation6 + $0x1d8] sm:$0xff] }
 0x1c7   :  { %v262_v38 = vmax.f32 %v257_v35, 0.0  ;;  %v5878_v39 = vpop.f32.mrb[3].mxu1  ;;  %v427_v35 = vld [vmem:[#allocation6 + $0x198] sm:$0xff]  ;;  %v5470_v37 = vcombine.low %v410_v25, %v418_v26  ;;  %v5486_v45 = vcombine.low %v426_v33, %v434_v34 }
 0x1c8   :  { %v5487_v39 = vcombine.high %v426_v33, %v434_v34  ;;  %v5488_v46 = vcombine.low %v427_v35, %v435_v36 }
 0x1c9   :  { %v279_v40 = vpack.c.bf16 %v262_v38, %v262_v38  ;;  %v5472_v38 = vcombine.low %v411_v27, %v419_v28  ;;  %v414_v28 = vld [vmem:[#allocation6 + $0x130] sm:$0xff] }
 0x1cb   :  { %5896 = vmatmul.mubr.bf16.vlgmr.msra.gmra.mrb[4].mxu0 %v279_v40  ;;  %v5489_v40 = vcombine.high %v427_v35, %v435_v36  ;;  %v430_v36 = vld [vmem:[#allocation6 + $0x1b0] sm:$0xff] }
 0x1cc   :  { %891 = vmatpush1.bf16.msra.mxu0 %v5436_v31  ;;  %922 = vmatprep.mubr.bf16.mxu0 %v6836_v10  ;;  %v5471_v31 = vcombine.high %v410_v25, %v418_v26  ;;  %v5463_v26 = vcombine.high %v398_v19, %v406_v20 }
 0x1cd   :  { %892 = vmatprep.subr.bf16.mxu0 %v5453_v48  ;;  %v5445_v48 = vcombine.high %v381_v43, %v389_v44 }
 0x1d0   :  { %893 = vmatpush1.bf16.msra.mxu0 %v5452_v47  ;;  %v5443_v47 = vcombine.high %v380_v41, %v388_v42 }
 0x1d1   :  { %894 = vmatprep.subr.bf16.mxu0 %v5469_v56  ;;  %v5461_v56 = vcombine.high %v397_v51, %v405_v52 }
 0x1d4   :  { %895 = vmatpush1.bf16.msra.mxu0 %v5468_v55  ;;  %v5459_v55 = vcombine.high %v396_v49, %v404_v50  ;;  %v1271_v49 = vld [vmem:[%s7794_s9 + $0x10] sm:$0xff]  ;;  %v1272_v50 = vld [vmem:[%s7794_s9 + $0x18] sm:$0xff] }
 0x1d5   :  { %896 = vmatprep.subr.bf16.mxu0 %v5485_v1  ;;  %v5477_v1 = vcombine.high %v413_v59, %v421_v60  ;;  %v7064_v51 = vpack.c.bf16 %v1272_v50, %v1271_v49 }
 0x1d8   :  { %897 = vmatpush1.bf16.msra.mxu0 %v5484_v63  ;;  %v5475_v63 = vcombine.high %v412_v57, %v420_v58  ;;  %v6838_v57 = vmov 1983009808  }
 0x1d9   :  { %972 = vmatprep.subr.bf16.mxu0 %v5441_v9  ;;  %v5493_v9 = vcombine.high %v429_v4, %v437_v5  ;;  %v1196_v58 = vunpack.c.l.s4 %v6838_v57 }
 0x29e   :  { %v369_v12 = vpop.f32.mrb[4].mxu0 }
 0x29f   :  { %v370_v13 = vadd.f32 %v5425_v11, %v369_v12  ;;  %v5897_v14 = vpop.f32.mrb[5].mxu0  ;;  %v382_v11 = vld [vmem:[#allocation6 + $0x30] sm:$0xff] }
 0x2a0   :  { %v372_v15 = vpop.f32.mrb[6].mxu0  ;;  %v390_v12 = vld [vmem:[#allocation6 + $0x70] sm:$0xff]  ;;  %v391_v14 = vld [vmem:[#allocation6 + $0x78] sm:$0xff] }
 0x2a1   :  { %6525 = vtanh.f32 %v370_v13  ;;  %v5898_v16 = vpop.f32.mrb[7].mxu0  ;;  %v383_v13 = vld [vmem:[#allocation6 + $0x38] sm:$0xff]  ;;  %v5490_v15 = vcombine.low %v428_v2, %v436_v3  ;;  %v5447_v17 = vcombine.high %v382_v11, %v390_v12 }
 0x2a2   :  { %v5492_v16 = vcombine.low %v429_v4, %v437_v5  ;;  %v5449_v18 = vcombine.high %v383_v13, %v391_v14  ;;  %v5448_v25 = vcombine.low %v383_v13, %v391_v14 }
 0x2ab   :  { %v6526_v21 = vpop.eup %6525 }
 0x2ac   :  { %v7023_v22 = vpack.c.bf16 %v6526_v21, %v6526_v21  ;;  %v399_v21 = vld [vmem:[#allocation6 + $0xb8] sm:$0xff] }
 0x2ae   :  { %5498 = vmatmul.mubr.msk.bf16.vlgmr.msra.gmra.mrb[4].mxu1 %vm845_vm2, %v7023_v22  ;;  %5499 = vmatmul.mubr.msk.bf16.vlgmr.msra.gmra.mrb[8].mxu0 %vm845_vm2, %v7023_v22 }
 0x2af   :  { %932 = vmatpush1.bf16.msra.mxu1 %v5438_v7  ;;  %973 = vmatpush1.bf16.msra.mxu0 %v5440_v8  ;;  %v5476_v7 = vcombine.low %v413_v59, %v421_v60  ;;  %v5491_v8 = vcombine.high %v428_v2, %v436_v3 }
 0x2b0   :  { %933 = vmatprep.subr.bf16.mxu1 %v5455_v23  ;;  %974 = vmatprep.subr.bf16.mxu0 %v5457_v24  ;;  %v407_v23 = vld [vmem:[#allocation6 + $0xf8] sm:$0xff]  ;;  %v5446_v24 = vcombine.low %v382_v11, %v390_v12 }
 0x2b1   :  { %963 = vmatprep.mubr.bf16.mxu1 %v6836_v10  ;;  %1004 = vmatprep.mubr.bf16.mxu0 %v6836_v10  ;;  %v5465_v27 = vcombine.high %v399_v21, %v407_v23  ;;  %v5464_v33 = vcombine.low %v399_v21, %v407_v23 }
 0x2b3   :  { %934 = vmatpush1.bf16.msra.mxu1 %v5454_v29  ;;  %975 = vmatpush1.bf16.msra.mxu0 %v5456_v30  ;;  %v422_v29 = vld [vmem:[#allocation6 + $0x170] sm:$0xff]  ;;  %v415_v30 = vld [vmem:[#allocation6 + $0x138] sm:$0xff] }
 0x2b4   :  { %935 = vmatprep.subr.bf16.mxu1 %v5471_v31  ;;  %976 = vmatprep.subr.bf16.mxu0 %v5473_v32  ;;  %v423_v31 = vld [vmem:[#allocation6 + $0x178] sm:$0xff]  ;;  %v5462_v32 = vcombine.low %v398_v19, %v406_v20  ;;  %v5479_v34 = vcombine.high %v414_v28, %v422_v29 }
 0x2b5   :  { %v5481_v35 = vcombine.high %v415_v30, %v423_v31  ;;  %v5480_v41 = vcombine.low %v415_v30, %v423_v31 }
 0x2b7   :  { %936 = vmatpush1.bf16.msra.mxu1 %v5470_v37  ;;  %977 = vmatpush1.bf16.msra.mxu0 %v5472_v38  ;;  %v438_v37 = vld [vmem:[#allocation6 + $0x1f0] sm:$0xff]  ;;  %v431_v38 = vld [vmem:[#allocation6 + $0x1b8] sm:$0xff] }
 0x2b8   :  { %937 = vmatprep.subr.bf16.mxu1 %v5487_v39  ;;  %978 = vmatprep.subr.bf16.mxu0 %v5489_v40  ;;  %v439_v39 = vld [vmem:[#allocation6 + $0x1f8] sm:$0xff]  ;;  %v5478_v40 = vcombine.low %v414_v28, %v422_v29  ;;  %v5495_v42 = vcombine.high %v430_v36, %v438_v37  ;;  %v5494_v44 = vcombine.low %v430_v36, %v438_v37 }
 0x2b9   :  { %v5497_v43 = vcombine.high %v431_v38, %v439_v39 }
 0x2bb   :  { %938 = vmatpush1.bf16.msra.mxu1 %v5486_v45  ;;  %979 = vmatpush1.bf16.msra.mxu0 %v5488_v46  ;;  %v5496_v45 = vcombine.low %v431_v38, %v439_v39  ;;  %v1269_v46 = vld [vmem:[%s7794_s9] sm:$0xff] }
 0x2bc   :  { %1013 = vmatprep.subr.bf16.mxu1 %v5443_v47  ;;  %1054 = vmatprep.subr.bf16.mxu0 %v5445_v48  ;;  %v6837_v48 = vmov 0.0|0.0  }
 0x2be   :  { %5500 = vmatmul.mubr.msk.bf16.vlgmr.msra.gmra.mrb[8].mxu1 %vm845_vm2, %v7023_v22  ;;  %5501 = vmatmul.mubr.msk.bf16.vlgmr.msra.gmra.mrb[12].mxu0 %vm845_vm2, %v7023_v22 }
 0x2bf   :  { %1014 = vmatpush1.bf16.msra.mxu1 %v5442_v53  ;;  %1055 = vmatpush1.bf16.msra.mxu0 %v5444_v54 }
 0x2c0   :  { %1015 = vmatprep.subr.bf16.mxu1 %v5459_v55  ;;  %1056 = vmatprep.subr.bf16.mxu0 %v5461_v56  ;;  %v441_v55 = vld [vmem:[%s7793_s8] sm:$0xff] }
 0x2c1   :  { %1045 = vmatprep.mubr.bf16.mxu1 %v6836_v10  ;;  %1086 = vmatprep.mubr.bf16.mxu0 %v6836_v10 }
 0x2c3   :  { %1016 = vmatpush1.bf16.msra.mxu1 %v5458_v61  ;;  %1057 = vmatpush1.bf16.msra.mxu0 %v5460_v62 }
 0x2c4   :  { %1017 = vmatprep.subr.bf16.mxu1 %v5475_v63  ;;  %1058 = vmatprep.subr.bf16.mxu0 %v5477_v1  ;;  %v1197_v63 = vunpack.c.0.s8 %v1196_v58 }
 0x2c7   :  { %1018 = vmatpush1.bf16.msra.mxu1 %v5474_v6  ;;  %1059 = vmatpush1.bf16.msra.mxu0 %v5476_v7 }
 0x2c8   :  { %1019 = vmatprep.subr.bf16.mxu1 %v5491_v8  ;;  %1060 = vmatprep.subr.bf16.mxu0 %v5493_v9 }
 0x2cb   :  { %1020 = vmatpush1.bf16.msra.mxu1 %v5490_v15  ;;  %1061 = vmatpush1.bf16.msra.mxu0 %v5492_v16 }
 0x2cc   :  { %1095 = vmatprep.subr.bf16.mxu1 %v5447_v17  ;;  %1136 = vmatprep.subr.bf16.mxu0 %v5449_v18 }
 0x2ce   :  { %5502 = vmatmul.mubr.msk.bf16.vlgmr.msra.gmra.mrb[12].mxu1 %vm845_vm2, %v7023_v22  ;;  %5503 = vmatmul.mubr.msk.bf16.vlgmr.msra.gmra.mrb[16].mxu0 %vm845_vm2, %v7023_v22 }
 0x2cf   :  { %1096 = vmatpush1.bf16.msra.mxu1 %v5446_v24  ;;  %1137 = vmatpush1.bf16.msra.mxu0 %v5448_v25 }
 0x2d0   :  { %1097 = vmatprep.subr.bf16.mxu1 %v5463_v26  ;;  %1138 = vmatprep.subr.bf16.mxu0 %v5465_v27 }
 0x2d1   :  { %1127 = vmatprep.mubr.bf16.mxu1 %v6836_v10  ;;  %1168 = vmatprep.mubr.bf16.mxu0 %v6836_v10  ;;  %v1270_v10 = vld [vmem:[%s7794_s9 + $0x8] sm:$0xff] }
 0x2d2   :  { %v7049_v47 = vpack.c.bf16 %v1270_v10, %v1269_v46  ;;  %v442_v10 = vld [vmem:[%s7793_s8 + $0x8] sm:$0xff]  ;;  %s6839_s8 = smov 32  }
 0x2d3   :  { %1098 = vmatpush1.bf16.msra.mxu1 %v5462_v32  ;;  %1139 = vmatpush1.bf16.msra.mxu0 %v5464_v33 }
 0x2d4   :  { %1099 = vmatprep.subr.bf16.mxu1 %v5479_v34  ;;  %1140 = vmatprep.subr.bf16.mxu0 %v5481_v35 }
 0x2d7   :  { %1100 = vmatpush1.bf16.msra.mxu1 %v5478_v40  ;;  %1141 = vmatpush1.bf16.msra.mxu0 %v5480_v41 }
 0x2d8   :  { %1101 = vmatprep.subr.bf16.mxu1 %v5495_v42  ;;  %1142 = vmatprep.subr.bf16.mxu0 %v5497_v43 }
 0x2db   :  { %1102 = vmatpush1.bf16.msra.mxu1 %v5494_v44  ;;  %1143 = vmatpush1.bf16.msra.mxu0 %v5496_v45 }
 0x2dc   :  { %6265 = vmatprep.subr.bf16.mxu1 %v6837_v48  ;;  %6271 = vmatprep.subr.bf16.mxu0 %v6837_v48 }
 0x2de   :  { %5504 = vmatmul.mubr.msk.bf16.vlgmr.msra.gmra.mrb[16].mxu1 %vm845_vm2, %v7023_v22  ;;  %5505 = vmatmul.mubr.msk.bf16.vlgmr.msra.gmra.mrb[20].mxu0 %vm845_vm2, %v7023_v22  ;;  %v445_v22 = vlaneseq }
 0x2df   :  { %6267 = vmatpush3.bf16.msra.mxu1 %v7049_v47  ;;  %5907 = vmatprep.mubr.msk.f32.mxu1 %vm6835_vm0, %v6834_v0 }
 0x2e0   :  { %6268 = vmatprep.subr.bf16.mxu1 %v6837_v48  ;;  %6273 = vmatpush3.bf16.msra.mxu0 %v7049_v47  ;;  %v7084_v52 = vshrl.u32 %v445_v22, 7 }
 0x2e1   :  { %6274 = vmatprep.subr.bf16.mxu0 %v6837_v48  ;;  %5918 = vmatprep.mubr.msk.f32.mxu0 %vm6835_vm0, %v6834_v0 }
 0x2e2   :  { %v447_v53 = vsub.s32 0, %v7084_v52  ;;  %v455_v54 = vsub.s32 2, %v7084_v52  ;;  %v451_v56 = vsub.s32 1, %v7084_v52  ;;  %v459_v59 = vsub.s32 3, %v7084_v52 }
 0x2e3   :  { %6270 = vmatpush3.bf16.msra.mxu1 %v7064_v51  ;;  %v7094_v9 = vsub.s32 %v1197_v63, %v7084_v52  ;;  %v463_v21 = vsub.s32 4, %v7084_v52  ;;  %v471_v23 = vsub.s32 6, %v7084_v52  ;;  %v467_v24 = vsub.s32 5, %v7084_v52 }
 0x2e4   :  { %6276 = vmatpush3.bf16.msra.mxu0 %v7064_v51  ;;  %6277 = vmatprep.subr.bf16.mxu1 %v6837_v48  ;;  %v448_v60 = vrot.slane %v441_v55, %v447_v53  ;;  %v456_v61 = vrot.slane %v441_v55, %v455_v54  ;;  %v452_v62 = vrot.slane %v441_v55, %v451_v56  ;;  %v475_v25 = vsub.s32 7, %v7084_v52 }
 0x2e5   :  { %6283 = vmatprep.subr.bf16.mxu0 %v6837_v48  ;;  %v460_v1 = vrot.slane %v441_v55, %v459_v59  ;;  %v464_v26 = vrot.slane %v441_v55, %v463_v21  ;;  %v472_v27 = vrot.slane %v441_v55, %v471_v23  ;;  %v468_v28 = vrot.slane %v441_v55, %v467_v24 }
 0x2e6   :  { %5908 = vmatmul.mubr.f32.vlgmr.msra.gmra.mrb[20].mxu1 %v6834_v0  ;;  %v476_v29 = vrot.slane %v441_v55, %v475_v25  ;;  %v480_v49 = vrot.slane %v442_v10, %v447_v53  ;;  %v488_v50 = vrot.slane %v442_v10, %v455_v54  ;;  %v484_v22 = vrot.slane %v442_v10, %v451_v56 }
 0x2e7   :  { %6279 = vmatpush3.bf16.msra.mxu1 %v7049_v47  ;;  %5929 = vmatprep.mubr.msk.f32.mxu1 %vm6835_vm0, %v6834_v0  ;;  %v492_v52 = vrot.slane %v442_v10, %v459_v59  ;;  %v496_v56 = vrot.slane %v442_v10, %v463_v21  ;;  %v504_v59 = vrot.slane %v442_v10, %v471_v23 }
 0x2e8   :  { %6280 = vmatprep.subr.bf16.mxu1 %v6837_v48 }
 0x2eb   :  { %6282 = vmatpush3.bf16.msra.mxu1 %v7064_v51 }
 0x2ec   :  { %6289 = vmatprep.subr.bf16.mxu1 %v6837_v48 }
 0x381   :  { %v883_v2 = vpop.f32.mrb[4].mxu1  ;;  %v924_v3 = vpop.f32.mrb[8].mxu0 }
 0x382   :  { %v884_v4 = vadd.f32 %v883_v2, %v448_v60  ;;  %v925_v5 = vadd.f32 %v924_v3, %v456_v61  ;;  %v885_v6 = vpop.f32.mrb[5].mxu1  ;;  %v926_v7 = vpop.f32.mrb[9].mxu0 }
 0x383   :  { %v886_v8 = vadd.f32 %v885_v6, %v452_v62  ;;  %v927_v11 = vadd.f32 %v926_v7, %v460_v1  ;;  %v887_v12 = vpop.f32.mrb[6].mxu1  ;;  %v928_v13 = vpop.f32.mrb[10].mxu0 }
 0x384   :  { %v888_v14 = vpop.f32.mrb[7].mxu1  ;;  %v929_v15 = vpop.f32.mrb[11].mxu0  ;;  %v508_v12 = vrot.slane %v442_v10, %v475_v25 }
 0x385   :  { %v1193_v16 = vcombine.low %v884_v4, %v886_v8  ;;  %v1194_v17 = vcombine.low %v925_v5, %v927_v11  ;;  %v500_v11 = vrot.slane %v442_v10, %v467_v24 }
 0x387   :  { %v1201_v18 = vrot.slane %v1193_v16, %v7094_v9  ;;  %v1208_v19 = vrot.slane %v1194_v17, %v7094_v9 }
 0x389   :  { %v1209_v20 = vcombine.low %v1201_v18, %v1208_v19 }
 0x38b   :  { %1265 = vst [vmem:[#allocation2] sm:$0xff] %v1209_v20 }
 0x391   :  { %v965_v30 = vpop.f32.mrb[8].mxu1  ;;  %v1006_v31 = vpop.f32.mrb[12].mxu0 }
 0x392   :  { %v966_v32 = vadd.f32 %v965_v30, %v464_v26  ;;  %v1007_v33 = vadd.f32 %v1006_v31, %v472_v27  ;;  %v967_v34 = vpop.f32.mrb[9].mxu1  ;;  %v1008_v35 = vpop.f32.mrb[13].mxu0  ;;  %v1273_v24 = vld [vmem:[#allocation2] sm:$0x3] }
 0x393   :  { %v968_v36 = vadd.f32 %v967_v34, %v468_v28  ;;  %v1009_v37 = vadd.f32 %v1008_v35, %v476_v29  ;;  %v969_v38 = vpop.f32.mrb[10].mxu1  ;;  %v1010_v39 = vpop.f32.mrb[14].mxu0 }
 0x394   :  { %v970_v40 = vpop.f32.mrb[11].mxu1  ;;  %v1011_v41 = vpop.f32.mrb[15].mxu0 }
 0x395   :  { %v1210_v42 = vcombine.low %v966_v32, %v968_v36  ;;  %v1211_v43 = vcombine.low %v1007_v33, %v1009_v37 }
 0x397   :  { %v1218_v44 = vrot.slane %v1210_v42, %v7094_v9  ;;  %v1225_v45 = vrot.slane %v1211_v43, %v7094_v9 }
 0x399   :  { %v1226_v46 = vcombine.low %v1218_v44, %v1225_v45 }
 0x39b   :  { %1266 = vst [vmem:[#allocation2 + $0x8] sm:$0xff] %v1226_v46 }
 0x3a1   :  { %v1047_v55 = vpop.f32.mrb[12].mxu1  ;;  %v1088_v57 = vpop.f32.mrb[16].mxu0 }
 0x3a2   :  { %v1048_v58 = vadd.f32 %v1047_v55, %v480_v49  ;;  %v1089_v60 = vadd.f32 %v1088_v57, %v488_v50  ;;  %v1049_v61 = vpop.f32.mrb[13].mxu1  ;;  %v1090_v62 = vpop.f32.mrb[17].mxu0 }
 0x3a3   :  { %v1050_v63 = vadd.f32 %v1049_v61, %v484_v22  ;;  %v1091_v1 = vadd.f32 %v1090_v62, %v492_v52  ;;  %v1051_v2 = vpop.f32.mrb[14].mxu1  ;;  %v1092_v3 = vpop.f32.mrb[18].mxu0  ;;  %v1386_v22 = vld [vmem:[#allocation2 + $0x2] sm:$0x3] }
 0x3a4   :  { %v1052_v4 = vpop.f32.mrb[15].mxu1  ;;  %v1093_v5 = vpop.f32.mrb[19].mxu0 }
 0x3a5   :  { %v1227_v6 = vcombine.low %v1048_v58, %v1050_v63  ;;  %v1228_v7 = vcombine.low %v1089_v60, %v1091_v1 }
 0x3a7   :  { %v1235_v8 = vrot.slane %v1227_v6, %v7094_v9  ;;  %v1242_v53 = vrot.slane %v1228_v7, %v7094_v9 }
 0x3a9   :  { %v1243_v54 = vcombine.low %v1235_v8, %v1242_v53 }
 0x3ab   :  { %1267 = vst [vmem:[#allocation2 + $0x10] sm:$0xff] %v1243_v54 }
 0x3b1   :  { %v1129_v13 = vpop.f32.mrb[16].mxu1  ;;  %v1170_v14 = vpop.f32.mrb[20].mxu0 }
 0x3b2   :  { %v1130_v15 = vadd.f32 %v1129_v13, %v496_v56  ;;  %v1171_v16 = vadd.f32 %v1170_v14, %v504_v59  ;;  %v1131_v17 = vpop.f32.mrb[17].mxu1  ;;  %v1172_v18 = vpop.f32.mrb[21].mxu0  ;;  %v1496_v56 = vld [vmem:[#allocation2 + $0x4] sm:$0x3] }
 0x3b3   :  { %v1132_v19 = vadd.f32 %v1131_v17, %v500_v11  ;;  %v1173_v20 = vadd.f32 %v1172_v18, %v508_v12  ;;  %v1133_v26 = vpop.f32.mrb[18].mxu1  ;;  %v1174_v27 = vpop.f32.mrb[22].mxu0 }
 0x3b4   :  { %v1134_v28 = vpop.f32.mrb[19].mxu1  ;;  %v1175_v29 = vpop.f32.mrb[23].mxu0 }
 0x3b5   :  { %v1244_v30 = vcombine.low %v1130_v15, %v1132_v19  ;;  %v1245_v31 = vcombine.low %v1171_v16, %v1173_v20 }
 0x3b7   :  { %v1252_v32 = vrot.slane %v1244_v30, %v7094_v9  ;;  %v1259_v21 = vrot.slane %v1245_v31, %v7094_v9 }
 0x3b9   :  { %v1260_v23 = vcombine.low %v1252_v32, %v1259_v21  ;;  %v1344_v25 = vpop.f32.mrb[20].mxu1  ;;  %v1606_v21 = vld [vmem:[#allocation2 + $0x6] sm:$0x3] }
 0x3ba   :  { %v1348_v33 = vadd.f32 %v1344_v25, %v1273_v24  ;;  %v5909_v34 = vpop.f32.mrb[21].mxu1 }
 0x3bb   :  { %1268 = vst [vmem:[#allocation2 + $0x18] sm:$0xff] %v1260_v23 }
 0x3bc   :  { %6527 = vtanh.f32 %v1348_v33  ;;  %v5506_v36 = vmul.f32 -1.442695, %v1348_v33 }
 0x3be   :  { %6529 = vpow2.f32 %v5506_v36 }
 0x3c6   :  { %v6528_v35 = vpop.eup %6527 }
 0x3c7   :  { %1358 = vrot.lane.b32.xlu0 %v6528_v35, %s6833_s29 }
 0x3c8   :  { %v6530_v37 = vpop.eup %6529 }
 0x3c9   :  { %v1352_v38 = vadd.f32 1.0, %v6530_v37 }
 0x3cb   :  { %6531 = vrcp.f32 %v1352_v38 }
 0x3d5   :  { %v6532_v39 = vpop.eup %6531 }
 0x3d6   :  { %v1356_v42 = vmul.f32 0.0, %v6532_v39 }
 0x439   :  { %v1359_v40 = vpop.permute.xlu0 %1358 }
 0x43a   :  { %v1361_v41 = vmul.f32 %v6532_v39, %v1359_v40 }
 0x43c   :  { %1363 = vrot.lane.b32.xlu0 %v1361_v41, %s6839_s8 }
 0x4ae   :  { %v1364_v43 = vpop.permute.xlu0 %1363 }
 0x4af   :  { %v1366_v44 = vadd.f32 %v1364_v43, %v1356_v42 }
 0x4b1   :  { %6533 = vtanh.f32 %v1366_v44 }
 0x4bb   :  { %v6534_v45 = vpop.eup %6533 }
 0x4bc   :  { %1369 = vrot.lane.b32.xlu1 %v6534_v45, %s6833_s29 }
 0x52e   :  { %v1370_v46 = vpop.permute.xlu1 %1369 }
 0x52f   :  { %v1372_v10 = vmul.f32 %v6532_v39, %v1370_v46 }
 0x531   :  { %v1380_v49 = vrot.slane %v1372_v10, %v7094_v9 }
 0x533   :  { %1381 = vrot.lane.b32.xlu1 %v1380_v49, %s6839_s8  ;;  %v1716_v49 = vld [vmem:[#allocation2 + $0x8] sm:$0x3] }
 0x5a5   :  { %v1382_v50 = vpop.permute.xlu1 %1381 }
 0x5a6   :  { %1385 = vst.msk [vmem:[#allocation3] sm:$0x3] %vm1384_vm3, %v1382_v50  ;;  %5919 = vmatmul.mubr.msk.f32.vlgmr.msra.gmra.mrb[2].mxu0 %vm1274_vm4, %v1382_v50 }
 0x5a7   :  { %6285 = vmatpush3.bf16.msra.mxu0 %v7049_v47  ;;  %5940 = vmatprep.mubr.msk.f32.mxu0 %vm6835_vm0, %v6834_v0 }
 0x5a8   :  { %6286 = vmatprep.subr.bf16.mxu0 %v6837_v48 }
 0x5ab   :  { %6288 = vmatpush3.bf16.msra.mxu0 %v7064_v51 }
 0x5ac   :  { %6295 = vmatprep.subr.bf16.mxu0 %v6837_v48 }
 0x679   :  { %v1455_v52 = vpop.f32.mrb[2].mxu0 }
 0x67a   :  { %v1459_v55 = vadd.f32 %v1455_v52, %v1386_v22  ;;  %v5920_v57 = vpop.f32.mrb[3].mxu0 }
 0x67c   :  { %6535 = vtanh.f32 %v1459_v55  ;;  %v5508_v60 = vmul.f32 -1.442695, %v1459_v55 }
 0x67e   :  { %6537 = vpow2.f32 %v5508_v60 }
 0x686   :  { %v6536_v58 = vpop.eup %6535 }
 0x687   :  { %1469 = vrot.lane.b32.xlu0 %v6536_v58, %s6833_s29 }
 0x688   :  { %v6538_v61 = vpop.eup %6537 }
 0x689   :  { %v1463_v62 = vadd.f32 1.0, %v6538_v61 }
 0x68b   :  { %6539 = vrcp.f32 %v1463_v62 }
 0x695   :  { %v6540_v63 = vpop.eup %6539 }
 0x696   :  { %v1467_v3 = vmul.f32 %v6540_v63, %v1366_v44 }
 0x6f9   :  { %v1470_v1 = vpop.permute.xlu0 %1469 }
 0x6fa   :  { %v1472_v2 = vmul.f32 %v6540_v63, %v1470_v1 }
 0x6fc   :  { %1474 = vrot.lane.b32.xlu1 %v1472_v2, %s6839_s8 }
 0x76e   :  { %v1475_v4 = vpop.permute.xlu1 %1474 }
 0x76f   :  { %v1477_v5 = vadd.f32 %v1475_v4, %v1467_v3 }
 0x771   :  { %6541 = vtanh.f32 %v1477_v5 }
 0x77b   :  { %v6542_v6 = vpop.eup %6541 }
 0x77c   :  { %1480 = vrot.lane.b32.xlu0 %v6542_v6, %s6833_s29 }
 0x7ee   :  { %v1481_v7 = vpop.permute.xlu0 %1480 }
 0x7ef   :  { %v1483_v8 = vmul.f32 %v6540_v63, %v1481_v7 }
 0x7f1   :  { %v1491_v53 = vrot.slane %v1483_v8, %v7094_v9 }
 0x7f3   :  { %1492 = vrot.lane.b32.xlu1 %v1491_v53, %s6839_s8  ;;  %v1826_v53 = vld [vmem:[#allocation2 + $0xa] sm:$0x3] }
 0x865   :  { %v1493_v54 = vpop.permute.xlu1 %1492 }
 0x866   :  { %1495 = vst.msk [vmem:[#allocation3 + $0x2] sm:$0x3] %vm1384_vm3, %v1493_v54  ;;  %5930 = vmatmul.mubr.msk.f32.vlgmr.msra.gmra.mrb[22].mxu1 %vm1274_vm4, %v1493_v54 }
 0x867   :  { %6291 = vmatpush3.bf16.msra.mxu1 %v7049_v47  ;;  %5951 = vmatprep.mubr.msk.f32.mxu1 %vm6835_vm0, %v6834_v0 }
 0x868   :  { %6292 = vmatprep.subr.bf16.mxu1 %v6837_v48 }
 0x86b   :  { %6294 = vmatpush3.bf16.msra.mxu1 %v7064_v51 }
 0x86c   :  { %6301 = vmatprep.subr.bf16.mxu1 %v6837_v48 }
 0x939   :  { %v1565_v59 = vpop.f32.mrb[22].mxu1 }
 0x93a   :  { %v1569_v11 = vadd.f32 %v1565_v59, %v1496_v56  ;;  %v5931_v12 = vpop.f32.mrb[23].mxu1 }
 0x93c   :  { %6543 = vtanh.f32 %v1569_v11  ;;  %v5510_v14 = vmul.f32 -1.442695, %v1569_v11 }
 0x93e   :  { %6545 = vpow2.f32 %v5510_v14 }
 0x946   :  { %v6544_v13 = vpop.eup %6543 }
 0x947   :  { %1579 = vrot.lane.b32.xlu0 %v6544_v13, %s6833_s29 }
 0x948   :  { %v6546_v15 = vpop.eup %6545 }
 0x949   :  { %v1573_v16 = vadd.f32 1.0, %v6546_v15 }
 0x94b   :  { %6547 = vrcp.f32 %v1573_v16 }
 0x955   :  { %v6548_v17 = vpop.eup %6547 }
 0x956   :  { %v1577_v20 = vmul.f32 %v6548_v17, %v1477_v5 }
 0x9b9   :  { %v1580_v18 = vpop.permute.xlu0 %1579 }
 0x9ba   :  { %v1582_v19 = vmul.f32 %v6548_v17, %v1580_v18 }
 0x9bc   :  { %1584 = vrot.lane.b32.xlu1 %v1582_v19, %s6839_s8 }
 0xa2e   :  { %v1585_v26 = vpop.permute.xlu1 %1584 }
 0xa2f   :  { %v1587_v27 = vadd.f32 %v1585_v26, %v1577_v20 }
 0xa31   :  { %6549 = vtanh.f32 %v1587_v27 }
 0xa3b   :  { %v6550_v28 = vpop.eup %6549 }
 0xa3c   :  { %1590 = vrot.lane.b32.xlu0 %v6550_v28, %s6833_s29 }
 0xaae   :  { %v1591_v29 = vpop.permute.xlu0 %1590 }
 0xaaf   :  { %v1593_v30 = vmul.f32 %v6548_v17, %v1591_v29 }
 0xab1   :  { %v1601_v31 = vrot.slane %v1593_v30, %v7094_v9 }
 0xab3   :  { %1602 = vrot.lane.b32.xlu1 %v1601_v31, %s6839_s8  ;;  %v1936_v31 = vld [vmem:[#allocation2 + $0xc] sm:$0x3] }
 0xb25   :  { %v1603_v32 = vpop.permute.xlu1 %1602 }
 0xb26   :  { %1605 = vst.msk [vmem:[#allocation3 + $0x4] sm:$0x3] %vm1384_vm3, %v1603_v32  ;;  %5941 = vmatmul.mubr.msk.f32.vlgmr.msra.gmra.mrb[24].mxu0 %vm1274_vm4, %v1603_v32 }
 0xb27   :  { %6297 = vmatpush3.bf16.msra.mxu0 %v7049_v47  ;;  %5962 = vmatprep.mubr.msk.f32.mxu0 %vm6835_vm0, %v6834_v0 }
 0xb28   :  { %6298 = vmatprep.subr.bf16.mxu0 %v6837_v48 }
 0xb2b   :  { %6300 = vmatpush3.bf16.msra.mxu0 %v7064_v51 }
 0xb2c   :  { %6307 = vmatprep.subr.bf16.mxu0 %v6837_v48 }
 0xbf9   :  { %v1675_v23 = vpop.f32.mrb[24].mxu0 }
 0xbfa   :  { %v1679_v24 = vadd.f32 %v1675_v23, %v1606_v21  ;;  %v5942_v25 = vpop.f32.mrb[25].mxu0 }
 0xbfc   :  { %6551 = vtanh.f32 %v1679_v24  ;;  %v5512_v34 = vmul.f32 -1.442695, %v1679_v24 }
 0xbfe   :  { %6553 = vpow2.f32 %v5512_v34 }
 0xc06   :  { %v6552_v33 = vpop.eup %6551 }
 0xc07   :  { %1689 = vrot.lane.b32.xlu0 %v6552_v33, %s6833_s29 }
 0xc08   :  { %v6554_v35 = vpop.eup %6553 }
 0xc09   :  { %v1683_v36 = vadd.f32 1.0, %v6554_v35 }
 0xc0b   :  { %6555 = vrcp.f32 %v1683_v36 }
 0xc15   :  { %v6556_v37 = vpop.eup %6555 }
 0xc16   :  { %v1687_v40 = vmul.f32 %v6556_v37, %v1587_v27 }
 0xc79   :  { %v1690_v38 = vpop.permute.xlu0 %1689 }
 0xc7a   :  { %v1692_v39 = vmul.f32 %v6556_v37, %v1690_v38 }
 0xc7c   :  { %1694 = vrot.lane.b32.xlu1 %v1692_v39, %s6839_s8 }
 0xcee   :  { %v1695_v41 = vpop.permute.xlu1 %1694 }
 0xcef   :  { %v1697_v42 = vadd.f32 %v1695_v41, %v1687_v40 }
 0xcf1   :  { %6557 = vtanh.f32 %v1697_v42 }
 0xcfb   :  { %v6558_v43 = vpop.eup %6557 }
 0xcfc   :  { %1700 = vrot.lane.b32.xlu0 %v6558_v43, %s6833_s29 }
 0xd6e   :  { %v1701_v44 = vpop.permute.xlu0 %1700 }
 0xd6f   :  { %v1703_v45 = vmul.f32 %v6556_v37, %v1701_v44 }
 0xd71   :  { %v1711_v46 = vrot.slane %v1703_v45, %v7094_v9 }
 0xd73   :  { %1712 = vrot.lane.b32.xlu1 %v1711_v46, %s6839_s8  ;;  %v2046_v46 = vld [vmem:[#allocation2 + $0xe] sm:$0x3] }
 0xde5   :  { %v1713_v10 = vpop.permute.xlu1 %1712 }
 0xde6   :  { %1715 = vst.msk [vmem:[#allocation3 + $0x6] sm:$0x3] %vm1384_vm3, %v1713_v10  ;;  %5952 = vmatmul.mubr.msk.f32.vlgmr.msra.gmra.mrb[24].mxu1 %vm1274_vm4, %v1713_v10 }
 0xde7   :  { %6303 = vmatpush3.bf16.msra.mxu1 %v7049_v47  ;;  %5973 = vmatprep.mubr.msk.f32.mxu1 %vm6835_vm0, %v6834_v0 }
 0xde8   :  { %6304 = vmatprep.subr.bf16.mxu1 %v6837_v48 }
 0xdeb   :  { %6306 = vmatpush3.bf16.msra.mxu1 %v7064_v51 }
 0xdec   :  { %6313 = vmatprep.subr.bf16.mxu1 %v6837_v48 }
 0xeb9   :  { %v1785_v50 = vpop.f32.mrb[24].mxu1 }
 0xeba   :  { %v1789_v22 = vadd.f32 %v1785_v50, %v1716_v49  ;;  %v5953_v52 = vpop.f32.mrb[25].mxu1 }
 0xebc   :  { %6559 = vtanh.f32 %v1789_v22  ;;  %v5514_v57 = vmul.f32 -1.442695, %v1789_v22 }
 0xebe   :  { %6561 = vpow2.f32 %v5514_v57 }
 0xec6   :  { %v6560_v55 = vpop.eup %6559 }
 0xec7   :  { %1799 = vrot.lane.b32.xlu0 %v6560_v55, %s6833_s29 }
 0xec8   :  { %v6562_v58 = vpop.eup %6561 }
 0xec9   :  { %v1793_v60 = vadd.f32 1.0, %v6562_v58 }
 0xecb   :  { %6563 = vrcp.f32 %v1793_v60 }
 0xed5   :  { %v6564_v61 = vpop.eup %6563 }
 0xed6   :  { %v1797_v1 = vmul.f32 %v6564_v61, %v1697_v42 }
 0xf39   :  { %v1800_v62 = vpop.permute.xlu0 %1799 }
 0xf3a   :  { %v1802_v63 = vmul.f32 %v6564_v61, %v1800_v62 }
 0xf3c   :  { %1804 = vrot.lane.b32.xlu1 %v1802_v63, %s6839_s8 }
 0xfae   :  { %v1805_v2 = vpop.permute.xlu1 %1804 }
 0xfaf   :  { %v1807_v3 = vadd.f32 %v1805_v2, %v1797_v1 }
 0xfb1   :  { %6565 = vtanh.f32 %v1807_v3 }
 0xfbb   :  { %v6566_v4 = vpop.eup %6565 }
 0xfbc   :  { %1810 = vrot.lane.b32.xlu0 %v6566_v4, %s6833_s29 }
0x102e   :  { %v1811_v5 = vpop.permute.xlu0 %1810 }
0x102f   :  { %v1813_v6 = vmul.f32 %v6564_v61, %v1811_v5 }
0x1031   :  { %v1821_v7 = vrot.slane %v1813_v6, %v7094_v9 }
0x1033   :  { %1822 = vrot.lane.b32.xlu1 %v1821_v7, %s6839_s8  ;;  %v2156_v7 = vld [vmem:[#allocation2 + $0x10] sm:$0x3] }
0x10a5   :  { %v1823_v8 = vpop.permute.xlu1 %1822 }
0x10a6   :  { %1825 = vst.msk [vmem:[#allocation3 + $0x8] sm:$0x3] %vm1384_vm3, %v1823_v8  ;;  %5963 = vmatmul.mubr.msk.f32.vlgmr.msra.gmra.mrb[26].mxu0 %vm1274_vm4, %v1823_v8 }
0x10a7   :  { %6309 = vmatpush3.bf16.msra.mxu0 %v7049_v47  ;;  %5984 = vmatprep.mubr.msk.f32.mxu0 %vm6835_vm0, %v6834_v0 }
0x10a8   :  { %6310 = vmatprep.subr.bf16.mxu0 %v6837_v48 }
0x10ab   :  { %6312 = vmatpush3.bf16.msra.mxu0 %v7064_v51 }
0x10ac   :  { %6319 = vmatprep.subr.bf16.mxu0 %v6837_v48 }
0x1179   :  { %v1895_v54 = vpop.f32.mrb[26].mxu0 }
0x117a   :  { %v1899_v56 = vadd.f32 %v1895_v54, %v1826_v53  ;;  %v5964_v59 = vpop.f32.mrb[27].mxu0 }
0x117c   :  { %6567 = vtanh.f32 %v1899_v56  ;;  %v5516_v12 = vmul.f32 -1.442695, %v1899_v56 }
0x117e   :  { %6569 = vpow2.f32 %v5516_v12 }
0x1186   :  { %v6568_v11 = vpop.eup %6567 }
0x1187   :  { %1909 = vrot.lane.b32.xlu0 %v6568_v11, %s6833_s29 }
0x1188   :  { %v6570_v13 = vpop.eup %6569 }
0x1189   :  { %v1903_v14 = vadd.f32 1.0, %v6570_v13 }
0x118b   :  { %6571 = vrcp.f32 %v1903_v14 }
0x1195   :  { %v6572_v15 = vpop.eup %6571 }
0x1196   :  { %v1907_v18 = vmul.f32 %v6572_v15, %v1807_v3 }
0x11f9   :  { %v1910_v16 = vpop.permute.xlu0 %1909 }
0x11fa   :  { %v1912_v17 = vmul.f32 %v6572_v15, %v1910_v16 }
0x11fc   :  { %1914 = vrot.lane.b32.xlu1 %v1912_v17, %s6839_s8 }
0x126e   :  { %v1915_v19 = vpop.permute.xlu1 %1914 }
0x126f   :  { %v1917_v20 = vadd.f32 %v1915_v19, %v1907_v18 }
0x1271   :  { %6573 = vtanh.f32 %v1917_v20 }
0x127b   :  { %v6574_v26 = vpop.eup %6573 }
0x127c   :  { %1920 = vrot.lane.b32.xlu0 %v6574_v26, %s6833_s29 }
0x12ee   :  { %v1921_v27 = vpop.permute.xlu0 %1920 }
0x12ef   :  { %v1923_v28 = vmul.f32 %v6572_v15, %v1921_v27 }
0x12f1   :  { %v1931_v29 = vrot.slane %v1923_v28, %v7094_v9 }
0x12f3   :  { %1932 = vrot.lane.b32.xlu1 %v1931_v29, %s6839_s8  ;;  %v2266_v29 = vld [vmem:[#allocation2 + $0x12] sm:$0x3] }
0x1365   :  { %v1933_v30 = vpop.permute.xlu1 %1932 }
0x1366   :  { %1935 = vst.msk [vmem:[#allocation3 + $0xa] sm:$0x3] %vm1384_vm3, %v1933_v30  ;;  %5974 = vmatmul.mubr.msk.f32.vlgmr.msra.gmra.mrb[26].mxu1 %vm1274_vm4, %v1933_v30 }
0x1367   :  { %6315 = vmatpush3.bf16.msra.mxu1 %v7049_v47  ;;  %5995 = vmatprep.mubr.msk.f32.mxu1 %vm6835_vm0, %v6834_v0 }
0x1368   :  { %6316 = vmatprep.subr.bf16.mxu1 %v6837_v48 }
0x136b   :  { %6318 = vmatpush3.bf16.msra.mxu1 %v7064_v51 }
0x136c   :  { %6325 = vmatprep.subr.bf16.mxu1 %v6837_v48 }
0x1439   :  { %v2005_v32 = vpop.f32.mrb[26].mxu1 }
0x143a   :  { %v2009_v21 = vadd.f32 %v2005_v32, %v1936_v31  ;;  %v5975_v23 = vpop.f32.mrb[27].mxu1 }
0x143c   :  { %6575 = vtanh.f32 %v2009_v21  ;;  %v5518_v25 = vmul.f32 -1.442695, %v2009_v21 }
0x143e   :  { %6577 = vpow2.f32 %v5518_v25 }
0x1446   :  { %v6576_v24 = vpop.eup %6575 }
0x1447   :  { %2019 = vrot.lane.b32.xlu0 %v6576_v24, %s6833_s29 }
0x1448   :  { %v6578_v33 = vpop.eup %6577 }
0x1449   :  { %v2013_v34 = vadd.f32 1.0, %v6578_v33 }
0x144b   :  { %6579 = vrcp.f32 %v2013_v34 }
0x1455   :  { %v6580_v35 = vpop.eup %6579 }
0x1456   :  { %v2017_v38 = vmul.f32 %v6580_v35, %v1917_v20 }
0x14b9   :  { %v2020_v36 = vpop.permute.xlu0 %2019 }
0x14ba   :  { %v2022_v37 = vmul.f32 %v6580_v35, %v2020_v36 }
0x14bc   :  { %2024 = vrot.lane.b32.xlu1 %v2022_v37, %s6839_s8 }
0x152e   :  { %v2025_v39 = vpop.permute.xlu1 %2024 }
0x152f   :  { %v2027_v40 = vadd.f32 %v2025_v39, %v2017_v38 }
0x1531   :  { %6581 = vtanh.f32 %v2027_v40 }
0x153b   :  { %v6582_v41 = vpop.eup %6581 }
0x153c   :  { %2030 = vrot.lane.b32.xlu0 %v6582_v41, %s6833_s29 }
0x15ae   :  { %v2031_v42 = vpop.permute.xlu0 %2030 }
0x15af   :  { %v2033_v43 = vmul.f32 %v6580_v35, %v2031_v42 }
0x15b1   :  { %v2041_v44 = vrot.slane %v2033_v43, %v7094_v9 }
0x15b3   :  { %2042 = vrot.lane.b32.xlu1 %v2041_v44, %s6839_s8  ;;  %v2376_v44 = vld [vmem:[#allocation2 + $0x14] sm:$0x3] }
0x1625   :  { %v2043_v45 = vpop.permute.xlu1 %2042 }
0x1626   :  { %2045 = vst.msk [vmem:[#allocation3 + $0xc] sm:$0x3] %vm1384_vm3, %v2043_v45  ;;  %5985 = vmatmul.mubr.msk.f32.vlgmr.msra.gmra.mrb[28].mxu0 %vm1274_vm4, %v2043_v45 }
0x1627   :  { %6321 = vmatpush3.bf16.msra.mxu0 %v7049_v47  ;;  %6006 = vmatprep.mubr.msk.f32.mxu0 %vm6835_vm0, %v6834_v0 }
0x1628   :  { %6322 = vmatprep.subr.bf16.mxu0 %v6837_v48 }
0x162b   :  { %6324 = vmatpush3.bf16.msra.mxu0 %v7064_v51 }
0x162c   :  { %6331 = vmatprep.subr.bf16.mxu0 %v6837_v48 }
0x16f9   :  { %v2115_v10 = vpop.f32.mrb[28].mxu0 }
0x16fa   :  { %v2119_v49 = vadd.f32 %v2115_v10, %v2046_v46  ;;  %v5986_v50 = vpop.f32.mrb[29].mxu0 }
0x16fc   :  { %6583 = vtanh.f32 %v2119_v49  ;;  %v5520_v52 = vmul.f32 -1.442695, %v2119_v49 }
0x16fe   :  { %6585 = vpow2.f32 %v5520_v52 }
0x1706   :  { %v6584_v22 = vpop.eup %6583 }
0x1707   :  { %2129 = vrot.lane.b32.xlu0 %v6584_v22, %s6833_s29 }
0x1708   :  { %v6586_v55 = vpop.eup %6585 }
0x1709   :  { %v2123_v57 = vadd.f32 1.0, %v6586_v55 }
0x170b   :  { %6587 = vrcp.f32 %v2123_v57 }
0x1715   :  { %v6588_v58 = vpop.eup %6587 }
0x1716   :  { %v2127_v62 = vmul.f32 %v6588_v58, %v2027_v40 }
0x1779   :  { %v2130_v60 = vpop.permute.xlu0 %2129 }
0x177a   :  { %v2132_v61 = vmul.f32 %v6588_v58, %v2130_v60 }
0x177c   :  { %2134 = vrot.lane.b32.xlu1 %v2132_v61, %s6839_s8 }
0x17ee   :  { %v2135_v63 = vpop.permute.xlu1 %2134 }
0x17ef   :  { %v2137_v1 = vadd.f32 %v2135_v63, %v2127_v62 }
0x17f1   :  { %6589 = vtanh.f32 %v2137_v1 }
0x17fb   :  { %v6590_v2 = vpop.eup %6589 }
0x17fc   :  { %2140 = vrot.lane.b32.xlu0 %v6590_v2, %s6833_s29 }
0x186e   :  { %v2141_v3 = vpop.permute.xlu0 %2140 }
0x186f   :  { %v2143_v4 = vmul.f32 %v6588_v58, %v2141_v3 }
0x1871   :  { %v2151_v5 = vrot.slane %v2143_v4, %v7094_v9 }
0x1873   :  { %2152 = vrot.lane.b32.xlu1 %v2151_v5, %s6839_s8  ;;  %v2486_v5 = vld [vmem:[#allocation2 + $0x16] sm:$0x3] }
0x18e5   :  { %v2153_v6 = vpop.permute.xlu1 %2152 }
0x18e6   :  { %2155 = vst.msk [vmem:[#allocation3 + $0xe] sm:$0x3] %vm1384_vm3, %v2153_v6  ;;  %5996 = vmatmul.mubr.msk.f32.vlgmr.msra.gmra.mrb[28].mxu1 %vm1274_vm4, %v2153_v6 }
0x18e7   :  { %6327 = vmatpush3.bf16.msra.mxu1 %v7049_v47  ;;  %6017 = vmatprep.mubr.msk.f32.mxu1 %vm6835_vm0, %v6834_v0 }
0x18e8   :  { %6328 = vmatprep.subr.bf16.mxu1 %v6837_v48 }
0x18eb   :  { %6330 = vmatpush3.bf16.msra.mxu1 %v7064_v51 }
0x18ec   :  { %6337 = vmatprep.subr.bf16.mxu1 %v6837_v48 }
0x19b9   :  { %v2225_v8 = vpop.f32.mrb[28].mxu1 }
0x19ba   :  { %v2229_v53 = vadd.f32 %v2225_v8, %v2156_v7  ;;  %v5997_v54 = vpop.f32.mrb[29].mxu1 }
0x19bc   :  { %6591 = vtanh.f32 %v2229_v53  ;;  %v5522_v59 = vmul.f32 -1.442695, %v2229_v53 }
0x19be   :  { %6593 = vpow2.f32 %v5522_v59 }
0x19c6   :  { %v6592_v56 = vpop.eup %6591 }
0x19c7   :  { %2239 = vrot.lane.b32.xlu0 %v6592_v56, %s6833_s29 }
0x19c8   :  { %v6594_v11 = vpop.eup %6593 }
0x19c9   :  { %v2233_v12 = vadd.f32 1.0, %v6594_v11 }
0x19cb   :  { %6595 = vrcp.f32 %v2233_v12 }
0x19d5   :  { %v6596_v13 = vpop.eup %6595 }
0x19d6   :  { %v2237_v16 = vmul.f32 %v6596_v13, %v2137_v1 }
0x1a39   :  { %v2240_v14 = vpop.permute.xlu0 %2239 }
0x1a3a   :  { %v2242_v15 = vmul.f32 %v6596_v13, %v2240_v14 }
0x1a3c   :  { %2244 = vrot.lane.b32.xlu1 %v2242_v15, %s6839_s8 }
0x1aae   :  { %v2245_v17 = vpop.permute.xlu1 %2244 }
0x1aaf   :  { %v2247_v18 = vadd.f32 %v2245_v17, %v2237_v16 }
0x1ab1   :  { %6597 = vtanh.f32 %v2247_v18 }
0x1abb   :  { %v6598_v19 = vpop.eup %6597 }
0x1abc   :  { %2250 = vrot.lane.b32.xlu0 %v6598_v19, %s6833_s29 }
0x1b2e   :  { %v2251_v20 = vpop.permute.xlu0 %2250 }
0x1b2f   :  { %v2253_v26 = vmul.f32 %v6596_v13, %v2251_v20 }
0x1b31   :  { %v2261_v27 = vrot.slane %v2253_v26, %v7094_v9 }
0x1b33   :  { %2262 = vrot.lane.b32.xlu1 %v2261_v27, %s6839_s8  ;;  %v2596_v27 = vld [vmem:[#allocation2 + $0x18] sm:$0x3] }
0x1ba5   :  { %v2263_v28 = vpop.permute.xlu1 %2262 }
0x1ba6   :  { %2265 = vst.msk [vmem:[#allocation3 + $0x10] sm:$0x3] %vm1384_vm3, %v2263_v28  ;;  %6007 = vmatmul.mubr.msk.f32.vlgmr.msra.gmra.mrb[30].mxu0 %vm1274_vm4, %v2263_v28 }
0x1ba7   :  { %6333 = vmatpush3.bf16.msra.mxu0 %v7049_v47  ;;  %6028 = vmatprep.mubr.msk.f32.mxu0 %vm6835_vm0, %v6834_v0 }
0x1ba8   :  { %6334 = vmatprep.subr.bf16.mxu0 %v6837_v48 }
0x1bab   :  { %6336 = vmatpush3.bf16.msra.mxu0 %v7064_v51 }
0x1bac   :  { %6343 = vmatprep.subr.bf16.mxu0 %v6837_v48 }
0x1c79   :  { %v2335_v30 = vpop.f32.mrb[30].mxu0 }
0x1c7a   :  { %v2339_v31 = vadd.f32 %v2335_v30, %v2266_v29  ;;  %v6008_v32 = vpop.f32.mrb[31].mxu0 }
0x1c7c   :  { %6599 = vtanh.f32 %v2339_v31  ;;  %v5524_v23 = vmul.f32 -1.442695, %v2339_v31 }
0x1c7e   :  { %6601 = vpow2.f32 %v5524_v23 }
0x1c86   :  { %v6600_v21 = vpop.eup %6599 }
0x1c87   :  { %2349 = vrot.lane.b32.xlu0 %v6600_v21, %s6833_s29 }
0x1c88   :  { %v6602_v24 = vpop.eup %6601 }
0x1c89   :  { %v2343_v25 = vadd.f32 1.0, %v6602_v24 }
0x1c8b   :  { %6603 = vrcp.f32 %v2343_v25 }
0x1c95   :  { %v6604_v33 = vpop.eup %6603 }
0x1c96   :  { %v2347_v36 = vmul.f32 %v6604_v33, %v2247_v18 }
0x1cf9   :  { %v2350_v34 = vpop.permute.xlu0 %2349 }
0x1cfa   :  { %v2352_v35 = vmul.f32 %v6604_v33, %v2350_v34 }
0x1cfc   :  { %2354 = vrot.lane.b32.xlu1 %v2352_v35, %s6839_s8 }
0x1d6e   :  { %v2355_v37 = vpop.permute.xlu1 %2354 }
0x1d6f   :  { %v2357_v38 = vadd.f32 %v2355_v37, %v2347_v36 }
0x1d71   :  { %6605 = vtanh.f32 %v2357_v38 }
0x1d7b   :  { %v6606_v39 = vpop.eup %6605 }
0x1d7c   :  { %2360 = vrot.lane.b32.xlu0 %v6606_v39, %s6833_s29 }
0x1dee   :  { %v2361_v40 = vpop.permute.xlu0 %2360 }
0x1def   :  { %v2363_v41 = vmul.f32 %v6604_v33, %v2361_v40 }
0x1df1   :  { %v2371_v42 = vrot.slane %v2363_v41, %v7094_v9 }
0x1df3   :  { %2372 = vrot.lane.b32.xlu1 %v2371_v42, %s6839_s8  ;;  %v2706_v42 = vld [vmem:[#allocation2 + $0x1a] sm:$0x3] }
0x1e65   :  { %v2373_v43 = vpop.permute.xlu1 %2372 }
0x1e66   :  { %2375 = vst.msk [vmem:[#allocation3 + $0x12] sm:$0x3] %vm1384_vm3, %v2373_v43  ;;  %6018 = vmatmul.mubr.msk.f32.vlgmr.msra.gmra.mrb[30].mxu1 %vm1274_vm4, %v2373_v43 }
0x1e67   :  { %6339 = vmatpush3.bf16.msra.mxu1 %v7049_v47  ;;  %6039 = vmatprep.mubr.msk.f32.mxu1 %vm6835_vm0, %v6834_v0 }
0x1e68   :  { %6340 = vmatprep.subr.bf16.mxu1 %v6837_v48 }
0x1e6b   :  { %6342 = vmatpush3.bf16.msra.mxu1 %v7064_v51 }
0x1e6c   :  { %6349 = vmatprep.subr.bf16.mxu1 %v6837_v48 }
0x1f39   :  { %v2445_v45 = vpop.f32.mrb[30].mxu1 }
0x1f3a   :  { %v2449_v46 = vadd.f32 %v2445_v45, %v2376_v44  ;;  %v6019_v10 = vpop.f32.mrb[31].mxu1 }
0x1f3c   :  { %6607 = vtanh.f32 %v2449_v46  ;;  %v5526_v50 = vmul.f32 -1.442695, %v2449_v46 }
0x1f3e   :  { %6609 = vpow2.f32 %v5526_v50 }
0x1f46   :  { %v6608_v49 = vpop.eup %6607 }
0x1f47   :  { %2459 = vrot.lane.b32.xlu0 %v6608_v49, %s6833_s29 }
0x1f48   :  { %v6610_v22 = vpop.eup %6609 }
0x1f49   :  { %v2453_v52 = vadd.f32 1.0, %v6610_v22 }
0x1f4b   :  { %6611 = vrcp.f32 %v2453_v52 }
0x1f55   :  { %v6612_v55 = vpop.eup %6611 }
0x1f56   :  { %v2457_v60 = vmul.f32 %v6612_v55, %v2357_v38 }
0x1fb9   :  { %v2460_v57 = vpop.permute.xlu0 %2459 }
0x1fba   :  { %v2462_v58 = vmul.f32 %v6612_v55, %v2460_v57 }
0x1fbc   :  { %2464 = vrot.lane.b32.xlu1 %v2462_v58, %s6839_s8  ;;  %v3040_v58 = vld [vmem:[%s7795_s10] sm:$0xff] }
0x202e   :  { %v2465_v61 = vpop.permute.xlu1 %2464 }
0x202f   :  { %v2467_v62 = vadd.f32 %v2465_v61, %v2457_v60  ;;  %v3041_v60 = vld [vmem:[%s7795_s10 + $0x8] sm:$0xff] }
0x2030   :  { %v6361_v61 = vpack.c.bf16 %v3041_v60, %v3040_v58 }
0x2031   :  { %6613 = vtanh.f32 %v2467_v62 }
0x203b   :  { %v6614_v63 = vpop.eup %6613 }
0x203c   :  { %2470 = vrot.lane.b32.xlu0 %v6614_v63, %s6833_s29 }
0x20ae   :  { %v2471_v1 = vpop.permute.xlu0 %2470 }
0x20af   :  { %v2473_v2 = vmul.f32 %v6612_v55, %v2471_v1 }
0x20b1   :  { %v2481_v3 = vrot.slane %v2473_v2, %v7094_v9 }
0x20b3   :  { %2482 = vrot.lane.b32.xlu1 %v2481_v3, %s6839_s8  ;;  %v3042_v3 = vld [vmem:[%s7795_s10 + $0x10] sm:$0xff] }
0x2125   :  { %v2483_v4 = vpop.permute.xlu1 %2482 }
0x2126   :  { %2485 = vst.msk [vmem:[#allocation3 + $0x14] sm:$0x3] %vm1384_vm3, %v2483_v4  ;;  %6029 = vmatmul.mubr.msk.f32.vlgmr.msra.gmra.mrb[32].mxu0 %vm1274_vm4, %v2483_v4  ;;  %v3043_v4 = vld [vmem:[%s7795_s10 + $0x18] sm:$0xff] }
0x2127   :  { %6345 = vmatpush3.bf16.msra.mxu0 %v7049_v47  ;;  %6050 = vmatprep.mubr.msk.f32.mxu0 %vm6835_vm0, %v6834_v0 }
0x2128   :  { %6346 = vmatprep.subr.bf16.mxu0 %v6837_v48 }
0x212b   :  { %6348 = vmatpush3.bf16.msra.mxu0 %v7064_v51 }
0x212c   :  { %6355 = vmatprep.subr.bf16.mxu0 %v6837_v48 }
0x21f9   :  { %v2555_v6 = vpop.f32.mrb[32].mxu0 }
0x21fa   :  { %v2559_v7 = vadd.f32 %v2555_v6, %v2486_v5  ;;  %v6030_v8 = vpop.f32.mrb[33].mxu0  ;;  %v6365_v5 = vpack.c.bf16 %v3043_v4, %v3042_v3 }
0x21fb   :  { %v3037_v8 = vld [vmem:[#allocation3 + $0x8] sm:$0xff] }
0x21fc   :  { %6615 = vtanh.f32 %v2559_v7  ;;  %v5528_v54 = vmul.f32 -1.442695, %v2559_v7  ;;  %v3036_v7 = vld [vmem:[#allocation3] sm:$0xff] }
0x21fe   :  { %6617 = vpow2.f32 %v5528_v54  ;;  %v2816_v54 = vld [vmem:[#allocation2 + $0x1c] sm:$0x3] }
0x2206   :  { %v6616_v53 = vpop.eup %6615 }
0x2207   :  { %2569 = vrot.lane.b32.xlu0 %v6616_v53, %s6833_s29 }
0x2208   :  { %v6618_v56 = vpop.eup %6617 }
0x2209   :  { %v2563_v59 = vadd.f32 1.0, %v6618_v56 }
0x220b   :  { %6619 = vrcp.f32 %v2563_v59 }
0x2215   :  { %v6620_v11 = vpop.eup %6619 }
0x2216   :  { %v2567_v14 = vmul.f32 %v6620_v11, %v2467_v62 }
0x2279   :  { %v2570_v12 = vpop.permute.xlu0 %2569 }
0x227a   :  { %v2572_v13 = vmul.f32 %v6620_v11, %v2570_v12  ;;  %v7305_v12 = vld [vmem:[%s7796_s11] ss:$0 sm:$0xff] }
0x227c   :  { %2574 = vrot.lane.b32.xlu1 %v2572_v13, %s6839_s8 }
0x22ee   :  { %v2575_v15 = vpop.permute.xlu1 %2574 }
0x22ef   :  { %v2577_v16 = vadd.f32 %v2575_v15, %v2567_v14 }
0x22f1   :  { %6621 = vtanh.f32 %v2577_v16 }
0x22fb   :  { %v6622_v17 = vpop.eup %6621 }
0x22fc   :  { %2580 = vrot.lane.b32.xlu0 %v6622_v17, %s6833_s29 }
0x236e   :  { %v2581_v18 = vpop.permute.xlu0 %2580 }
0x236f   :  { %v2583_v19 = vmul.f32 %v6620_v11, %v2581_v18 }
0x2371   :  { %v2591_v20 = vrot.slane %v2583_v19, %v7094_v9 }
0x2373   :  { %2592 = vrot.lane.b32.xlu1 %v2591_v20, %s6839_s8 }
0x23e5   :  { %v2593_v26 = vpop.permute.xlu1 %2592 }
0x23e6   :  { %2595 = vst.msk [vmem:[#allocation3 + $0x16] sm:$0x3] %vm1384_vm3, %v2593_v26  ;;  %6040 = vmatmul.mubr.msk.f32.vlgmr.msra.gmra.mrb[32].mxu1 %vm1274_vm4, %v2593_v26 }
0x23e7   :  { %6351 = vmatpush3.bf16.msra.mxu1 %v7049_v47  ;;  %6061 = vmatprep.mubr.msk.f32.mxu1 %vm6835_vm0, %v6834_v0 }
0x23e8   :  { %6352 = vmatprep.subr.bf16.mxu1 %v6837_v48 }
0x23eb   :  { %6354 = vmatpush3.bf16.msra.mxu1 %v7064_v51 }
0x23ec   :  { %6362 = vmatprep.subr.bf16.mxu1 %v6361_v61 }
0x23ed   :  { %v3038_v53 = vld [vmem:[#allocation3 + $0x10] sm:$0xff] }
0x24b9   :  { %v2665_v28 = vpop.f32.mrb[32].mxu1 }
0x24ba   :  { %v2669_v29 = vadd.f32 %v2665_v28, %v2596_v27  ;;  %v6041_v30 = vpop.f32.mrb[33].mxu1 }
0x24bc   :  { %6623 = vtanh.f32 %v2669_v29  ;;  %v5530_v32 = vmul.f32 -1.442695, %v2669_v29 }
0x24be   :  { %6625 = vpow2.f32 %v5530_v32 }
0x24c6   :  { %v6624_v31 = vpop.eup %6623 }
0x24c7   :  { %2679 = vrot.lane.b32.xlu0 %v6624_v31, %s6833_s29 }
0x24c8   :  { %v6626_v21 = vpop.eup %6625 }
0x24c9   :  { %v2673_v23 = vadd.f32 1.0, %v6626_v21  ;;  %v3152_v21 = vld [vmem:[%s7797_s12] sm:$0xff] }
0x24cb   :  { %6627 = vrcp.f32 %v2673_v23  ;;  %v3153_v23 = vld [vmem:[%s7797_s12 + $0x8] sm:$0xff] }
0x24d5   :  { %v6628_v24 = vpop.eup %6627 }
0x24d6   :  { %v2677_v34 = vmul.f32 %v6628_v24, %v2577_v16 }
0x2539   :  { %v2680_v25 = vpop.permute.xlu0 %2679 }
0x253a   :  { %v2682_v33 = vmul.f32 %v6628_v24, %v2680_v25  ;;  %v3154_v25 = vld [vmem:[%s7797_s12 + $0x10] sm:$0xff] }
0x253c   :  { %2684 = vrot.lane.b32.xlu1 %v2682_v33, %s6839_s8  ;;  %v3155_v33 = vld [vmem:[%s7797_s12 + $0x18] sm:$0xff]  ;;  %s6840_s12 = smov 96  }
0x25ae   :  { %v2685_v35 = vpop.permute.xlu1 %2684 }
0x25af   :  { %v2687_v36 = vadd.f32 %v2685_v35, %v2677_v34  ;;  %v7331_v34 = vpack.c.bf16 %v3155_v33, %v3154_v25 }
0x25b1   :  { %6629 = vtanh.f32 %v2687_v36 }
0x25bb   :  { %v6630_v37 = vpop.eup %6629 }
0x25bc   :  { %2690 = vrot.lane.b32.xlu0 %v6630_v37, %s6833_s29 }
0x262e   :  { %v2691_v38 = vpop.permute.xlu0 %2690 }
0x262f   :  { %v2693_v39 = vmul.f32 %v6628_v24, %v2691_v38  ;;  %v7321_v24 = vpack.c.bf16 %v3153_v23, %v3152_v21 }
0x2631   :  { %v2701_v40 = vrot.slane %v2693_v39, %v7094_v9  ;;  %v2926_v39 = vld [vmem:[#allocation2 + $0x1e] sm:$0x3] }
0x2633   :  { %2702 = vrot.lane.b32.xlu1 %v2701_v40, %s6839_s8 }
0x26a5   :  { %v2703_v41 = vpop.permute.xlu1 %2702 }
0x26a6   :  { %2705 = vst.msk [vmem:[#allocation3 + $0x18] sm:$0x3] %vm1384_vm3, %v2703_v41  ;;  %6051 = vmatmul.mubr.msk.f32.vlgmr.msra.gmra.mrb[34].mxu0 %vm1274_vm4, %v2703_v41 }
0x26a7   :  { %6357 = vmatpush3.bf16.msra.mxu0 %v7049_v47  ;;  %6072 = vmatprep.mubr.msk.f32.mxu0 %vm6835_vm0, %v6834_v0 }
0x26a8   :  { %6358 = vmatprep.subr.bf16.mxu0 %v6837_v48 }
0x26ab   :  { %6360 = vmatpush3.bf16.msra.mxu0 %v7064_v51 }
0x26ac   :  { %6369 = vmatprep.subr.bf16.mxu0 %v6837_v48 }
0x2779   :  { %v2775_v43 = vpop.f32.mrb[34].mxu0 }
0x277a   :  { %v2779_v44 = vadd.f32 %v2775_v43, %v2706_v42  ;;  %v6052_v45 = vpop.f32.mrb[35].mxu0 }
0x277c   :  { %6631 = vtanh.f32 %v2779_v44  ;;  %v5532_v10 = vmul.f32 -1.442695, %v2779_v44 }
0x277e   :  { %6633 = vpow2.f32 %v5532_v10 }
0x2786   :  { %v6632_v46 = vpop.eup %6631 }
0x2787   :  { %2789 = vrot.lane.b32.xlu0 %v6632_v46, %s6833_s29 }
0x2788   :  { %v6634_v47 = vpop.eup %6633 }
0x2789   :  { %v2783_v49 = vadd.f32 1.0, %v6634_v47 }
0x278b   :  { %6635 = vrcp.f32 %v2783_v49 }
0x2795   :  { %v6636_v50 = vpop.eup %6635 }
0x2796   :  { %v2787_v51 = vmul.f32 %v6636_v50, %v2687_v36 }
0x27f9   :  { %v2790_v22 = vpop.permute.xlu0 %2789 }
0x27fa   :  { %v2792_v52 = vmul.f32 %v6636_v50, %v2790_v22 }
0x27fc   :  { %2794 = vrot.lane.b32.xlu1 %v2792_v52, %s6839_s8 }
0x286e   :  { %v2795_v55 = vpop.permute.xlu1 %2794 }
0x286f   :  { %v2797_v57 = vadd.f32 %v2795_v55, %v2787_v51 }
0x2871   :  { %6637 = vtanh.f32 %v2797_v57 }
0x287b   :  { %v6638_v62 = vpop.eup %6637 }
0x287c   :  { %2800 = vrot.lane.b32.xlu0 %v6638_v62, %s6833_s29 }
0x28ee   :  { %v2801_v63 = vpop.permute.xlu0 %2800 }
0x28ef   :  { %v2803_v1 = vmul.f32 %v6636_v50, %v2801_v63 }
0x28f1   :  { %v2811_v2 = vrot.slane %v2803_v1, %v7094_v9 }
0x28f3   :  { %2812 = vrot.lane.b32.xlu1 %v2811_v2, %s6839_s8 }
0x2965   :  { %v2813_v6 = vpop.permute.xlu1 %2812 }
0x2966   :  { %2815 = vst.msk [vmem:[#allocation3 + $0x1a] sm:$0x3] %vm1384_vm3, %v2813_v6  ;;  %6062 = vmatmul.mubr.msk.f32.vlgmr.msra.gmra.mrb[34].mxu1 %vm1274_vm4, %v2813_v6 }
0x2967   :  { %6364 = vmatpush3.bf16.msra.mxu1 %v6361_v61  ;;  %6083 = vmatprep.mubr.msk.f32.mxu1 %vm1274_vm4, %v3036_v7 }
0x2968   :  { %6366 = vmatprep.subr.bf16.mxu1 %v6365_v5 }
0x296b   :  { %6368 = vmatpush3.bf16.msra.mxu1 %v6365_v5 }
0x296c   :  { %6375 = vmatprep.subr.bf16.mxu1 %v6837_v48 }
0x296e   :  { %6084 = vmatmul.mubr.msk.f32.vlgmr.msra.gmra.mrb[36].mxu1 %vm1274_vm4, %v3037_v8 }
0x296f   :  { %6086 = vmatprep.mubr.msk.f32.mxu1 %vm1274_vm4, %v3038_v53  ;;  %6377 = vmatpush3.bf16.msra.mxu1 %v7321_v24 }
0x2970   :  { %6378 = vmatprep.subr.bf16.mxu1 %v6837_v48 }
0x2973   :  { %6380 = vmatpush3.bf16.msra.mxu1 %v7331_v34 }
0x2974   :  { %6387 = vmatprep.subr.bf16.mxu1 %v6837_v48 }
0x2a39   :  { %v2885_v56 = vpop.f32.mrb[34].mxu1 }
0x2a3a   :  { %v2889_v59 = vadd.f32 %v2885_v56, %v2816_v54  ;;  %v6063_v11 = vpop.f32.mrb[35].mxu1 }
0x2a3c   :  { %6639 = vtanh.f32 %v2889_v59  ;;  %v5534_v18 = vmul.f32 -1.442695, %v2889_v59 }
0x2a3e   :  { %6641 = vpow2.f32 %v5534_v18 }
0x2a41   :  { %v6085_v13 = vpop.f32.mrb[36].mxu1 }
0x2a42   :  { %v3135_v14 = vadd.f32 %v6085_v13, %v7305_v12  ;;  %v3129_v15 = vpop.f32.mrb[37].mxu1 }
0x2a43   :  { %v3130_v16 = vadd.f32 %v7305_v12, %v3129_v15 }
0x2a44   :  { %3149 = vst [vmem:[#allocation4 + $0x8] sm:$0xff] %v3135_v14 }
0x2a45   :  { %3148 = vst [vmem:[#allocation4] sm:$0xff] %v3130_v16 }
0x2a46   :  { %v6640_v17 = vpop.eup %6639 }
0x2a47   :  { %2899 = vrot.lane.b32.xlu0 %v6640_v17, %s6833_s29 }
0x2a48   :  { %v6642_v19 = vpop.eup %6641 }
0x2a49   :  { %v2893_v20 = vadd.f32 1.0, %v6642_v19 }
0x2a4b   :  { %6643 = vrcp.f32 %v2893_v20 }
0x2a4c   :  { %v3156_v43 = vld [vmem:[#allocation4] sm:$0x3]  ;;  %v3272_v20 = vld [vmem:[#allocation4 + $0x2] sm:$0x3] }
0x2a55   :  { %v6644_v26 = vpop.eup %6643 }
0x2a56   :  { %v2897_v29 = vmul.f32 %v6644_v26, %v2797_v57 }
0x2ab9   :  { %v2900_v27 = vpop.permute.xlu0 %2899 }
0x2aba   :  { %v2902_v28 = vmul.f32 %v6644_v26, %v2900_v27 }
0x2abc   :  { %2904 = vrot.lane.b32.xlu1 %v2902_v28, %s6839_s8 }
0x2b2e   :  { %v2905_v30 = vpop.permute.xlu1 %2904 }
0x2b2f   :  { %v7311_v31 = vadd.f32 %v2905_v30, %v2897_v29 }
0x2b31   :  { %6645 = vtanh.f32 %v7311_v31 }
0x2b3b   :  { %v6646_v32 = vpop.eup %6645 }
0x2b3c   :  { %2910 = vrot.lane.b32.xlu0 %v6646_v32, %s6833_s29 }
0x2bae   :  { %v2911_v35 = vpop.permute.xlu0 %2910 }
0x2baf   :  { %v2913_v36 = vmul.f32 %v6644_v26, %v2911_v35 }
0x2bb1   :  { %v2921_v37 = vrot.slane %v2913_v36, %v7094_v9 }
0x2bb3   :  { %2922 = vrot.lane.b32.xlu1 %v2921_v37, %s6839_s8 }
0x2c25   :  { %v2923_v38 = vpop.permute.xlu1 %2922 }
0x2c26   :  { %2925 = vst.msk [vmem:[#allocation3 + $0x1c] sm:$0x3] %vm1384_vm3, %v2923_v38  ;;  %6073 = vmatmul.mubr.msk.f32.vlgmr.msra.gmra.mrb[36].mxu0 %vm1274_vm4, %v2923_v38 }
0x2c27   :  { %6371 = vmatpush3.bf16.msra.mxu0 %v7321_v24  ;;  %6097 = vmatprep.mubr.msk.f32.mxu0 %vm6835_vm0, %v6834_v0 }
0x2c28   :  { %6372 = vmatprep.subr.bf16.mxu0 %v6837_v48 }
0x2c2b   :  { %6374 = vmatpush3.bf16.msra.mxu0 %v7331_v34 }
0x2c2c   :  { %6381 = vmatprep.subr.bf16.mxu0 %v6837_v48 }
0x2c2e   :  { %6098 = vmatmul.mubr.f32.vlgmr.msra.gmra.mrb[38].mxu0 %v6834_v0 }
0x2c2f   :  { %6383 = vmatpush3.bf16.msra.mxu0 %v7321_v24  ;;  %6119 = vmatprep.mubr.msk.f32.mxu0 %vm6835_vm0, %v6834_v0 }
0x2c30   :  { %6384 = vmatprep.subr.bf16.mxu0 %v6837_v48 }
0x2c33   :  { %6386 = vmatpush3.bf16.msra.mxu0 %v7331_v34 }
0x2c34   :  { %6393 = vmatprep.subr.bf16.mxu0 %v6837_v48 }
0x2cf9   :  { %v2995_v40 = vpop.f32.mrb[36].mxu0 }
0x2cfa   :  { %v2999_v41 = vadd.f32 %v2995_v40, %v2926_v39  ;;  %v6074_v42 = vpop.f32.mrb[37].mxu0  ;;  %v3390_v40 = vld [vmem:[#allocation4 + $0x4] sm:$0x3] }
0x2cfc   :  { %6647 = vtanh.f32 %v2999_v41  ;;  %v5536_v49 = vmul.f32 -1.442695, %v2999_v41 }
0x2d01   :  { %v3223_v44 = vpop.f32.mrb[38].mxu0 }
0x2d02   :  { %v3227_v45 = vadd.f32 %v3223_v44, %v3156_v43  ;;  %v6099_v46 = vpop.f32.mrb[39].mxu0 }
0x2d04   :  { %6649 = vtanh.f32 %v3227_v45  ;;  %v5542_v50 = vmul.f32 -1.442695, %v3227_v45 }
0x2d05   :  { %6651 = vpow2.f32 %v5536_v49 }
0x2d06   :  { %v6648_v10 = vpop.eup %6647  ;;  %6653 = vpow2.f32 %v5542_v50 }
0x2d07   :  { %3009 = vrot.lane.b32.xlu0 %v6648_v10, %s6833_s29 }
0x2d0e   :  { %v6650_v47 = vpop.eup %6649 }
0x2d0f   :  { %3237 = vrot.lane.b32.xlu1 %v6650_v47, %s6833_s29  ;;  %v6652_v22 = vpop.eup %6651 }
0x2d10   :  { %v3003_v52 = vadd.f32 1.0, %v6652_v22  ;;  %v6654_v51 = vpop.eup %6653 }
0x2d11   :  { %v3231_v55 = vadd.f32 1.0, %v6654_v51 }
0x2d12   :  { %6655 = vrcp.f32 %v3003_v52 }
0x2d13   :  { %6657 = vrcp.f32 %v3231_v55 }
0x2d1c   :  { %v6656_v57 = vpop.eup %6655 }
0x2d1d   :  { %v6658_v61 = vpop.eup %6657  ;;  %v3007_v1 = vmul.f32 %v6656_v57, %v7311_v31 }
0x2d1e   :  { %v3235_v4 = vmul.f32 0.0, %v6658_v61 }
0x2d79   :  { %v3010_v58 = vpop.permute.xlu0 %3009 }
0x2d7a   :  { %v3012_v60 = vmul.f32 %v6656_v57, %v3010_v58 }
0x2d7c   :  { %3014 = vrot.lane.b32.xlu0 %v3012_v60, %s6839_s8 }
0x2d81   :  { %v3238_v62 = vpop.permute.xlu1 %3237 }
0x2d82   :  { %v3240_v63 = vmul.f32 %v6658_v61, %v3238_v62 }
0x2d84   :  { %3242 = vrot.lane.b32.xlu1 %v3240_v63, %s6839_s8 }
0x2dee   :  { %v3015_v2 = vpop.permute.xlu0 %3014 }
0x2def   :  { %v3017_v3 = vadd.f32 %v3015_v2, %v3007_v1 }
0x2df1   :  { %6659 = vtanh.f32 %v3017_v3 }
0x2df6   :  { %v3243_v5 = vpop.permute.xlu1 %3242 }
0x2df7   :  { %v3245_v6 = vadd.f32 %v3243_v5, %v3235_v4 }
0x2df9   :  { %6661 = vtanh.f32 %v3245_v6 }
0x2dfb   :  { %v6660_v7 = vpop.eup %6659 }
0x2dfc   :  { %3020 = vrot.lane.b32.xlu0 %v6660_v7, %s6833_s29 }
0x2e03   :  { %v6662_v8 = vpop.eup %6661 }
0x2e04   :  { %3248 = vrot.lane.b32.xlu1 %v6662_v8, %s6833_s29 }
0x2e6e   :  { %v3021_v53 = vpop.permute.xlu0 %3020 }
0x2e6f   :  { %v3023_v54 = vmul.f32 %v6656_v57, %v3021_v53 }
0x2e71   :  { %v3031_v56 = vrot.slane %v3023_v54, %v7094_v9 }
0x2e73   :  { %3032 = vrot.lane.b32.xlu0 %v3031_v56, %s6839_s8 }
0x2e76   :  { %v3249_v59 = vpop.permute.xlu1 %3248 }
0x2e77   :  { %v7361_v11 = vmul.f32 %v6658_v61, %v3249_v59  ;;  %v3508_v61 = vld [vmem:[#allocation4 + $0x6] sm:$0x3] }
0x2e79   :  { %3273 = vrot.lane.b32.xlu1 %v7361_v11, %s6839_s8 }
0x2ee5   :  { %v3033_v13 = vpop.permute.xlu0 %3032 }
0x2ee6   :  { %3035 = vst.msk [vmem:[#allocation3 + $0x1e] sm:$0x3] %vm1384_vm3, %v3033_v13 }
0x2eeb   :  { %v3274_v15 = vpop.permute.xlu1 %3273 }
0x2eed   :  { %v3039_v14 = vld [vmem:[#allocation3 + $0x18] sm:$0xff] }
0x2eee   :  { %6087 = vmatmul.mubr.msk.f32.gmra.mrb[38].mxu1 %vm1274_vm4, %v3039_v14 }
0x2eef   :  { %6108 = vmatprep.mubr.msk.f32.mxu1 %vm6835_vm0, %v6834_v0 }
0x2ef2   :  { %6109 = vmatmul.mubr.msk.f32.vlgmr.msra.gmra.mrb[40].mxu1 %vm1274_vm4, %v3274_v15 }
0x2ef3   :  { %6389 = vmatpush3.bf16.msra.mxu1 %v7321_v24  ;;  %6130 = vmatprep.mubr.msk.f32.mxu1 %vm6835_vm0, %v6834_v0 }
0x2ef4   :  { %6390 = vmatprep.subr.bf16.mxu1 %v6837_v48 }
0x2ef7   :  { %6392 = vmatpush3.bf16.msra.mxu1 %v7331_v34 }
0x2ef8   :  { %6399 = vmatprep.subr.bf16.mxu1 %v6837_v48 }
0x2fc1   :  { %v6088_v16 = vpop.f32.mrb[38].mxu1 }
0x2fc2   :  { %v3145_v17 = vadd.f32 %v6088_v16, %v7305_v12  ;;  %v3139_v18 = vpop.f32.mrb[39].mxu1  ;;  %v3624_v16 = vld [vmem:[#allocation4 + $0x8] sm:$0x3] }
0x2fc3   :  { %v3140_v19 = vadd.f32 %v7305_v12, %v3139_v18 }
0x2fc4   :  { %3151 = vst [vmem:[#allocation4 + $0x18] sm:$0xff] %v3145_v17 }
0x2fc5   :  { %3150 = vst [vmem:[#allocation4 + $0x10] sm:$0xff] %v3140_v19  ;;  %v3343_v26 = vpop.f32.mrb[40].mxu1 }
0x2fc6   :  { %v3347_v27 = vadd.f32 %v3343_v26, %v3272_v20  ;;  %v6110_v28 = vpop.f32.mrb[41].mxu1 }
0x2fc8   :  { %6663 = vtanh.f32 %v3347_v27  ;;  %v5545_v30 = vmul.f32 -1.442695, %v3347_v27 }
0x2fca   :  { %6665 = vpow2.f32 %v5545_v30 }
0x2fd2   :  { %v6664_v29 = vpop.eup %6663 }
0x2fd3   :  { %3357 = vrot.lane.b32.xlu0 %v6664_v29, %s6833_s29 }
0x2fd4   :  { %v6666_v31 = vpop.eup %6665 }
0x2fd5   :  { %v3351_v32 = vadd.f32 1.0, %v6666_v31 }
0x2fd7   :  { %6667 = vrcp.f32 %v3351_v32 }
0x2fe1   :  { %v6668_v21 = vpop.eup %6667 }
0x2fe2   :  { %v3355_v12 = vmul.f32 %v6668_v21, %v3245_v6 }
0x3045   :  { %v3358_v23 = vpop.permute.xlu0 %3357 }
0x3046   :  { %v3360_v25 = vmul.f32 %v6668_v21, %v3358_v23 }
0x3048   :  { %3362 = vrot.lane.b32.xlu1 %v3360_v25, %s6839_s8 }
0x30ba   :  { %v3363_v33 = vpop.permute.xlu1 %3362 }
0x30bb   :  { %v3365_v35 = vadd.f32 %v3363_v33, %v3355_v12 }
0x30bd   :  { %6669 = vtanh.f32 %v3365_v35 }
0x30c7   :  { %v6670_v36 = vpop.eup %6669 }
0x30c8   :  { %3368 = vrot.lane.b32.xlu0 %v6670_v36, %s6833_s29  ;;  %v3742_v36 = vld [vmem:[#allocation4 + $0xa] sm:$0x3] }
0x313a   :  { %v3369_v37 = vpop.permute.xlu0 %3368 }
0x313b   :  { %v7381_v38 = vmul.f32 %v6668_v21, %v3369_v37 }
0x313d   :  { %3391 = vrot.lane.b32.xlu1 %v7381_v38, %s6839_s8 }
0x31af   :  { %v3392_v39 = vpop.permute.xlu1 %3391 }
0x31b0   :  { %6120 = vmatmul.mubr.msk.f32.vlgmr.msra.gmra.mrb[40].mxu0 %vm1274_vm4, %v3392_v39 }
0x31b1   :  { %6395 = vmatpush3.bf16.msra.mxu0 %v7321_v24  ;;  %6141 = vmatprep.mubr.msk.f32.mxu0 %vm6835_vm0, %v6834_v0 }
0x31b2   :  { %6396 = vmatprep.subr.bf16.mxu0 %v6837_v48 }
0x31b5   :  { %6398 = vmatpush3.bf16.msra.mxu0 %v7331_v34 }
0x31b6   :  { %6405 = vmatprep.subr.bf16.mxu0 %v6837_v48 }
0x3283   :  { %v3461_v41 = vpop.f32.mrb[40].mxu0 }
0x3284   :  { %v3465_v42 = vadd.f32 %v3461_v41, %v3390_v40  ;;  %v6121_v43 = vpop.f32.mrb[41].mxu0 }
0x3286   :  { %6671 = vtanh.f32 %v3465_v42  ;;  %v5548_v45 = vmul.f32 -1.442695, %v3465_v42 }
0x3288   :  { %6673 = vpow2.f32 %v5548_v45 }
0x3290   :  { %v6672_v44 = vpop.eup %6671 }
0x3291   :  { %3475 = vrot.lane.b32.xlu0 %v6672_v44, %s6833_s29 }
0x3292   :  { %v6674_v46 = vpop.eup %6673 }
0x3293   :  { %v3469_v10 = vadd.f32 1.0, %v6674_v46 }
0x3295   :  { %6675 = vrcp.f32 %v3469_v10 }
0x329f   :  { %v6676_v47 = vpop.eup %6675 }
0x32a0   :  { %v3473_v22 = vmul.f32 %v6676_v47, %v3365_v35 }
0x3303   :  { %v3476_v49 = vpop.permute.xlu0 %3475 }
0x3304   :  { %v3478_v50 = vmul.f32 %v6676_v47, %v3476_v49 }
0x3306   :  { %3480 = vrot.lane.b32.xlu1 %v3478_v50, %s6839_s8 }
0x3378   :  { %v3481_v52 = vpop.permute.xlu1 %3480 }
0x3379   :  { %v3483_v51 = vadd.f32 %v3481_v52, %v3473_v22 }
0x337b   :  { %6677 = vtanh.f32 %v3483_v51 }
0x3385   :  { %v6678_v55 = vpop.eup %6677 }
0x3386   :  { %3486 = vrot.lane.b32.xlu0 %v6678_v55, %s6833_s29 }
0x33f8   :  { %v3487_v57 = vpop.permute.xlu0 %3486 }
0x33f9   :  { %v7395_v58 = vmul.f32 %v6676_v47, %v3487_v57  ;;  %v3858_v57 = vld [vmem:[#allocation4 + $0xc] sm:$0x3] }
0x33fb   :  { %3509 = vrot.lane.b32.xlu1 %v7395_v58, %s6839_s8 }
0x346d   :  { %v3510_v60 = vpop.permute.xlu1 %3509 }
0x346e   :  { %6131 = vmatmul.mubr.msk.f32.vlgmr.msra.gmra.mrb[42].mxu1 %vm1274_vm4, %v3510_v60 }
0x346f   :  { %6401 = vmatpush3.bf16.msra.mxu1 %v7321_v24  ;;  %6152 = vmatprep.mubr.msk.f32.mxu1 %vm6835_vm0, %v6834_v0 }
0x3470   :  { %6402 = vmatprep.subr.bf16.mxu1 %v6837_v48 }
0x3473   :  { %6404 = vmatpush3.bf16.msra.mxu1 %v7331_v34 }
0x3474   :  { %6411 = vmatprep.subr.bf16.mxu1 %v6837_v48 }
0x3541   :  { %v3579_v62 = vpop.f32.mrb[42].mxu1 }
0x3542   :  { %v3583_v63 = vadd.f32 %v3579_v62, %v3508_v61  ;;  %v6132_v1 = vpop.f32.mrb[43].mxu1 }
0x3544   :  { %6679 = vtanh.f32 %v3583_v63  ;;  %v5551_v3 = vmul.f32 -1.442695, %v3583_v63 }
0x3546   :  { %6681 = vpow2.f32 %v5551_v3 }
0x354e   :  { %v6680_v2 = vpop.eup %6679 }
0x354f   :  { %3593 = vrot.lane.b32.xlu0 %v6680_v2, %s6833_s29 }
0x3550   :  { %v6682_v4 = vpop.eup %6681 }
0x3551   :  { %v3587_v5 = vadd.f32 1.0, %v6682_v4 }
0x3553   :  { %6683 = vrcp.f32 %v3587_v5 }
0x355d   :  { %v6684_v6 = vpop.eup %6683 }
0x355e   :  { %v3591_v53 = vmul.f32 %v6684_v6, %v3483_v51 }
0x35c1   :  { %v3594_v7 = vpop.permute.xlu0 %3593 }
0x35c2   :  { %v3596_v8 = vmul.f32 %v6684_v6, %v3594_v7 }
0x35c4   :  { %3598 = vrot.lane.b32.xlu1 %v3596_v8, %s6839_s8 }
0x3636   :  { %v3599_v54 = vpop.permute.xlu1 %3598 }
0x3637   :  { %v3601_v56 = vadd.f32 %v3599_v54, %v3591_v53 }
0x3639   :  { %6685 = vtanh.f32 %v3601_v56 }
0x3643   :  { %v6686_v59 = vpop.eup %6685 }
0x3644   :  { %3604 = vrot.lane.b32.xlu0 %v6686_v59, %s6833_s29 }
0x36b6   :  { %v3605_v13 = vpop.permute.xlu0 %3604 }
0x36b7   :  { %v7409_v14 = vmul.f32 %v6684_v6, %v3605_v13 }
0x36b9   :  { %3625 = vrot.lane.b32.xlu1 %v7409_v14, %s6839_s8 }
0x372b   :  { %v3626_v15 = vpop.permute.xlu1 %3625 }
0x372c   :  { %6142 = vmatmul.mubr.msk.f32.vlgmr.msra.gmra.mrb[42].mxu0 %vm1274_vm4, %v3626_v15  ;;  %v3976_v15 = vld [vmem:[#allocation4 + $0xe] sm:$0x3] }
0x372d   :  { %6407 = vmatpush3.bf16.msra.mxu0 %v7321_v24  ;;  %6163 = vmatprep.mubr.msk.f32.mxu0 %vm6835_vm0, %v6834_v0 }
0x372e   :  { %6408 = vmatprep.subr.bf16.mxu0 %v6837_v48 }
0x3731   :  { %6410 = vmatpush3.bf16.msra.mxu0 %v7331_v34 }
0x3732   :  { %6417 = vmatprep.subr.bf16.mxu0 %v6837_v48 }
0x37ff   :  { %v3695_v17 = vpop.f32.mrb[42].mxu0 }
0x3800   :  { %v3699_v18 = vadd.f32 %v3695_v17, %v3624_v16  ;;  %v6143_v19 = vpop.f32.mrb[43].mxu0 }
0x3802   :  { %6687 = vtanh.f32 %v3699_v18  ;;  %v5554_v26 = vmul.f32 -1.442695, %v3699_v18 }
0x3804   :  { %6689 = vpow2.f32 %v5554_v26 }
0x380c   :  { %v6688_v20 = vpop.eup %6687 }
0x380d   :  { %3709 = vrot.lane.b32.xlu0 %v6688_v20, %s6833_s29 }
0x380e   :  { %v6690_v27 = vpop.eup %6689 }
0x380f   :  { %v3703_v28 = vadd.f32 1.0, %v6690_v27 }
0x3811   :  { %6691 = vrcp.f32 %v3703_v28 }
0x381b   :  { %v6692_v29 = vpop.eup %6691 }
0x381c   :  { %v3707_v32 = vmul.f32 %v6692_v29, %v3601_v56 }
0x387f   :  { %v3710_v30 = vpop.permute.xlu0 %3709 }
0x3880   :  { %v3712_v31 = vmul.f32 %v6692_v29, %v3710_v30 }
0x3882   :  { %3714 = vrot.lane.b32.xlu1 %v3712_v31, %s6839_s8 }
0x38f4   :  { %v3715_v21 = vpop.permute.xlu1 %3714 }
0x38f5   :  { %v3717_v23 = vadd.f32 %v3715_v21, %v3707_v32 }
0x38f7   :  { %6693 = vtanh.f32 %v3717_v23 }
0x3901   :  { %v6694_v25 = vpop.eup %6693 }
0x3902   :  { %3720 = vrot.lane.b32.xlu0 %v6694_v25, %s6833_s29 }
0x3974   :  { %v3721_v12 = vpop.permute.xlu0 %3720 }
0x3975   :  { %v7423_v33 = vmul.f32 %v6692_v29, %v3721_v12 }
0x3977   :  { %3743 = vrot.lane.b32.xlu1 %v7423_v33, %s6839_s8 }
0x39e9   :  { %v3744_v35 = vpop.permute.xlu1 %3743 }
0x39ea   :  { %6153 = vmatmul.mubr.msk.f32.vlgmr.msra.gmra.mrb[44].mxu1 %vm1274_vm4, %v3744_v35 }
0x39eb   :  { %6413 = vmatpush3.bf16.msra.mxu1 %v7321_v24  ;;  %6174 = vmatprep.mubr.msk.f32.mxu1 %vm6835_vm0, %v6834_v0 }
0x39ec   :  { %6414 = vmatprep.subr.bf16.mxu1 %v6837_v48 }
0x39ef   :  { %6416 = vmatpush3.bf16.msra.mxu1 %v7331_v34 }
0x39f0   :  { %6423 = vmatprep.subr.bf16.mxu1 %v6837_v48 }
0x3abd   :  { %v3813_v37 = vpop.f32.mrb[44].mxu1 }
0x3abe   :  { %v3817_v39 = vadd.f32 %v3813_v37, %v3742_v36  ;;  %v6154_v40 = vpop.f32.mrb[45].mxu1  ;;  %v4092_v36 = vld [vmem:[#allocation4 + $0x10] sm:$0x3] }
0x3ac0   :  { %6695 = vtanh.f32 %v3817_v39  ;;  %v5557_v42 = vmul.f32 -1.442695, %v3817_v39 }
0x3ac2   :  { %6697 = vpow2.f32 %v5557_v42 }
0x3aca   :  { %v6696_v41 = vpop.eup %6695 }
0x3acb   :  { %3827 = vrot.lane.b32.xlu0 %v6696_v41, %s6833_s29 }
0x3acc   :  { %v6698_v43 = vpop.eup %6697 }
0x3acd   :  { %v3821_v44 = vadd.f32 1.0, %v6698_v43 }
0x3acf   :  { %6699 = vrcp.f32 %v3821_v44 }
0x3ad9   :  { %v6700_v45 = vpop.eup %6699 }
0x3ada   :  { %v3825_v47 = vmul.f32 %v6700_v45, %v3717_v23 }
0x3b3d   :  { %v3828_v46 = vpop.permute.xlu0 %3827 }
0x3b3e   :  { %v3830_v10 = vmul.f32 %v6700_v45, %v3828_v46 }
0x3b40   :  { %3832 = vrot.lane.b32.xlu1 %v3830_v10, %s6839_s8 }
0x3bb2   :  { %v3833_v49 = vpop.permute.xlu1 %3832 }
0x3bb3   :  { %v3835_v50 = vadd.f32 %v3833_v49, %v3825_v47 }
0x3bb5   :  { %6701 = vtanh.f32 %v3835_v50 }
0x3bbf   :  { %v6702_v22 = vpop.eup %6701 }
0x3bc0   :  { %3838 = vrot.lane.b32.xlu0 %v6702_v22, %s6833_s29 }
0x3c32   :  { %v3839_v52 = vpop.permute.xlu0 %3838 }
0x3c33   :  { %v7437_v51 = vmul.f32 %v6700_v45, %v3839_v52 }
0x3c35   :  { %3859 = vrot.lane.b32.xlu1 %v7437_v51, %s6839_s8 }
0x3ca7   :  { %v3860_v55 = vpop.permute.xlu1 %3859 }
0x3ca8   :  { %6164 = vmatmul.mubr.msk.f32.vlgmr.msra.gmra.mrb[44].mxu0 %vm1274_vm4, %v3860_v55 }
0x3ca9   :  { %6419 = vmatpush3.bf16.msra.mxu0 %v7321_v24  ;;  %6185 = vmatprep.mubr.msk.f32.mxu0 %vm6835_vm0, %v6834_v0 }
0x3caa   :  { %6420 = vmatprep.subr.bf16.mxu0 %v6837_v48 }
0x3cad   :  { %6422 = vmatpush3.bf16.msra.mxu0 %v7331_v34 }
0x3cae   :  { %6429 = vmatprep.subr.bf16.mxu0 %v6837_v48 }
0x3d7b   :  { %v3929_v60 = vpop.f32.mrb[44].mxu0 }
0x3d7c   :  { %v3933_v61 = vadd.f32 %v3929_v60, %v3858_v57  ;;  %v6165_v62 = vpop.f32.mrb[45].mxu0  ;;  %v4210_v60 = vld [vmem:[#allocation4 + $0x12] sm:$0x3] }
0x3d7e   :  { %6703 = vtanh.f32 %v3933_v61  ;;  %v5560_v1 = vmul.f32 -1.442695, %v3933_v61 }
0x3d80   :  { %6705 = vpow2.f32 %v5560_v1 }
0x3d88   :  { %v6704_v63 = vpop.eup %6703 }
0x3d89   :  { %3943 = vrot.lane.b32.xlu0 %v6704_v63, %s6833_s29 }
0x3d8a   :  { %v6706_v2 = vpop.eup %6705 }
0x3d8b   :  { %v3937_v3 = vadd.f32 1.0, %v6706_v2 }
0x3d8d   :  { %6707 = vrcp.f32 %v3937_v3 }
0x3d97   :  { %v6708_v4 = vpop.eup %6707 }
0x3d98   :  { %v3941_v7 = vmul.f32 %v6708_v4, %v3835_v50 }
0x3dfb   :  { %v3944_v5 = vpop.permute.xlu0 %3943 }
0x3dfc   :  { %v3946_v6 = vmul.f32 %v6708_v4, %v3944_v5 }
0x3dfe   :  { %3948 = vrot.lane.b32.xlu1 %v3946_v6, %s6839_s8 }
0x3e70   :  { %v3949_v8 = vpop.permute.xlu1 %3948 }
0x3e71   :  { %v3951_v53 = vadd.f32 %v3949_v8, %v3941_v7 }
0x3e73   :  { %6709 = vtanh.f32 %v3951_v53 }
0x3e7d   :  { %v6710_v54 = vpop.eup %6709 }
0x3e7e   :  { %3954 = vrot.lane.b32.xlu0 %v6710_v54, %s6833_s29 }
0x3ef0   :  { %v3955_v56 = vpop.permute.xlu0 %3954 }
0x3ef1   :  { %v7451_v59 = vmul.f32 %v6708_v4, %v3955_v56 }
0x3ef3   :  { %3977 = vrot.lane.b32.xlu1 %v7451_v59, %s6839_s8 }
0x3f65   :  { %v3978_v13 = vpop.permute.xlu1 %3977 }
0x3f66   :  { %6175 = vmatmul.mubr.msk.f32.vlgmr.msra.gmra.mrb[46].mxu1 %vm1274_vm4, %v3978_v13 }
0x3f67   :  { %6425 = vmatpush3.bf16.msra.mxu1 %v7321_v24  ;;  %6196 = vmatprep.mubr.msk.f32.mxu1 %vm6835_vm0, %v6834_v0 }
0x3f68   :  { %6426 = vmatprep.subr.bf16.mxu1 %v6837_v48 }
0x3f6b   :  { %6428 = vmatpush3.bf16.msra.mxu1 %v7331_v34 }
0x3f6c   :  { %6435 = vmatprep.subr.bf16.mxu1 %v6837_v48 }
0x4039   :  { %v4047_v16 = vpop.f32.mrb[46].mxu1 }
0x403a   :  { %v4051_v17 = vadd.f32 %v4047_v16, %v3976_v15  ;;  %v6176_v18 = vpop.f32.mrb[47].mxu1 }
0x403c   :  { %6711 = vtanh.f32 %v4051_v17  ;;  %v5563_v20 = vmul.f32 -1.442695, %v4051_v17  ;;  %v4326_v17 = vld [vmem:[#allocation4 + $0x14] sm:$0x3] }
0x403e   :  { %6713 = vpow2.f32 %v5563_v20 }
0x4046   :  { %v6712_v19 = vpop.eup %6711 }
0x4047   :  { %4061 = vrot.lane.b32.xlu0 %v6712_v19, %s6833_s29 }
0x4048   :  { %v6714_v26 = vpop.eup %6713 }
0x4049   :  { %v4055_v27 = vadd.f32 1.0, %v6714_v26 }
0x404b   :  { %6715 = vrcp.f32 %v4055_v27 }
0x4055   :  { %v6716_v28 = vpop.eup %6715 }
0x4056   :  { %v4059_v31 = vmul.f32 %v6716_v28, %v3951_v53 }
0x40b9   :  { %v4062_v29 = vpop.permute.xlu0 %4061 }
0x40ba   :  { %v4064_v30 = vmul.f32 %v6716_v28, %v4062_v29 }
0x40bc   :  { %4066 = vrot.lane.b32.xlu1 %v4064_v30, %s6839_s8 }
0x412e   :  { %v4067_v32 = vpop.permute.xlu1 %4066 }
0x412f   :  { %v4069_v21 = vadd.f32 %v4067_v32, %v4059_v31 }
0x4131   :  { %6717 = vtanh.f32 %v4069_v21 }
0x413b   :  { %v6718_v23 = vpop.eup %6717 }
0x413c   :  { %4072 = vrot.lane.b32.xlu0 %v6718_v23, %s6833_s29 }
0x41ae   :  { %v4073_v25 = vpop.permute.xlu0 %4072 }
0x41af   :  { %v7465_v12 = vmul.f32 %v6716_v28, %v4073_v25 }
0x41b1   :  { %4093 = vrot.lane.b32.xlu1 %v7465_v12, %s6839_s8 }
0x4223   :  { %v4094_v35 = vpop.permute.xlu1 %4093 }
0x4224   :  { %6186 = vmatmul.mubr.msk.f32.vlgmr.msra.gmra.mrb[46].mxu0 %vm1274_vm4, %v4094_v35 }
0x4225   :  { %6431 = vmatpush3.bf16.msra.mxu0 %v7321_v24  ;;  %6207 = vmatprep.mubr.msk.f32.mxu0 %vm6835_vm0, %v6834_v0 }
0x4226   :  { %6432 = vmatprep.subr.bf16.mxu0 %v6837_v48 }
0x4229   :  { %6434 = vmatpush3.bf16.msra.mxu0 %v7331_v34 }
0x422a   :  { %6441 = vmatprep.subr.bf16.mxu0 %v6837_v48 }
0x42f7   :  { %v4163_v37 = vpop.f32.mrb[46].mxu0 }
0x42f8   :  { %v4167_v39 = vadd.f32 %v4163_v37, %v4092_v36  ;;  %v6187_v40 = vpop.f32.mrb[47].mxu0 }
0x42f9   :  { %v4444_v40 = vld [vmem:[#allocation4 + $0x16] sm:$0x3] }
0x42fa   :  { %6719 = vtanh.f32 %v4167_v39  ;;  %v5566_v42 = vmul.f32 -1.442695, %v4167_v39 }
0x42fc   :  { %6721 = vpow2.f32 %v5566_v42 }
0x4304   :  { %v6720_v41 = vpop.eup %6719 }
0x4305   :  { %4177 = vrot.lane.b32.xlu0 %v6720_v41, %s6833_s29 }
0x4306   :  { %v6722_v43 = vpop.eup %6721 }
0x4307   :  { %v4171_v44 = vadd.f32 1.0, %v6722_v43 }
0x4309   :  { %6723 = vrcp.f32 %v4171_v44 }
0x4313   :  { %v6724_v45 = vpop.eup %6723 }
0x4314   :  { %v4175_v47 = vmul.f32 %v6724_v45, %v4069_v21 }
0x4377   :  { %v4178_v46 = vpop.permute.xlu0 %4177 }
0x4378   :  { %v4180_v10 = vmul.f32 %v6724_v45, %v4178_v46 }
0x437a   :  { %4182 = vrot.lane.b32.xlu1 %v4180_v10, %s6839_s8 }
0x43ec   :  { %v4183_v49 = vpop.permute.xlu1 %4182 }
0x43ed   :  { %v4185_v50 = vadd.f32 %v4183_v49, %v4175_v47 }
0x43ef   :  { %6725 = vtanh.f32 %v4185_v50 }
0x43f9   :  { %v6726_v22 = vpop.eup %6725 }
0x43fa   :  { %4188 = vrot.lane.b32.xlu0 %v6726_v22, %s6833_s29 }
0x446c   :  { %v4189_v52 = vpop.permute.xlu0 %4188 }
0x446d   :  { %v7479_v55 = vmul.f32 %v6724_v45, %v4189_v52 }
0x446f   :  { %4211 = vrot.lane.b32.xlu1 %v7479_v55, %s6839_s8 }
0x44e1   :  { %v4212_v57 = vpop.permute.xlu1 %4211 }
0x44e2   :  { %6197 = vmatmul.mubr.msk.f32.vlgmr.msra.gmra.mrb[48].mxu1 %vm1274_vm4, %v4212_v57 }
0x44e3   :  { %6437 = vmatpush3.bf16.msra.mxu1 %v7321_v24  ;;  %6218 = vmatprep.mubr.msk.f32.mxu1 %vm6835_vm0, %v6834_v0 }
0x44e4   :  { %6438 = vmatprep.subr.bf16.mxu1 %v6837_v48 }
0x44e7   :  { %6440 = vmatpush3.bf16.msra.mxu1 %v7331_v34 }
0x44e8   :  { %6447 = vmatprep.subr.bf16.mxu1 %v6837_v48 }
0x45b5   :  { %v4281_v61 = vpop.f32.mrb[48].mxu1 }
0x45b6   :  { %v4285_v62 = vadd.f32 %v4281_v61, %v4210_v60  ;;  %v6198_v63 = vpop.f32.mrb[49].mxu1 }
0x45b8   :  { %6727 = vtanh.f32 %v4285_v62  ;;  %v5569_v2 = vmul.f32 -1.442695, %v4285_v62 }
0x45ba   :  { %6729 = vpow2.f32 %v5569_v2 }
0x45c2   :  { %v6728_v1 = vpop.eup %6727 }
0x45c3   :  { %4295 = vrot.lane.b32.xlu0 %v6728_v1, %s6833_s29  ;;  %v4560_v1 = vld [vmem:[#allocation4 + $0x18] sm:$0x3] }
0x45c4   :  { %v6730_v3 = vpop.eup %6729 }
0x45c5   :  { %v4289_v4 = vadd.f32 1.0, %v6730_v3 }
0x45c7   :  { %6731 = vrcp.f32 %v4289_v4 }
0x45d1   :  { %v6732_v5 = vpop.eup %6731 }
0x45d2   :  { %v4293_v8 = vmul.f32 %v6732_v5, %v4185_v50 }
0x4635   :  { %v4296_v6 = vpop.permute.xlu0 %4295 }
0x4636   :  { %v4298_v7 = vmul.f32 %v6732_v5, %v4296_v6 }
0x4638   :  { %4300 = vrot.lane.b32.xlu1 %v4298_v7, %s6839_s8 }
0x46aa   :  { %v4301_v53 = vpop.permute.xlu1 %4300 }
0x46ab   :  { %v4303_v54 = vadd.f32 %v4301_v53, %v4293_v8 }
0x46ad   :  { %6733 = vtanh.f32 %v4303_v54 }
0x46b7   :  { %v6734_v56 = vpop.eup %6733 }
0x46b8   :  { %4306 = vrot.lane.b32.xlu0 %v6734_v56, %s6833_s29 }
0x472a   :  { %v4307_v13 = vpop.permute.xlu0 %4306 }
0x472b   :  { %v7493_v15 = vmul.f32 %v6732_v5, %v4307_v13 }
0x472d   :  { %4327 = vrot.lane.b32.xlu1 %v7493_v15, %s6839_s8 }
0x479f   :  { %v4328_v16 = vpop.permute.xlu1 %4327 }
0x47a0   :  { %6208 = vmatmul.mubr.msk.f32.vlgmr.msra.gmra.mrb[48].mxu0 %vm1274_vm4, %v4328_v16 }
0x47a1   :  { %6443 = vmatpush3.bf16.msra.mxu0 %v7321_v24  ;;  %6229 = vmatprep.mubr.msk.f32.mxu0 %vm6835_vm0, %v6834_v0 }
0x47a2   :  { %6444 = vmatprep.subr.bf16.mxu0 %v6837_v48 }
0x47a5   :  { %6446 = vmatpush3.bf16.msra.mxu0 %v7331_v34 }
0x47a6   :  { %6453 = vmatprep.subr.bf16.mxu0 %v6837_v48 }
0x4873   :  { %v4397_v18 = vpop.f32.mrb[48].mxu0 }
0x4874   :  { %v4401_v19 = vadd.f32 %v4397_v18, %v4326_v17  ;;  %v6209_v20 = vpop.f32.mrb[49].mxu0 }
0x4876   :  { %6735 = vtanh.f32 %v4401_v19  ;;  %v5572_v27 = vmul.f32 -1.442695, %v4401_v19 }
0x4878   :  { %6737 = vpow2.f32 %v5572_v27  ;;  %v4678_v27 = vld [vmem:[#allocation4 + $0x1a] sm:$0x3] }
0x4880   :  { %v6736_v26 = vpop.eup %6735 }
0x4881   :  { %4411 = vrot.lane.b32.xlu0 %v6736_v26, %s6833_s29 }
0x4882   :  { %v6738_v28 = vpop.eup %6737 }
0x4883   :  { %v4405_v29 = vadd.f32 1.0, %v6738_v28 }
0x4885   :  { %6739 = vrcp.f32 %v4405_v29 }
0x488f   :  { %v6740_v30 = vpop.eup %6739 }
0x4890   :  { %v4409_v21 = vmul.f32 %v6740_v30, %v4303_v54 }
0x48f3   :  { %v4412_v31 = vpop.permute.xlu0 %4411 }
0x48f4   :  { %v4414_v32 = vmul.f32 %v6740_v30, %v4412_v31 }
0x48f6   :  { %4416 = vrot.lane.b32.xlu1 %v4414_v32, %s6839_s8 }
0x4968   :  { %v4417_v23 = vpop.permute.xlu1 %4416 }
0x4969   :  { %v4419_v25 = vadd.f32 %v4417_v23, %v4409_v21 }
0x496b   :  { %6741 = vtanh.f32 %v4419_v25 }
0x4975   :  { %v6742_v35 = vpop.eup %6741 }
0x4976   :  { %4422 = vrot.lane.b32.xlu0 %v6742_v35, %s6833_s29 }
0x49e8   :  { %v4423_v36 = vpop.permute.xlu0 %4422 }
0x49e9   :  { %v7507_v37 = vmul.f32 %v6740_v30, %v4423_v36 }
0x49eb   :  { %4445 = vrot.lane.b32.xlu1 %v7507_v37, %s6839_s8 }
0x4a5d   :  { %v4446_v39 = vpop.permute.xlu1 %4445 }
0x4a5e   :  { %6219 = vmatmul.mubr.msk.f32.vlgmr.msra.gmra.mrb[50].mxu1 %vm1274_vm4, %v4446_v39 }
0x4a5f   :  { %6449 = vmatpush3.bf16.msra.mxu1 %v7321_v24  ;;  %6240 = vmatprep.mubr.msk.f32.mxu1 %vm6835_vm0, %v6834_v0 }
0x4a60   :  { %6450 = vmatprep.subr.bf16.mxu1 %v6837_v48 }
0x4a63   :  { %6452 = vmatpush3.bf16.msra.mxu1 %v7331_v34 }
0x4a64   :  { %6459 = vmatprep.subr.bf16.mxu1 %v6837_v48 }
0x4b31   :  { %v4515_v41 = vpop.f32.mrb[50].mxu1 }
0x4b32   :  { %v4519_v42 = vadd.f32 %v4515_v41, %v4444_v40  ;;  %v6220_v43 = vpop.f32.mrb[51].mxu1 }
0x4b34   :  { %6743 = vtanh.f32 %v4519_v42  ;;  %v5575_v45 = vmul.f32 -1.442695, %v4519_v42  ;;  %v4794_v42 = vld [vmem:[#allocation4 + $0x1c] sm:$0x3] }
0x4b36   :  { %6745 = vpow2.f32 %v5575_v45 }
0x4b3e   :  { %v6744_v44 = vpop.eup %6743 }
0x4b3f   :  { %4529 = vrot.lane.b32.xlu0 %v6744_v44, %s6833_s29 }
0x4b40   :  { %v6746_v46 = vpop.eup %6745 }
0x4b41   :  { %v4523_v10 = vadd.f32 1.0, %v6746_v46 }
0x4b43   :  { %6747 = vrcp.f32 %v4523_v10 }
0x4b4d   :  { %v6748_v47 = vpop.eup %6747 }
0x4b4e   :  { %v4527_v22 = vmul.f32 %v6748_v47, %v4419_v25 }
0x4bb1   :  { %v4530_v49 = vpop.permute.xlu0 %4529 }
0x4bb2   :  { %v4532_v50 = vmul.f32 %v6748_v47, %v4530_v49 }
0x4bb4   :  { %4534 = vrot.lane.b32.xlu1 %v4532_v50, %s6839_s8 }
0x4c26   :  { %v4535_v52 = vpop.permute.xlu1 %4534 }
0x4c27   :  { %v4537_v57 = vadd.f32 %v4535_v52, %v4527_v22 }
0x4c29   :  { %6749 = vtanh.f32 %v4537_v57 }
0x4c33   :  { %v6750_v60 = vpop.eup %6749 }
0x4c34   :  { %4540 = vrot.lane.b32.xlu0 %v6750_v60, %s6833_s29 }
0x4ca6   :  { %v4541_v61 = vpop.permute.xlu0 %4540 }
0x4ca7   :  { %v7521_v62 = vmul.f32 %v6748_v47, %v4541_v61 }
0x4ca9   :  { %4561 = vrot.lane.b32.xlu1 %v7521_v62, %s6839_s8 }
0x4d1b   :  { %v4562_v63 = vpop.permute.xlu1 %4561 }
0x4d1c   :  { %6230 = vmatmul.mubr.msk.f32.vlgmr.msra.gmra.mrb[50].mxu0 %vm1274_vm4, %v4562_v63 }
0x4d1d   :  { %6455 = vmatpush3.bf16.msra.mxu0 %v7321_v24  ;;  %6251 = vmatprep.mubr.msk.f32.mxu0 %vm6835_vm0, %v6834_v0 }
0x4d1e   :  { %6456 = vmatprep.subr.bf16.mxu0 %v6837_v48 }
0x4d21   :  { %6458 = vmatpush3.bf16.msra.mxu0 %v7331_v34 }
0x4def   :  { %v4631_v2 = vpop.f32.mrb[50].mxu0 }
0x4df0   :  { %v4635_v3 = vadd.f32 %v4631_v2, %v4560_v1  ;;  %v6231_v4 = vpop.f32.mrb[51].mxu0 }
0x4df1   :  { %v4912_v4 = vld [vmem:[#allocation4 + $0x1e] sm:$0x3] }
0x4df2   :  { %6751 = vtanh.f32 %v4635_v3  ;;  %v5578_v6 = vmul.f32 -1.442695, %v4635_v3 }
0x4df4   :  { %6753 = vpow2.f32 %v5578_v6 }
0x4dfc   :  { %v6752_v5 = vpop.eup %6751 }
0x4dfd   :  { %4645 = vrot.lane.b32.xlu0 %v6752_v5, %s6833_s29 }
0x4dfe   :  { %v6754_v7 = vpop.eup %6753 }
0x4dff   :  { %v4639_v8 = vadd.f32 1.0, %v6754_v7 }
0x4e01   :  { %6755 = vrcp.f32 %v4639_v8 }
0x4e0b   :  { %v6756_v53 = vpop.eup %6755 }
0x4e0c   :  { %v4643_v13 = vmul.f32 %v6756_v53, %v4537_v57 }
0x4e6f   :  { %v4646_v54 = vpop.permute.xlu0 %4645 }
0x4e70   :  { %v4648_v56 = vmul.f32 %v6756_v53, %v4646_v54 }
0x4e72   :  { %4650 = vrot.lane.b32.xlu1 %v4648_v56, %s6839_s8 }
0x4ee4   :  { %v4651_v16 = vpop.permute.xlu1 %4650 }
0x4ee5   :  { %v4653_v17 = vadd.f32 %v4651_v16, %v4643_v13 }
0x4ee7   :  { %6757 = vtanh.f32 %v4653_v17 }
0x4ef1   :  { %v6758_v18 = vpop.eup %6757 }
0x4ef2   :  { %4656 = vrot.lane.b32.xlu0 %v6758_v18, %s6833_s29  ;;  %v3259_v18 = vrot.slane %v7361_v11, %v7094_v9 }
0x4f64   :  { %v4657_v19 = vpop.permute.xlu0 %4656 }
0x4f65   :  { %v7534_v20 = vmul.f32 %v6756_v53, %v4657_v19  ;;  %v3731_v19 = vrot.slane %v7423_v33, %v7094_v9 }
0x4f67   :  { %4679 = vrot.lane.b32.xlu1 %v7534_v20, %s6839_s8  ;;  %v5555_v11 = vrot.slane %v3731_v19, 9 }
0x4fd9   :  { %v4680_v26 = vpop.permute.xlu1 %4679 }
0x4fda   :  { %6241 = vmatmul.mubr.msk.f32.vlgmr.msra.gmra.mrb[52].mxu1 %vm1274_vm4, %v4680_v26  ;;  %v4199_v26 = vrot.slane %v7479_v55, %v7094_v9  ;;  %v3379_v55 = vrot.slane %v7381_v38, %v7094_v9 }
0x4fdb   :  { %6461 = vmatpush3.bf16.msra.mxu1 %v7321_v24  ;;  %6262 = vmatprep.mubr.msk.f32.mxu1 %vm6835_vm0, %v6834_v0 }
0x4fdc   :  { %6462 = vmatprep.subr.bf16.mxu1 %v6837_v48 }
0x4fdf   :  { %6464 = vmatpush3.bf16.msra.mxu1 %v7331_v34 }
0x50ad   :  { %v4749_v28 = vpop.f32.mrb[52].mxu1 }
0x50ae   :  { %v4753_v29 = vadd.f32 %v4749_v28, %v4678_v27  ;;  %v6242_v30 = vpop.f32.mrb[53].mxu1  ;;  %v4667_v27 = vrot.slane %v7534_v20, %v7094_v9  ;;  %v5543_v28 = vrot.slane %v3259_v18, 9  ;;  %v3849_v20 = vrot.slane %v7437_v51, %v7094_v9 }
0x50af   :  { %v4317_v30 = vrot.slane %v7493_v15, %v7094_v9 }
0x50b0   :  { %6759 = vtanh.f32 %v4753_v29  ;;  %v5581_v32 = vmul.f32 -1.442695, %v4753_v29  ;;  %v5567_v29 = vrot.slane %v4199_v26, 9  ;;  %v5579_v33 = vrot.slane %v4667_v27, 9 }
0x50b2   :  { %6761 = vpow2.f32 %v5581_v32 }
0x50ba   :  { %v6760_v31 = vpop.eup %6759 }
0x50bb   :  { %4763 = vrot.lane.b32.xlu0 %v6760_v31, %s6833_s29 }
0x50bc   :  { %v6762_v21 = vpop.eup %6761 }
0x50bd   :  { %v4757_v23 = vadd.f32 1.0, %v6762_v21 }
0x50bf   :  { %6763 = vrcp.f32 %v4757_v23 }
0x50c9   :  { %v6764_v24 = vpop.eup %6763 }
0x50ca   :  { %v4761_v48 = vmul.f32 %v6764_v24, %v4653_v17 }
0x512d   :  { %v4764_v25 = vpop.permute.xlu0 %4763 }
0x512e   :  { %v4766_v0 = vmul.f32 %v6764_v24, %v4764_v25  ;;  %v3497_v25 = vrot.slane %v7395_v58, %v7094_v9 }
0x5130   :  { %4768 = vrot.lane.b32.xlu1 %v4766_v0, %s6839_s8 }
0x51a2   :  { %v4769_v34 = vpop.permute.xlu1 %4768 }
0x51a3   :  { %v4771_v35 = vadd.f32 %v4769_v34, %v4761_v48  ;;  %v3965_v48 = vrot.slane %v7451_v59, %v7094_v9 }
0x51a5   :  { %6765 = vtanh.f32 %v4771_v35 }
0x51af   :  { %v6766_v36 = vpop.eup %6765 }
0x51b0   :  { %4774 = vrot.lane.b32.xlu0 %v6766_v36, %s6833_s29 }
0x5222   :  { %v4775_v39 = vpop.permute.xlu0 %4774 }
0x5223   :  { %v7547_v40 = vmul.f32 %v6764_v24, %v4775_v39 }
0x5225   :  { %4795 = vrot.lane.b32.xlu1 %v7547_v40, %s6839_s8  ;;  %v7592_v31 = vrot.slane %v7547_v40, %v7094_v9  ;;  %v5549_v40 = vrot.slane %v3497_v25, 9 }
0x5297   :  { %v4796_v41 = vpop.permute.xlu1 %4795 }
0x5298   :  { %6252 = vmatmul.mubr.msk.f32.vlgmr.msra.gmra.mrb[52].mxu0 %vm1274_vm4, %v4796_v41 }
0x536b   :  { %v4865_v43 = vpop.f32.mrb[52].mxu0 }
0x536c   :  { %v4869_v44 = vadd.f32 %v4865_v43, %v4794_v42  ;;  %v6253_v45 = vpop.f32.mrb[53].mxu0  ;;  %v5561_v42 = vrot.slane %v3965_v48, 9  ;;  %v5558_v43 = vrot.slane %v3849_v20, 9 }
0x536e   :  { %6767 = vtanh.f32 %v4869_v44  ;;  %v5584_v10 = vmul.f32 -1.442695, %v4869_v44 }
0x5370   :  { %6769 = vpow2.f32 %v5584_v10 }
0x5378   :  { %v6768_v46 = vpop.eup %6767 }
0x5379   :  { %4879 = vrot.lane.b32.xlu0 %v6768_v46, %s6833_s29  ;;  %v5570_v46 = vrot.slane %v4317_v30, 9 }
0x537a   :  { %v6770_v47 = vpop.eup %6769 }
0x537b   :  { %v4873_v49 = vadd.f32 1.0, %v6770_v47 }
0x537d   :  { %6771 = vrcp.f32 %v4873_v49  ;;  %v6492_v49 = vld [vmem:[%s7798_s13 + $0x40] sm:$0xff]  }
0x537e   :  { %5810 = vmatprep.subr.bf16.mxu0 %v6492_v49 }
0x5387   :  { %v6772_v50 = vpop.eup %6771 }
0x5388   :  { %v4877_v57 = vmul.f32 %v6772_v50, %v4771_v35  ;;  %v4433_v35 = vrot.slane %v7507_v37, %v7094_v9  ;;  %v5546_v37 = vrot.slane %v3379_v55, 9 }
0x538a   :  { %v5573_v45 = vrot.slane %v4433_v35, 9 }
0x53eb   :  { %v4880_v22 = vpop.permute.xlu0 %4879 }
0x53ec   :  { %v4882_v52 = vmul.f32 %v6772_v50, %v4880_v22  ;;  %v6494_v22 = vld [vmem:[%s7798_s13 + $0xc0] sm:$0xff]  }
0x53ed   :  { %5832 = vmatprep.subr.bf16.mxu1 %v6494_v22 }
0x53ee   :  { %4884 = vrot.lane.b32.xlu1 %v4882_v52, %s6839_s8  ;;  %v6495_v52 = vld [vmem:[%s7798_s13 + $0x80] sm:$0xff]  }
0x5460   :  { %v4885_v60 = vpop.permute.xlu1 %4884 }
0x5461   :  { %v4887_v61 = vadd.f32 %v4885_v60, %v4877_v57  ;;  %v6496_v57 = vld [vmem:[%s7798_s13 + $0x48] sm:$0xff]   ;;  %v7645_v60 = vrot.slane %v7409_v14, %v7094_v9 }
0x5462   :  { %v6499_v14 = vld [vmem:[%s7798_s13 + $0x88] sm:$0xff]  }
0x5463   :  { %6773 = vtanh.f32 %v4887_v61 }
0x546d   :  { %v6774_v63 = vpop.eup %6773 }
0x546e   :  { %4890 = vrot.lane.b32.xlu0 %v6774_v63, %s6833_s29 }
0x54e0   :  { %v4891_v1 = vpop.permute.xlu0 %4890 }
0x54e1   :  { %v7555_v2 = vmul.f32 %v6772_v50, %v4891_v1  ;;  %v6493_v50 = vld [vmem:[%s7798_s13] sm:$0xff]   ;;  %v6498_v1 = vld [vmem:[%s7798_s13 + $0xc8] sm:$0xff]  }
0x54e2   :  { %5811 = vmatpush3.bf16.msra.mxu0 %v6493_v50 }
0x54e3   :  { %4913 = vrot.lane.b32.xlu1 %v7555_v2, %s6839_s8  ;;  %v4901_v58 = vrot.slane %v7555_v2, %v7094_v9  ;;  %v6497_v2 = vld [vmem:[%s7798_s13 + $0x8] sm:$0xff]   ;;  %5812 = vmatprep.subr.bf16.mxu0 %v6496_v57  ;;  %v5589_v57 = vld [vmem:[%s7799_s14] ss:$0 sm:$0xff] }
0x54e5   :  { %v5585_v47 = vrot.slane %v4901_v58, 9 }
0x54e6   :  { %5813 = vmatpush3.bf16.msra.mxu0 %v6497_v2 }
0x5555   :  { %v4914_v3 = vpop.permute.xlu1 %4913 }
0x5556   :  { %6263 = vmatmul.mubr.msk.f32.vlgmr.msra.gmra.mrb[54].mxu1 %vm1274_vm4, %v4914_v3  ;;  %v6500_v3 = vld [vmem:[%s7798_s13 + $0x50] sm:$0xff]  }
0x5557   :  { %5833 = vmatpush3.bf16.msra.mxu1 %v6495_v52  ;;  %5814 = vmatprep.subr.bf16.mxu0 %v6500_v3 }
0x5558   :  { %5834 = vmatprep.subr.bf16.mxu1 %v6498_v1 }
0x555b   :  { %5835 = vmatpush3.bf16.msra.mxu1 %v6499_v14 }
0x5629   :  { %v4983_v5 = vpop.f32.mrb[54].mxu1 }
0x562a   :  { %v4987_v6 = vadd.f32 %v4983_v5, %v4912_v4  ;;  %v6264_v7 = vpop.f32.mrb[55].mxu1  ;;  %v6502_v4 = vld [vmem:[%s7798_s13 + $0xd0] sm:$0xff]   ;;  %v7669_v5 = vrot.slane %v7465_v12, %v7094_v9  ;;  %v6506_v12 = vld [vmem:[%s7798_s13 + $0xd8] sm:$0xff]  }
0x562b   :  { %v6503_v7 = vld [vmem:[%s7798_s13 + $0x90] sm:$0xff]   ;;  %5836 = vmatprep.subr.bf16.mxu1 %v6502_v4 }
0x562c   :  { %6775 = vtanh.f32 %v4987_v6  ;;  %v5587_v53 = vmul.f32 -1.442695, %v4987_v6  ;;  %v6501_v6 = vld [vmem:[%s7798_s13 + $0x10] sm:$0xff]   ;;  %5837 = vmatpush3.bf16.msra.mxu1 %v6503_v7 }
0x562d   :  { %5815 = vmatpush3.bf16.msra.mxu0 %v6501_v6  ;;  %5838 = vmatprep.subr.bf16.mxu1 %v6506_v12 }
0x562e   :  { %6777 = vpow2.f32 %v5587_v53  ;;  %v7687_v53 = vrot.slane %v7521_v62, %v7094_v9  ;;  %v6508_v62 = vld [vmem:[%s7798_s13 + $0x60] sm:$0xff]  }
0x5636   :  { %v6776_v8 = vpop.eup %6775 }
0x5637   :  { %4997 = vrot.lane.b32.xlu0 %v6776_v8, %s6833_s29  ;;  %v6504_v8 = vld [vmem:[%s7798_s13 + $0x58] sm:$0xff]  }
0x5638   :  { %v6778_v54 = vpop.eup %6777  ;;  %5816 = vmatprep.subr.bf16.mxu0 %v6504_v8 }
0x5639   :  { %v4991_v56 = vadd.f32 1.0, %v6778_v54  ;;  %v6505_v54 = vld [vmem:[%s7798_s13 + $0x18] sm:$0xff]  }
0x563a   :  { %5817 = vmatpush3.bf16.msra.mxu0 %v6505_v54 }
0x563b   :  { %6779 = vrcp.f32 %v4991_v56  ;;  %v6507_v56 = vld [vmem:[%s7798_s13 + $0x98] sm:$0xff]   ;;  %5818 = vmatprep.subr.bf16.mxu0 %v6508_v62 }
0x563c   :  { %5839 = vmatpush3.bf16.msra.mxu1 %v6507_v56 }
0x5645   :  { %v7561_v13 = vpop.eup %6779 }
0x5646   :  { %v4995_v38 = vmul.f32 %v7561_v13, %v4887_v61  ;;  %v5582_v61 = vrot.slane %v7592_v31, 9 }
0x56a9   :  { %v4998_v16 = vpop.permute.xlu0 %4997 }
0x56aa   :  { %v5000_v17 = vmul.f32 %v7561_v13, %v4998_v16  ;;  %v6509_v16 = vld [vmem:[%s7798_s13 + $0x20] sm:$0xff]  }
0x56ab   :  { %5819 = vmatpush3.bf16.msra.mxu0 %v6509_v16 }
0x56ac   :  { %5002 = vrot.lane.b32.xlu1 %v5000_v17, %s6839_s8  ;;  %v6510_v17 = vld [vmem:[%s7798_s13 + $0xe0] sm:$0xff]  }
0x56ad   :  { %5840 = vmatprep.subr.bf16.mxu1 %v6510_v17 }
0x56b0   :  { %3260 = vrot.lane.b32.xlu1 %v3259_v18, %s6839_s8  ;;  %v6511_v18 = vld [vmem:[%s7798_s13 + $0xa0] sm:$0xff]  }
0x56b1   :  { %5841 = vmatpush3.bf16.msra.mxu1 %v6511_v18 }
0x56b4   :  { %3732 = vrot.lane.b32.xlu1 %v3731_v19, %s6839_s8  ;;  %v6512_v19 = vld [vmem:[%s7798_s13 + $0x68] sm:$0xff]  }
0x56b5   :  { %5820 = vmatprep.subr.bf16.mxu0 %v6512_v19 }
0x56b8   :  { %4200 = vrot.lane.b32.xlu1 %v4199_v26, %s6839_s8  ;;  %v6514_v26 = vld [vmem:[%s7798_s13 + $0xe8] sm:$0xff]  }
0x56b9   :  { %5842 = vmatprep.subr.bf16.mxu1 %v6514_v26 }
0x56bc   :  { %4668 = vrot.lane.b32.xlu1 %v4667_v27, %s6839_s8  ;;  %v6513_v27 = vld [vmem:[%s7798_s13 + $0x28] sm:$0xff]  }
0x56bd   :  { %5821 = vmatpush3.bf16.msra.mxu0 %v6513_v27 }
0x56c0   :  { %3267 = vrot.lane.b32.xlu1 %v5543_v28, %s6833_s29  ;;  %v6515_v28 = vld [vmem:[%s7798_s13 + $0xa8] sm:$0xff]  }
0x56c1   :  { %5843 = vmatpush3.bf16.msra.mxu1 %v6515_v28 }
0x56c4   :  { %3738 = vrot.lane.b32.xlu1 %v5555_v11, %s6833_s29  ;;  %v6516_v11 = vld [vmem:[%s7798_s13 + $0x70] sm:$0xff]  }
0x56c5   :  { %5822 = vmatprep.subr.bf16.mxu0 %v6516_v11 }
0x56c8   :  { %4206 = vrot.lane.b32.xlu1 %v5567_v29, %s6833_s29  ;;  %v6518_v29 = vld [vmem:[%s7798_s13 + $0xf0] sm:$0xff]  }
0x56c9   :  { %5844 = vmatprep.subr.bf16.mxu1 %v6518_v29 }
0x56cc   :  { %4674 = vrot.lane.b32.xlu1 %v5579_v33, %s6833_s29 }
0x56d0   :  { %3380 = vrot.lane.b32.xlu1 %v3379_v55, %s6840_s12  ;;  %v6517_v55 = vld [vmem:[%s7798_s13 + $0x30] sm:$0xff]  }
0x56d1   :  { %5823 = vmatpush3.bf16.msra.mxu0 %v6517_v55 }
0x56d4   :  { %3850 = vrot.lane.b32.xlu1 %v3849_v20, %s6840_s12  ;;  %v6519_v20 = vld [vmem:[%s7798_s13 + $0xb0] sm:$0xff]  }
0x56d5   :  { %5845 = vmatpush3.bf16.msra.mxu1 %v6519_v20 }
0x56d8   :  { %4318 = vrot.lane.b32.xlu1 %v4317_v30, %s6840_s12 }
0x56dc   :  { %4786 = vrot.lane.b32.xlu1 %v7592_v31, %s6840_s12  ;;  %v6520_v31 = vld [vmem:[%s7798_s13 + $0x78] sm:$0xff]  }
0x56dd   :  { %5824 = vmatprep.subr.bf16.mxu0 %v6520_v31 }
0x571e   :  { %v5003_v32 = vpop.permute.xlu1 %5002 }
0x571f   :  { %v5005_v21 = vadd.f32 %v5003_v32, %v4995_v38  ;;  %v6522_v38 = vld [vmem:[%s7798_s13 + $0xf8] sm:$0xff]  }
0x5720   :  { %5846 = vmatprep.subr.bf16.mxu1 %v6522_v38 }
0x5721   :  { %6781 = vtanh.f32 %v5005_v21 }
0x5722   :  { %v3261_v51 = vpop.permute.xlu1 %3260 }
0x5723   :  { %3264 = vst.msk [vmem:[#allocation5] sm:$0x1] %vm3263_vm5, %v3261_v51  ;;  %v6521_v51 = vld [vmem:[%s7798_s13 + $0x38] sm:$0xff]  }
0x5724   :  { %5825 = vmatpush3.bf16.msra.mxu0 %v6521_v51 }
0x5726   :  { %v3733_v23 = vpop.permute.xlu1 %3732 }
0x5727   :  { %3735 = vst.msk [vmem:[#allocation5 + $0x4] sm:$0x1] %vm3263_vm5, %v3733_v23 }
0x572a   :  { %v4201_v15 = vpop.permute.xlu1 %4200 }
0x572b   :  { %v6782_v24 = vpop.eup %6781  ;;  %4203 = vst.msk [vmem:[#allocation5 + $0x1] sm:$0x1] %vm3263_vm5, %v4201_v15 }
0x572c   :  { %5008 = vrot.lane.b32.xlu0 %v6782_v24, %s6833_s29 }
0x572e   :  { %v4669_v0 = vpop.permute.xlu1 %4668 }
0x572f   :  { %4671 = vst.msk [vmem:[#allocation5 + $0x5] sm:$0x1] %vm3263_vm5, %v4669_v0 }
0x5730   :  { %3498 = vrot.lane.b32.xlu0 %v3497_v25, %s6839_s8 }
0x5732   :  { %v3268_v34 = vpop.permute.xlu1 %3267 }
0x5733   :  { %3271 = vst.msk [vmem:[#allocation5] sm:$0x1] %vm3270_vm6, %v3268_v34 }
0x5734   :  { %3966 = vrot.lane.b32.xlu0 %v3965_v48, %s6839_s8 }
0x5736   :  { %v3739_v36 = vpop.permute.xlu1 %3738 }
0x5737   :  { %3741 = vst.msk [vmem:[#allocation5 + $0x4] sm:$0x1] %vm3270_vm6, %v3739_v36 }
0x5738   :  { %4434 = vrot.lane.b32.xlu0 %v4433_v35, %s6839_s8  ;;  %v5552_v35 = vrot.slane %v7645_v60, 9 }
0x573a   :  { %v4207_v39 = vpop.permute.xlu1 %4206 }
0x573b   :  { %4209 = vst.msk [vmem:[#allocation5 + $0x1] sm:$0x1] %vm3270_vm6, %v4207_v39 }
0x573c   :  { %4902 = vrot.lane.b32.xlu0 %v4901_v58, %s6839_s8  ;;  %v5564_v58 = vrot.slane %v7669_v5, 9 }
0x573e   :  { %v4675_v59 = vpop.permute.xlu1 %4674 }
0x573f   :  { %4677 = vst.msk [vmem:[#allocation5 + $0x5] sm:$0x1] %vm3270_vm6, %v4675_v59  ;;  %v5576_v59 = vrot.slane %v7687_v53, 9 }
0x5740   :  { %3504 = vrot.lane.b32.xlu0 %v5549_v40, %s6833_s29 }
0x5742   :  { %v3381_v41 = vpop.permute.xlu1 %3380 }
0x5743   :  { %3384 = vst.msk [vmem:[#allocation5] sm:$0x1] %vm3383_vm7, %v3381_v41 }
0x5744   :  { %3389 = vst.msk [vmem:[#allocation5] sm:$0x1] %vm3388_vm8, %v5546_v37  ;;  %3972 = vrot.lane.b32.xlu0 %v5561_v42, %s6833_s29 }
0x5746   :  { %v3851_v44 = vpop.permute.xlu1 %3850 }
0x5747   :  { %3853 = vst.msk [vmem:[#allocation5 + $0x4] sm:$0x1] %vm3383_vm7, %v3851_v44 }
0x5748   :  { %3857 = vst.msk [vmem:[#allocation5 + $0x4] sm:$0x1] %vm3388_vm8, %v5558_v43  ;;  %4440 = vrot.lane.b32.xlu0 %v5573_v45, %s6833_s29 }
0x574a   :  { %v4319_v10 = vpop.permute.xlu1 %4318 }
0x574b   :  { %4321 = vst.msk [vmem:[#allocation5 + $0x1] sm:$0x1] %vm3383_vm7, %v4319_v10 }
0x574c   :  { %4325 = vst.msk [vmem:[#allocation5 + $0x1] sm:$0x1] %vm3388_vm8, %v5570_v46  ;;  %4908 = vrot.lane.b32.xlu0 %v5585_v47, %s6833_s29  ;;  %s6841_s29 = smov [#allocation9]  }
0x574d   :  { %s5405_s30 = sshll.u32 %s6841_s29, 4  ;;  %s5406_s30 = int_to_ptr.vmem [resolvable:$true] %s5405_s30 }
0x574e   :  { %v4787_v63 = vpop.permute.xlu1 %4786  ;;  %s6805_s16 = scalar_lea.vmem %s5406_s30, 32  ;;  %p6810_p9 = scmp.lt.s32.totalorder %s5406_s30, %s5406_s30 }
0x574f   :  { %4789 = vst.msk [vmem:[#allocation5 + $0x5] sm:$0x1] %vm3383_vm7, %v4787_v63  ;;  %p6806_p8 = scmp.ne.s32.totalorder %s5406_s30, %s6805_s16  ;;  %p6811_p10 = scmp.lt.s32.totalorder %s6805_s16, %s6805_s16 }
0x5750   :  { %4793 = vst.msk [vmem:[#allocation5 + $0x5] sm:$0x1] %vm3388_vm8, %v5582_v61  ;;  %3616 = vrot.lane.b32.xlu0 %v7645_v60, %s6840_s12 }
0x5751   :  { %p6812_p11 = por %p6811_p10, %p6810_p9 }
0x5753   :  { %p6813_p12 = pnand %p6812_p11, %p6806_p8 }
0x5754   :  { %4084 = vrot.lane.b32.xlu0 %v7669_v5, %s6840_s12 }
0x5758   :  { %4552 = vrot.lane.b32.xlu0 %v7687_v53, %s6840_s12 }
0x579e   :  { %v5009_v33 = vpop.permute.xlu0 %5008 }
0x579f   :  { %v5011_v30 = vmul.f32 %v7561_v13, %v5009_v33  ;;  %v6523_v13 = vld [vmem:[%s7798_s13 + $0xb8] sm:$0xff]  }
0x57a0   :  { %5847 = vmatpush3.bf16.msra.mxu1 %v6523_v13 }
0x57a1   :  { %v5019_v32 = vrot.slane %v5011_v30, %v7094_v9 }
0x57a2   :  { %v3499_v21 = vpop.permute.xlu0 %3498 }
0x57a3   :  { %3501 = vst.msk [vmem:[#allocation5 + $0x2] sm:$0x1] %vm3263_vm5, %v3499_v21  ;;  %5020 = vrot.lane.b32.xlu0 %v5019_v32, %s6840_s12  ;;  %v5588_v37 = vrot.slane %v5019_v32, 9 }
0x57a6   :  { %v3967_v23 = vpop.permute.xlu0 %3966 }
0x57a7   :  { %3969 = vst.msk [vmem:[#allocation5 + $0x6] sm:$0x1] %vm3263_vm5, %v3967_v23 }
0x57aa   :  { %v4435_v15 = vpop.permute.xlu0 %4434 }
0x57ab   :  { %4437 = vst.msk [vmem:[#allocation5 + $0x3] sm:$0x1] %vm3263_vm5, %v4435_v15 }
0x57ae   :  { %v4903_v24 = vpop.permute.xlu0 %4902 }
0x57af   :  { %4905 = vst.msk [vmem:[#allocation5 + $0x7] sm:$0x1] %vm3263_vm5, %v4903_v24 }
0x57b2   :  { %v3505_v25 = vpop.permute.xlu0 %3504 }
0x57b3   :  { %3507 = vst.msk [vmem:[#allocation5 + $0x2] sm:$0x1] %vm3270_vm6, %v3505_v25 }
0x57b6   :  { %v3973_v0 = vpop.permute.xlu0 %3972 }
0x57b7   :  { %3975 = vst.msk [vmem:[#allocation5 + $0x6] sm:$0x1] %vm3270_vm6, %v3973_v0 }
0x57ba   :  { %v4441_v48 = vpop.permute.xlu0 %4440 }
0x57bb   :  { %4443 = vst.msk [vmem:[#allocation5 + $0x3] sm:$0x1] %vm3270_vm6, %v4441_v48 }
0x57be   :  { %v4909_v34 = vpop.permute.xlu0 %4908 }
0x57bf   :  { %4911 = vst.msk [vmem:[#allocation5 + $0x7] sm:$0x1] %vm3270_vm6, %v4909_v34 }
0x57c2   :  { %v3617_v36 = vpop.permute.xlu0 %3616 }
0x57c3   :  { %3619 = vst.msk [vmem:[#allocation5 + $0x2] sm:$0x1] %vm3383_vm7, %v3617_v36 }
0x57c4   :  { %3623 = vst.msk [vmem:[#allocation5 + $0x2] sm:$0x1] %vm3388_vm8, %v5552_v35 }
0x57c6   :  { %v4085_v39 = vpop.permute.xlu0 %4084 }
0x57c7   :  { %4087 = vst.msk [vmem:[#allocation5 + $0x6] sm:$0x1] %vm3383_vm7, %v4085_v39 }
0x57c8   :  { %4091 = vst.msk [vmem:[#allocation5 + $0x6] sm:$0x1] %vm3388_vm8, %v5564_v58 }
0x57ca   :  { %v4553_v40 = vpop.permute.xlu0 %4552 }
0x57cb   :  { %4555 = vst.msk [vmem:[#allocation5 + $0x3] sm:$0x1] %vm3383_vm7, %v4553_v40 }
0x57cc   :  { %4559 = vst.msk [vmem:[#allocation5 + $0x3] sm:$0x1] %vm3388_vm8, %v5576_v59 }
0x5815   :  { %v5021_v41 = vpop.permute.xlu0 %5020 }
0x5816   :  { %5023 = vst.msk [vmem:[#allocation5 + $0x7] sm:$0x1] %vm3383_vm7, %v5021_v41 }
0x5817   :  { %5027 = vst.msk [vmem:[#allocation5 + $0x7] sm:$0x1] %vm3388_vm8, %v5588_v37 }
0x581e   :  { %v5092_v42 = vld [vmem:[#allocation5] sm:$0xff] }
0x581f   :  { %v5101_v43 = vrot.slane %v5092_v42, %v7094_v9  ;;  %v5094_v44 = vcombine.high %v5092_v42, %v5092_v42 }
0x5821   :  { %v5109_v45 = vcombine.high %v5101_v43, %v5101_v43  ;;  %v5108_v46 = vrot.slane %v5094_v44, %v7094_v9  ;;  %v5115_v49 = vpack.c.bf16 %v5101_v43, %v5101_v43 }
0x5823   :  { %v5116_v10 = vpack.c.bf16 %v5109_v45, %v5109_v45  ;;  %v5110_v47 = vcombine.high %v5108_v46, %v5108_v46  ;;  %v5117_v22 = vpack.c.bf16 %v5108_v46, %v5108_v46 }
0x5825   :  { %5350 = vmatprep.mubr.bf16.mxu0 %v5116_v10  ;;  %v5118_v50 = vpack.c.bf16 %v5110_v47, %v5110_v47 }
0x5826   :  { %5351 = vmatmul.mubr.bf16.vlgmr.msra.gmra.mrb[56].mxu0 %v5115_v49 }
0x5827   :  { %5390 = vmatprep.mubr.bf16.mxu1 %v5118_v50 }
0x5828   :  { %5391 = vmatmul.mubr.bf16.vlgmr.msra.gmra.mrb[56].mxu1 %v5117_v22 }
0x58f9   :  { %v5826_v52 = vpop.f32.mrb[56].mxu0 }
0x58fa   :  { %v5827_v60 = vpop.f32.mrb[57].mxu0 }
0x58fb   :  { %v5828_v61 = vadd.f32 %v5827_v60, %v5826_v52  ;;  %v5829_v63 = vpop.f32.mrb[58].mxu0  ;;  %v5848_v1 = vpop.f32.mrb[56].mxu1 }
0x58fc   :  { %v5830_v2 = vpop.f32.mrb[59].mxu0  ;;  %v5849_v9 = vpop.f32.mrb[57].mxu1 }
0x58fd   :  { %v5353_v14 = vadd.f32 %v5828_v61, %v5589_v57  ;;  %v5850_v3 = vadd.f32 %v5849_v9, %v5848_v1  ;;  %v5851_v4 = vpop.f32.mrb[58].mxu1 }
0x58fe   :  { %v5852_v5 = vpop.f32.mrb[59].mxu1 }
0x58ff   :  { %v5393_v6 = vadd.f32 %v5850_v3, %v5353_v14 }
0x5901   :  { %5398 = vst.msk [vmem:[#allocation9] sm:$0x3] %vm1384_vm3, %v5393_v6 }
0x5902   :  { %6816 = shalt.err (!%p6813_p12)
}
0x5903   :  { %s6817_s18 = scalar_lea.hbm %s7800_s15, 32 }
0x5904   :  { %p6818_p13 = scmp.ne.s32.totalorder %s7800_s15, %s6817_s18  ;;  %p6821_p0 = scmp.lt.u32.totalorder %s6817_s18, %s7800_s15 }
0x5906   :  { %p6823_p1 = pnand %p6821_p0, %p6818_p13 }
0x5908   :  { %6826 = shalt.err (!%p6823_p1)
}
0x5909   :  { %5408 = dma.vmem_to_hbm [thread:$0]  %s5406_s30, 32, %s7800_s15, [#allocation8]  }
0x590a   :  { %6829 = dma.done.wait [#allocation8], 32  }
0x590b   :  { %6830 = vsyncadd [#allocation8], 4294967264 }
0x590c   :  { %5412 = vsyncpa [#allocation7], 1 }
0x590d   :  { %5413 = vsyncpa [#allocation8], 1 }

</bundles_post_ra>
